<compile_context>
chip_gen: v7x
topology: tpu7x:2x2x1
jax: 0.10.0
libtpu: 0.0.40
codegen_flags: <defaults>
</compile_context>

<pallas_src>
import math
import numpy as np
import jax
import jax.numpy as jnp
from jax.experimental import pallas as pl
from jax.experimental.pallas import tpu as pltpu

# --- small test config (original module: dim=512, 16 layers/heads, ffn=2048) ---
NUM_CODEBOOK_VECTORS = 128
NUM_IMAGE_TOKENS = 15              # seq len after prepending SOS token = 16
DIM = 128
NUM_HEADS = 4
HEAD_DIM = DIM // NUM_HEADS
FFN_DIM = 256
NUM_LAYERS = 2
VOCAB = NUM_CODEBOOK_VECTORS + 2   # codebook + mask token + sos token
VOCAB_PAD = ((VOCAB + 127) // 128) * 128   # 256: lane-dense logits writeback
MASK_TOKEN_ID = NUM_CODEBOOK_VECTORS
SOS_TOKEN = NUM_CODEBOOK_VECTORS + 1
LN_EPS = 1e-5
NEG_INF = -1e30


# ----------------------------- in-kernel helpers ------------------------------

def _ln(x, g, b):
    mu = jnp.mean(x, axis=-1, keepdims=True)
    var = jnp.mean((x - mu) ** 2, axis=-1, keepdims=True)
    return (x - mu) * jax.lax.rsqrt(var + LN_EPS) * g + b


# TODO(synk): PyTorch nn.GELU default is exact erf-GELU; tanh-approx used here
# (jax.nn.gelu default) since the transformer internals are not pinned by the task.
def _gelu(x):
    return jax.nn.gelu(x)


# ----------------------------- fused Pallas kernel ----------------------------

def _fused_transformer_kernel(x_ref, bias_ref,
                              wqkv_ref, bqkv_ref, wo_ref, bo_ref,
                              ln1g_ref, ln1b_ref, ln2g_ref, ln2b_ref,
                              w1_ref, b1_ref, w2_ref, b2_ref,
                              hwp_ref, hbp_ref, hlng_ref, hlnb_ref,
                              wout_ref, hbias_ref,
                              o_ref, h_ref):
    """One grid step = one encoder layer; head fused into the last step."""
    l = pl.program_id(0)
    M, D = h_ref.shape

    @pl.when(l == 0)
    def _init():
        h_ref[...] = x_ref[...]

    x = h_ref[...]                                              # (M, D) f32 residual

    # ---- pre-LN multi-head self-attention (heads batched, bf16 MXU matmuls) ----
    hn = _ln(x, ln1g_ref[0], ln1b_ref[0])
    qkv = (jnp.dot(hn.astype(jnp.bfloat16), wqkv_ref[0],        # (M, 3D), f32 acc
                   preferred_element_type=jnp.float32) + bqkv_ref[0])

    # (H, M, HEAD_DIM) per-head stacks; 1/sqrt(head_dim) already folded into Wq.
    qs = jnp.stack([qkv[:, h * HEAD_DIM:(h + 1) * HEAD_DIM]
                    for h in range(NUM_HEADS)], axis=0).astype(jnp.bfloat16)
    ks = jnp.stack([qkv[:, DIM + h * HEAD_DIM:DIM + (h + 1) * HEAD_DIM]
                    for h in range(NUM_HEADS)], axis=0).astype(jnp.bfloat16)
    vs = jnp.stack([qkv[:, 2 * DIM + h * HEAD_DIM:2 * DIM + (h + 1) * HEAD_DIM]
                    for h in range(NUM_HEADS)], axis=0).astype(jnp.bfloat16)

    s = jnp.einsum('hqe,hke->hqk', qs, ks,
                   preferred_element_type=jnp.float32)          # (H, M, M)
    s = s + bias_ref[...][None]            # block-diagonal mask kills cross-batch
    s = s - jnp.max(s, axis=-1, keepdims=True)
    p = jnp.exp(s)
    p = p * pl.reciprocal(jnp.sum(p, axis=-1, keepdims=True), approx=True)
    ctx = jnp.einsum('hqk,hke->hqe', p.astype(jnp.bfloat16), vs,
                     preferred_element_type=jnp.float32)        # (H, M, HEAD_DIM)
    attn = jnp.concatenate([ctx[h] for h in range(NUM_HEADS)], axis=-1)   # (M, D)
    attn = (jnp.dot(attn.astype(jnp.bfloat16), wo_ref[0],
                    preferred_element_type=jnp.float32) + bo_ref[0])
    x = x + attn

    # ---- pre-LN feed-forward ----
    h2 = _ln(x, ln2g_ref[0], ln2b_ref[0])
    f = (jnp.dot(h2.astype(jnp.bfloat16), w1_ref[0],
                 preferred_element_type=jnp.float32) + b1_ref[0])
    f = _gelu(f)
    f = (jnp.dot(f.astype(jnp.bfloat16), w2_ref[0],
                 preferred_element_type=jnp.float32) + b2_ref[0])
    x = x + f
    h_ref[...] = x

    # ---- token-prediction head, fused into the last layer step ----
    @pl.when(l == pl.num_programs(0) - 1)
    def _head():
        t = (jnp.dot(x.astype(jnp.bfloat16), hwp_ref[...],
                     preferred_element_type=jnp.float32) + hbp_ref[...])
        t = _gelu(t)
        t = _ln(t, hlng_ref[...], hlnb_ref[...])
        logits = jnp.dot(t.astype(jnp.bfloat16), wout_ref[...],
                         preferred_element_type=jnp.float32)    # (M, VOCAB_PAD)
        logits = logits.reshape(o_ref.shape[0], o_ref.shape[1], o_ref.shape[2])
        o_ref[...] = logits + hbias_ref[...][None]


# ----------------------------- pallas_call wrapper ----------------------------

def fused_transformer(x_flat, attn_bias, params, B, S):
    M, D = x_flat.shape
    L = params['wqkv'].shape[0]
    F = params['w1'].shape[-1]
    VP = params['w_out'].shape[-1]
    H, HD = NUM_HEADS, HEAD_DIM

    def lyr(shape):                    # per-layer weight: layer grid axis selects it
        nd = len(shape)
        return pl.BlockSpec((1,) + shape, lambda l, _nd=nd: (l,) + (0,) * _nd)

    def fixed(shape):                  # resident across all layer steps
        nd = len(shape)
        return pl.BlockSpec(shape, lambda l, _nd=nd: (0,) * _nd)

    args = (x_flat, attn_bias,
            params['wqkv'], params['bqkv'], params['wo'], params['bo'],
            params['ln1_g'], params['ln1_b'], params['ln2_g'], params['ln2_b'],
            params['w1'], params['b1'], params['w2'], params['b2'],
            params['head_wp'], params['head_bp'], params['head_ln_g'],
            params['head_ln_b'], params['w_out'], params['head_bias'])

    in_specs = [
        fixed((M, D)),                 # activations (read once, l == 0)
        fixed((M, M)),                 # block-diagonal attention bias
        lyr((D, 3 * D)), lyr((1, 3 * D)),
        lyr((D, D)), lyr((1, D)),
        lyr((1, D)), lyr((1, D)), lyr((1, D)), lyr((1, D)),
        lyr((D, F)), lyr((1, F)),
        lyr((F, D)), lyr((1, D)),
        fixed((D, D)), fixed((1, D)), fixed((1, D)), fixed((1, D)),
        fixed((D, VP)), fixed((S, VP)),
    ]

    matmul_flops_per_layer = (2 * M * D * (3 * D) + 4 * H * M * M * HD
                              + 2 * M * D * D + 4 * M * D * F)
    head_flops = 2 * M * D * D + 2 * M * D * VP
    ce = pl.CostEstimate(
        flops=L * matmul_flops_per_layer + head_flops,
        transcendentals=L * (H * M * M + M * F) + M * D,
        bytes_accessed=sum(int(np.prod(a.shape)) * a.dtype.itemsize for a in args)
                       + B * S * VP * 4,
    )

    # TODO(synk): at production dims (D=512, FFN=2048, L=16) re-derive the VMEM
    # budget for v7x's 64 MiB physical VMEM (bf16 weights + double-buffered layer
    # weight DMAs must fit); 48 MiB is safe on v5e/v6e/v7x for this config.
    return pl.pallas_call(
        _fused_transformer_kernel,
        out_shape=jax.ShapeDtypeStruct((B, S, VP), jnp.float32),
        grid=(L,),
        in_specs=in_specs,
        out_specs=pl.BlockSpec((B, S, VP), lambda l: (0, 0, 0)),
        scratch_shapes=[pltpu.VMEM((M, D), jnp.float32)],
        compiler_params=pltpu.CompilerParams(
            dimension_semantics=("arbitrary",),      # layer axis is sequential
            vmem_limit_bytes=48 * 1024 * 1024),
        cost_estimate=ce,
    )(*args)


# ----------------------------- transformer forward ----------------------------

@jax.jit
def bidirectional_transformer(tokens, params):
    B, S = tokens.shape
    x = params['tok_emb'][tokens] + params['pos_emb'][None, :S, :]
    # embedding LayerNorm (glue, tiny); dropout(p=0.1) is identity at inference.
    mu = jnp.mean(x, axis=-1, keepdims=True)
    var = jnp.mean((x - mu) ** 2, axis=-1, keepdims=True)
    x = (x - mu) * jax.lax.rsqrt(var + LN_EPS) * params['ln0_g'] + params['ln0_b']
    x_flat = x.reshape(B * S, DIM).astype(jnp.float32)

    # additive block-diagonal mask: batch is folded into the M dim, so attention
    # across different batch elements is suppressed (exact: exp(-1e30) == 0).
    pos = jnp.arange(B * S, dtype=jnp.int32) // S
    attn_bias = jnp.where(pos[:, None] == pos[None, :], 0.0, NEG_INF).astype(jnp.float32)

    logits_padded = fused_transformer(x_flat, attn_bias, params, B, S)
    return logits_padded[..., :VOCAB]    # drop the lane padding (130 -> VOCAB)


def vq_transformer_forward(z_indices, params, key_mask, r=None, rng=None):
    """Mirrors VQTransformer.forward: returns (logits, target, a_indices)."""
    B = z_indices.shape[0]
    z = z_indices.reshape(B, -1).astype(jnp.int32)      # 'b ... -> b (...)'
    N = z.shape[1]
    sos = jnp.full((B, 1), SOS_TOKEN, dtype=jnp.int32)

    if r is None:
        # Host-side draw like the reference's np.random.uniform(); r must be a
        # static Python int because top_k needs a static k (no device sync).
        rng = np.random.default_rng(0) if rng is None else rng
        r = math.floor(math.cos(float(rng.uniform()) * math.pi / 2.0) * N)  # cosine gamma

    noise = jax.random.uniform(key_mask, (B, N))
    mask = jnp.zeros((B, N), dtype=bool)
    if r > 0:
        _, idx = jax.lax.top_k(noise, r)                 # torch.rand(...).topk(r).indices
        mask = mask.at[jnp.arange(B)[:, None], idx].set(True)

    # reference: a_indices = mask * z_indices + ~mask * masked_indices
    # (keep the original token where mask is True, mask token elsewhere)
    a = jnp.where(mask, z, MASK_TOKEN_ID).astype(jnp.int32)
    a_indices = jnp.concatenate([sos, a], axis=1)
    target = jnp.concatenate([sos, z], axis=1)
    logits = bidirectional_transformer(a_indices, params)
    return logits, target, a_indices


# ----------------------------- deterministic params ---------------------------

def init_params(key):
    keys = iter(jax.random.split(key, 256))

    def w(shape):
        return 0.02 * jax.random.normal(next(keys), shape, jnp.float32)

    S = NUM_IMAGE_TOKENS + 1
    scale = 1.0 / math.sqrt(HEAD_DIM)

    tok_emb = w((VOCAB, DIM))

    wqkv, bqkv, wo, bo = [], [], [], []
    ln1g, ln1b, ln2g, ln2b = [], [], [], []
    w1, b1, w2, b2 = [], [], [], []
    for _ in range(NUM_LAYERS):
        # fold the 1/sqrt(head_dim) attention scale into Wq (bias is zero).
        wq = w((DIM, DIM)) * scale
        wk = w((DIM, DIM))
        wv = w((DIM, DIM))
        wqkv.append(jnp.concatenate([wq, wk, wv], axis=1))
        bqkv.append(jnp.zeros((1, 3 * DIM), jnp.float32))
        wo.append(w((DIM, DIM)))
        bo.append(jnp.zeros((1, DIM), jnp.float32))
        ln1g.append(jnp.ones((1, DIM), jnp.float32))
        ln1b.append(jnp.zeros((1, DIM), jnp.float32))
        ln2g.append(jnp.ones((1, DIM), jnp.float32))
        ln2b.append(jnp.zeros((1, DIM), jnp.float32))
        w1.append(w((DIM, FFN_DIM)))
        b1.append(jnp.zeros((1, FFN_DIM), jnp.float32))
        w2.append(w((FFN_DIM, DIM)))
        b2.append(jnp.zeros((1, DIM), jnp.float32))

    st = lambda xs: jnp.stack(xs, axis=0)
    params = {
        'tok_emb': tok_emb,
        'pos_emb': w((S, DIM)),
        'ln0_g': jnp.ones((DIM,), jnp.float32),
        'ln0_b': jnp.zeros((DIM,), jnp.float32),
        # stacked per-layer weights (leading layer axis) for the fused kernel;
        # matmul weights bf16, LN/bias params f32.
        'wqkv': st(wqkv).astype(jnp.bfloat16), 'bqkv': st(bqkv),
        'wo': st(wo).astype(jnp.bfloat16), 'bo': st(bo),
        'ln1_g': st(ln1g), 'ln1_b': st(ln1b),
        'ln2_g': st(ln2g), 'ln2_b': st(ln2b),
        'w1': st(w1).astype(jnp.bfloat16), 'b1': st(b1),
        'w2': st(w2).astype(jnp.bfloat16), 'b2': st(b2),
        # token-prediction head; weight-tied output projection + per-position bias,
        # padded to a 128-multiple lane width (130 -> 256) for lane-dense writeback.
        'head_wp': w((DIM, DIM)).astype(jnp.bfloat16),
        'head_bp': jnp.zeros((1, DIM), jnp.float32),
        'head_ln_g': jnp.ones((1, DIM), jnp.float32),
        'head_ln_b': jnp.zeros((1, DIM), jnp.float32),
        'w_out': jnp.pad(tok_emb.T, ((0, 0), (0, VOCAB_PAD - VOCAB))).astype(jnp.bfloat16),
        'head_bias': jnp.pad(jnp.zeros((S, VOCAB), jnp.float32),
                             ((0, 0), (0, VOCAB_PAD - VOCAB))),
    }
    return params


# ----------------------------------- main --------------------------------------

if __name__ == "__main__":
    key = jax.random.PRNGKey(0)
    kp, kz, km = jax.random.split(key, 3)

    params = init_params(kp)
    # z_indices as produced by the VQ-VAE encoder: (B, h, w) codebook ids.
    z_indices = jax.random.randint(kz, (2, 3, 5), 0, NUM_CODEBOOK_VECTORS,
                                   dtype=jnp.int32)

    logits, target, a_indices = vq_transformer_forward(
        z_indices, params, km, rng=np.random.default_rng(0))
    jax.block_until_ready((logits, target, a_indices))

    S = NUM_IMAGE_TOKENS + 1
    assert logits.shape == (2, S, VOCAB) and logits.dtype == jnp.float32
    assert target.shape == (2, S) and a_indices.shape == (2, S)
    assert bool(jnp.all(target[:, 0] == SOS_TOKEN))
    assert bool(jnp.all(jnp.isfinite(logits)))
    print("KERNEL_OK")
</pallas_src>

<mosaic_0001>
module attributes {stable_mosaic.version = 11 : i64} {
  func.func @_fused_transformer_kernel(%arg0: i32, %arg1: memref<32x128xf32, #tpu.memory_space<vmem>>, %arg2: memref<32x32xf32, #tpu.memory_space<vmem>>, %arg3: memref<1x128x384xbf16, #tpu.memory_space<vmem>>, %arg4: memref<1x1x384xf32, #tpu.memory_space<vmem>>, %arg5: memref<1x128x128xbf16, #tpu.memory_space<vmem>>, %arg6: memref<1x1x128xf32, #tpu.memory_space<vmem>>, %arg7: memref<1x1x128xf32, #tpu.memory_space<vmem>>, %arg8: memref<1x1x128xf32, #tpu.memory_space<vmem>>, %arg9: memref<1x1x128xf32, #tpu.memory_space<vmem>>, %arg10: memref<1x1x128xf32, #tpu.memory_space<vmem>>, %arg11: memref<1x128x256xbf16, #tpu.memory_space<vmem>>, %arg12: memref<1x1x256xf32, #tpu.memory_space<vmem>>, %arg13: memref<1x256x128xbf16, #tpu.memory_space<vmem>>, %arg14: memref<1x1x128xf32, #tpu.memory_space<vmem>>, %arg15: memref<128x128xbf16, #tpu.memory_space<vmem>>, %arg16: memref<1x128xf32, #tpu.memory_space<vmem>>, %arg17: memref<1x128xf32, #tpu.memory_space<vmem>>, %arg18: memref<1x128xf32, #tpu.memory_space<vmem>>, %arg19: memref<128x256xbf16, #tpu.memory_space<vmem>>, %arg20: memref<16x256xf32, #tpu.memory_space<vmem>>, %arg21: memref<2x16x256xf32, #tpu.memory_space<vmem>>, %arg22: memref<32x128xf32, #tpu.memory_space<vmem>>) attributes {dimension_semantics = [#tpu.dimension_semantics<arbitrary>], iteration_bounds = array<i64: 2>, scalar_prefetch = 0 : i64, scratch_operands = 1 : i64, tpu.core_type = #tpu.core_type<tc>, window_params = [{pipeline_mode = #tpu.pipeline_mode<synchronous>, transform_indices = @transform_0, window_bounds = array<i64: 32, 128>}, {pipeline_mode = #tpu.pipeline_mode<synchronous>, transform_indices = @transform_1, window_bounds = array<i64: 32, 32>}, {transform_indices = @transform_2, window_bounds = array<i64: 1, 128, 384>}, {transform_indices = @transform_3, window_bounds = array<i64: 1, 1, 384>}, {transform_indices = @transform_4, window_bounds = array<i64: 1, 128, 128>}, {transform_indices = @transform_5, window_bounds = array<i64: 1, 1, 128>}, {transform_indices = @transform_6, window_bounds = array<i64: 1, 1, 128>}, {transform_indices = @transform_7, window_bounds = array<i64: 1, 1, 128>}, {transform_indices = @transform_8, window_bounds = array<i64: 1, 1, 128>}, {transform_indices = @transform_9, window_bounds = array<i64: 1, 1, 128>}, {transform_indices = @transform_10, window_bounds = array<i64: 1, 128, 256>}, {transform_indices = @transform_11, window_bounds = array<i64: 1, 1, 256>}, {transform_indices = @transform_12, window_bounds = array<i64: 1, 256, 128>}, {transform_indices = @transform_13, window_bounds = array<i64: 1, 1, 128>}, {pipeline_mode = #tpu.pipeline_mode<synchronous>, transform_indices = @transform_14, window_bounds = array<i64: 128, 128>}, {pipeline_mode = #tpu.pipeline_mode<synchronous>, transform_indices = @transform_15, window_bounds = array<i64: 1, 128>}, {pipeline_mode = #tpu.pipeline_mode<synchronous>, transform_indices = @transform_16, window_bounds = array<i64: 1, 128>}, {pipeline_mode = #tpu.pipeline_mode<synchronous>, transform_indices = @transform_17, window_bounds = array<i64: 1, 128>}, {pipeline_mode = #tpu.pipeline_mode<synchronous>, transform_indices = @transform_18, window_bounds = array<i64: 128, 256>}, {pipeline_mode = #tpu.pipeline_mode<synchronous>, transform_indices = @transform_19, window_bounds = array<i64: 16, 256>}, {pipeline_mode = #tpu.pipeline_mode<synchronous>, transform_indices = @transform_20, window_bounds = array<i64: 2, 16, 256>}]} {
    %c0_i32 = arith.constant 0 : i32
    %0 = arith.cmpi eq, %arg0, %c0_i32 : i32
    %1 = arith.extui %0 : i1 to i32
    %c0_i32_0 = arith.constant 0 : i32
    %2 = arith.cmpi ne, %1, %c0_i32_0 : i32
    scf.if %2 {
      %c0_64 = arith.constant 0 : index
      %c0_65 = arith.constant 0 : index
      %163 = vector.load %arg1[%c0_64, %c0_65] : memref<32x128xf32, #tpu.memory_space<vmem>>, vector<32x128xf32>
      %c0_66 = arith.constant 0 : index
      %c0_67 = arith.constant 0 : index
      %164 = vector.load %arg22[%c0_66, %c0_67] : memref<32x128xf32, #tpu.memory_space<vmem>>, vector<32x128xf32>
      tpu.vector_store %arg22[%c0_66, %c0_67], %163 {strides = array<i32>} : memref<32x128xf32, #tpu.memory_space<vmem>>, vector<32x128xf32>,
    } else {
    }
    %c0 = arith.constant 0 : index
    %c0_1 = arith.constant 0 : index
    %3 = vector.load %arg22[%c0, %c0_1] : memref<32x128xf32, #tpu.memory_space<vmem>>, vector<32x128xf32>
    %c0_2 = arith.constant 0 : index
    %c0_3 = arith.constant 0 : index
    %c0_4 = arith.constant 0 : index
    %4 = vector.load %arg7[%c0_2, %c0_3, %c0_4] : memref<1x1x128xf32, #tpu.memory_space<vmem>>, vector<1x1x128xf32>
    %5 = vector.shape_cast %4 : vector<1x1x128xf32> to vector<1x128xf32>
    %c0_5 = arith.constant 0 : index
    %c0_6 = arith.constant 0 : index
    %c0_7 = arith.constant 0 : index
    %6 = vector.load %arg8[%c0_5, %c0_6, %c0_7] : memref<1x1x128xf32, #tpu.memory_space<vmem>>, vector<1x1x128xf32>
    %7 = vector.shape_cast %6 : vector<1x1x128xf32> to vector<1x128xf32>
    %cst = arith.constant dense<0.000000e+00> : vector<32xf32>
    %8 = vector.multi_reduction <add>, %3, %cst [1] : vector<32x128xf32> to vector<32xf32>
    %9 = vector.shape_cast %8 : vector<32xf32> to vector<32x1xf32>
    %cst_8 = arith.constant 1.280000e+02 : f32
    %10 = vector.broadcast %cst_8 : f32 to vector<32x1xf32>
    %11 = arith.divf %9, %10 : vector<32x1xf32>
    %12 = vector.broadcast %11 : vector<32x1xf32> to vector<32x128xf32>
    %13 = arith.subf %3, %12 : vector<32x128xf32>
    %14 = arith.mulf %13, %13 : vector<32x128xf32>
    %cst_9 = arith.constant dense<0.000000e+00> : vector<32xf32>
    %15 = vector.multi_reduction <add>, %14, %cst_9 [1] : vector<32x128xf32> to vector<32xf32>
    %16 = vector.shape_cast %15 : vector<32xf32> to vector<32x1xf32>
    %cst_10 = arith.constant 1.280000e+02 : f32
    %17 = vector.broadcast %cst_10 : f32 to vector<32x1xf32>
    %18 = arith.divf %16, %17 : vector<32x1xf32>
    %19 = vector.broadcast %11 : vector<32x1xf32> to vector<32x128xf32>
    %20 = arith.subf %3, %19 : vector<32x128xf32>
    %cst_11 = arith.constant 9.99999974E-6 : f32
    %21 = vector.broadcast %cst_11 : f32 to vector<32x1xf32>
    %22 = arith.addf %18, %21 : vector<32x1xf32>
    %23 = math.rsqrt %22 : vector<32x1xf32>
    %24 = vector.broadcast %23 : vector<32x1xf32> to vector<32x128xf32>
    %25 = arith.mulf %20, %24 : vector<32x128xf32>
    %26 = vector.broadcast %5 : vector<1x128xf32> to vector<32x128xf32>
    %27 = arith.mulf %25, %26 : vector<32x128xf32>
    %28 = vector.broadcast %7 : vector<1x128xf32> to vector<32x128xf32>
    %29 = arith.addf %27, %28 : vector<32x128xf32>
    %30 = arith.truncf %29 : vector<32x128xf32> to vector<32x128xbf16>
    %c0_12 = arith.constant 0 : index
    %c0_13 = arith.constant 0 : index
    %c0_14 = arith.constant 0 : index
    %31 = vector.load %arg3[%c0_12, %c0_13, %c0_14] : memref<1x128x384xbf16, #tpu.memory_space<vmem>>, vector<1x128x384xbf16>
    %32 = vector.shape_cast %31 : vector<1x128x384xbf16> to vector<128x384xbf16>
    %cst_15 = arith.constant dense<0.000000e+00> : vector<32x384xf32>
    %33 = tpu.matmul %30, %32, %cst_15 {dimension_numbers = #tpu.dot_dimension_numbers<[1], [0], [0], [1], [0, 0, 1, 1], [], []>} : vector<32x128xbf16>, vector<128x384xbf16>, vector<32x384xf32> -> vector<32x384xf32>
    %c0_16 = arith.constant 0 : index
    %c0_17 = arith.constant 0 : index
    %c0_18 = arith.constant 0 : index
    %34 = vector.load %arg4[%c0_16, %c0_17, %c0_18] : memref<1x1x384xf32, #tpu.memory_space<vmem>>, vector<1x1x384xf32>
    %35 = vector.shape_cast %34 : vector<1x1x384xf32> to vector<1x384xf32>
    %36 = vector.broadcast %35 : vector<1x384xf32> to vector<32x384xf32>
    %37 = arith.addf %33, %36 : vector<32x384xf32>
    %38 = vector.extract_strided_slice %37 {offsets = [0, 0], sizes = [32, 32], strides = [1, 1]} : vector<32x384xf32> to vector<32x32xf32>
    %39 = vector.extract_strided_slice %37 {offsets = [0, 32], sizes = [32, 32], strides = [1, 1]} : vector<32x384xf32> to vector<32x32xf32>
    %40 = vector.extract_strided_slice %37 {offsets = [0, 64], sizes = [32, 32], strides = [1, 1]} : vector<32x384xf32> to vector<32x32xf32>
    %41 = vector.extract_strided_slice %37 {offsets = [0, 96], sizes = [32, 32], strides = [1, 1]} : vector<32x384xf32> to vector<32x32xf32>
    %42 = vector.shape_cast %38 : vector<32x32xf32> to vector<1x32x32xf32>
    %43 = vector.shape_cast %39 : vector<32x32xf32> to vector<1x32x32xf32>
    %44 = vector.shape_cast %40 : vector<32x32xf32> to vector<1x32x32xf32>
    %45 = vector.shape_cast %41 : vector<32x32xf32> to vector<1x32x32xf32>
    %46 = tpu.concatenate %42, %43, %44, %45 in 0 : vector<1x32x32xf32>, vector<1x32x32xf32>, vector<1x32x32xf32>, vector<1x32x32xf32> -> vector<4x32x32xf32>
    %47 = arith.truncf %46 : vector<4x32x32xf32> to vector<4x32x32xbf16>
    %48 = vector.extract_strided_slice %37 {offsets = [0, 128], sizes = [32, 32], strides = [1, 1]} : vector<32x384xf32> to vector<32x32xf32>
    %49 = vector.extract_strided_slice %37 {offsets = [0, 160], sizes = [32, 32], strides = [1, 1]} : vector<32x384xf32> to vector<32x32xf32>
    %50 = vector.extract_strided_slice %37 {offsets = [0, 192], sizes = [32, 32], strides = [1, 1]} : vector<32x384xf32> to vector<32x32xf32>
    %51 = vector.extract_strided_slice %37 {offsets = [0, 224], sizes = [32, 32], strides = [1, 1]} : vector<32x384xf32> to vector<32x32xf32>
    %52 = vector.shape_cast %48 : vector<32x32xf32> to vector<1x32x32xf32>
    %53 = vector.shape_cast %49 : vector<32x32xf32> to vector<1x32x32xf32>
    %54 = vector.shape_cast %50 : vector<32x32xf32> to vector<1x32x32xf32>
    %55 = vector.shape_cast %51 : vector<32x32xf32> to vector<1x32x32xf32>
    %56 = tpu.concatenate %52, %53, %54, %55 in 0 : vector<1x32x32xf32>, vector<1x32x32xf32>, vector<1x32x32xf32>, vector<1x32x32xf32> -> vector<4x32x32xf32>
    %57 = arith.truncf %56 : vector<4x32x32xf32> to vector<4x32x32xbf16>
    %58 = vector.extract_strided_slice %37 {offsets = [0, 256], sizes = [32, 32], strides = [1, 1]} : vector<32x384xf32> to vector<32x32xf32>
    %59 = vector.extract_strided_slice %37 {offsets = [0, 288], sizes = [32, 32], strides = [1, 1]} : vector<32x384xf32> to vector<32x32xf32>
    %60 = vector.extract_strided_slice %37 {offsets = [0, 320], sizes = [32, 32], strides = [1, 1]} : vector<32x384xf32> to vector<32x32xf32>
    %61 = vector.extract_strided_slice %37 {offsets = [0, 352], sizes = [32, 32], strides = [1, 1]} : vector<32x384xf32> to vector<32x32xf32>
    %62 = vector.shape_cast %58 : vector<32x32xf32> to vector<1x32x32xf32>
    %63 = vector.shape_cast %59 : vector<32x32xf32> to vector<1x32x32xf32>
    %64 = vector.shape_cast %60 : vector<32x32xf32> to vector<1x32x32xf32>
    %65 = vector.shape_cast %61 : vector<32x32xf32> to vector<1x32x32xf32>
    %66 = tpu.concatenate %62, %63, %64, %65 in 0 : vector<1x32x32xf32>, vector<1x32x32xf32>, vector<1x32x32xf32>, vector<1x32x32xf32> -> vector<4x32x32xf32>
    %67 = arith.truncf %66 : vector<4x32x32xf32> to vector<4x32x32xbf16>
    "tpu.trace_start"() <{level = 10 : i32, message = "hqe,hke->hqk"}> : () -> ()
    %cst_19 = arith.constant dense<0.000000e+00> : vector<4x32x32xf32>
    %68 = tpu.matmul %47, %57, %cst_19 {dimension_numbers = #tpu.dot_dimension_numbers<[2], [2], [1], [1], [0, 0, 0, 1, 1, 1], [0], [0]>} : vector<4x32x32xbf16>, vector<4x32x32xbf16>, vector<4x32x32xf32> -> vector<4x32x32xf32>
    "tpu.trace_stop"() : () -> ()
    %c0_20 = arith.constant 0 : index
    %c0_21 = arith.constant 0 : index
    %69 = vector.load %arg2[%c0_20, %c0_21] : memref<32x32xf32, #tpu.memory_space<vmem>>, vector<32x32xf32>
    %70 = vector.shape_cast %69 : vector<32x32xf32> to vector<1x32x32xf32>
    %71 = vector.broadcast %70 : vector<1x32x32xf32> to vector<4x32x32xf32>
    %72 = arith.addf %68, %71 : vector<4x32x32xf32>
    %cst_22 = arith.constant dense<0xFF800000> : vector<4x32xf32>
    %73 = vector.multi_reduction <maximumf>, %72, %cst_22 [2] : vector<4x32x32xf32> to vector<4x32xf32>
    %74 = vector.shape_cast %73 : vector<4x32xf32> to vector<4x32x1xf32>
    %75 = vector.broadcast %74 : vector<4x32x1xf32> to vector<4x32x32xf32>
    %76 = arith.subf %72, %75 : vector<4x32x32xf32>
    %77 = math.exp %76 : vector<4x32x32xf32>
    %cst_23 = arith.constant dense<0.000000e+00> : vector<4x32xf32>
    %78 = vector.multi_reduction <add>, %77, %cst_23 [2] : vector<4x32x32xf32> to vector<4x32xf32>
    %79 = vector.shape_cast %78 : vector<4x32xf32> to vector<4x32x1xf32>
    %80 = tpu.reciprocal %79 {approx = true} : vector<4x32x1xf32> -> vector<4x32x1xf32>
    %81 = vector.broadcast %80 : vector<4x32x1xf32> to vector<4x32x32xf32>
    %82 = arith.mulf %77, %81 : vector<4x32x32xf32>
    %83 = arith.truncf %82 : vector<4x32x32xf32> to vector<4x32x32xbf16>
    "tpu.trace_start"() <{level = 10 : i32, message = "hqk,hke->hqe"}> : () -> ()
    %cst_24 = arith.constant dense<0.000000e+00> : vector<4x32x32xf32>
    %84 = tpu.matmul %83, %67, %cst_24 {dimension_numbers = #tpu.dot_dimension_numbers<[2], [1], [1], [2], [0, 0, 0, 1, 1, 2], [0], [0]>} : vector<4x32x32xbf16>, vector<4x32x32xbf16>, vector<4x32x32xf32> -> vector<4x32x32xf32>
    "tpu.trace_stop"() : () -> ()
    %85 = vector.extract_strided_slice %84 {offsets = [0, 0, 0], sizes = [1, 32, 32], strides = [1, 1, 1]} : vector<4x32x32xf32> to vector<1x32x32xf32>
    %86 = vector.shape_cast %85 : vector<1x32x32xf32> to vector<32x32xf32>
    %87 = vector.extract_strided_slice %84 {offsets = [1, 0, 0], sizes = [1, 32, 32], strides = [1, 1, 1]} : vector<4x32x32xf32> to vector<1x32x32xf32>
    %88 = vector.shape_cast %87 : vector<1x32x32xf32> to vector<32x32xf32>
    %89 = vector.extract_strided_slice %84 {offsets = [2, 0, 0], sizes = [1, 32, 32], strides = [1, 1, 1]} : vector<4x32x32xf32> to vector<1x32x32xf32>
    %90 = vector.shape_cast %89 : vector<1x32x32xf32> to vector<32x32xf32>
    %91 = vector.extract_strided_slice %84 {offsets = [3, 0, 0], sizes = [1, 32, 32], strides = [1, 1, 1]} : vector<4x32x32xf32> to vector<1x32x32xf32>
    %92 = vector.shape_cast %91 : vector<1x32x32xf32> to vector<32x32xf32>
    %93 = tpu.concatenate %86, %88, %90, %92 in 1 : vector<32x32xf32>, vector<32x32xf32>, vector<32x32xf32>, vector<32x32xf32> -> vector<32x128xf32>
    %94 = arith.truncf %93 : vector<32x128xf32> to vector<32x128xbf16>
    %c0_25 = arith.constant 0 : index
    %c0_26 = arith.constant 0 : index
    %c0_27 = arith.constant 0 : index
    %95 = vector.load %arg5[%c0_25, %c0_26, %c0_27] : memref<1x128x128xbf16, #tpu.memory_space<vmem>>, vector<1x128x128xbf16>
    %96 = vector.shape_cast %95 : vector<1x128x128xbf16> to vector<128x128xbf16>
    %cst_28 = arith.constant dense<0.000000e+00> : vector<32x128xf32>
    %97 = tpu.matmul %94, %96, %cst_28 {dimension_numbers = #tpu.dot_dimension_numbers<[1], [0], [0], [1], [0, 0, 1, 1], [], []>} : vector<32x128xbf16>, vector<128x128xbf16>, vector<32x128xf32> -> vector<32x128xf32>
    %c0_29 = arith.constant 0 : index
    %c0_30 = arith.constant 0 : index
    %c0_31 = arith.constant 0 : index
    %98 = vector.load %arg6[%c0_29, %c0_30, %c0_31] : memref<1x1x128xf32, #tpu.memory_space<vmem>>, vector<1x1x128xf32>
    %99 = vector.shape_cast %98 : vector<1x1x128xf32> to vector<1x128xf32>
    %100 = vector.broadcast %99 : vector<1x128xf32> to vector<32x128xf32>
    %101 = arith.addf %97, %100 : vector<32x128xf32>
    %102 = arith.addf %3, %101 : vector<32x128xf32>
    %c0_32 = arith.constant 0 : index
    %c0_33 = arith.constant 0 : index
    %c0_34 = arith.constant 0 : index
    %103 = vector.load %arg9[%c0_32, %c0_33, %c0_34] : memref<1x1x128xf32, #tpu.memory_space<vmem>>, vector<1x1x128xf32>
    %104 = vector.shape_cast %103 : vector<1x1x128xf32> to vector<1x128xf32>
    %c0_35 = arith.constant 0 : index
    %c0_36 = arith.constant 0 : index
    %c0_37 = arith.constant 0 : index
    %105 = vector.load %arg10[%c0_35, %c0_36, %c0_37] : memref<1x1x128xf32, #tpu.memory_space<vmem>>, vector<1x1x128xf32>
    %106 = vector.shape_cast %105 : vector<1x1x128xf32> to vector<1x128xf32>
    %cst_38 = arith.constant dense<0.000000e+00> : vector<32xf32>
    %107 = vector.multi_reduction <add>, %102, %cst_38 [1] : vector<32x128xf32> to vector<32xf32>
    %108 = vector.shape_cast %107 : vector<32xf32> to vector<32x1xf32>
    %cst_39 = arith.constant 1.280000e+02 : f32
    %109 = vector.broadcast %cst_39 : f32 to vector<32x1xf32>
    %110 = arith.divf %108, %109 : vector<32x1xf32>
    %111 = vector.broadcast %110 : vector<32x1xf32> to vector<32x128xf32>
    %112 = arith.subf %102, %111 : vector<32x128xf32>
    %113 = arith.mulf %112, %112 : vector<32x128xf32>
    %cst_40 = arith.constant dense<0.000000e+00> : vector<32xf32>
    %114 = vector.multi_reduction <add>, %113, %cst_40 [1] : vector<32x128xf32> to vector<32xf32>
    %115 = vector.shape_cast %114 : vector<32xf32> to vector<32x1xf32>
    %cst_41 = arith.constant 1.280000e+02 : f32
    %116 = vector.broadcast %cst_41 : f32 to vector<32x1xf32>
    %117 = arith.divf %115, %116 : vector<32x1xf32>
    %118 = vector.broadcast %110 : vector<32x1xf32> to vector<32x128xf32>
    %119 = arith.subf %102, %118 : vector<32x128xf32>
    %cst_42 = arith.constant 9.99999974E-6 : f32
    %120 = vector.broadcast %cst_42 : f32 to vector<32x1xf32>
    %121 = arith.addf %117, %120 : vector<32x1xf32>
    %122 = math.rsqrt %121 : vector<32x1xf32>
    %123 = vector.broadcast %122 : vector<32x1xf32> to vector<32x128xf32>
    %124 = arith.mulf %119, %123 : vector<32x128xf32>
    %125 = vector.broadcast %104 : vector<1x128xf32> to vector<32x128xf32>
    %126 = arith.mulf %124, %125 : vector<32x128xf32>
    %127 = vector.broadcast %106 : vector<1x128xf32> to vector<32x128xf32>
    %128 = arith.addf %126, %127 : vector<32x128xf32>
    %129 = arith.truncf %128 : vector<32x128xf32> to vector<32x128xbf16>
    %c0_43 = arith.constant 0 : index
    %c0_44 = arith.constant 0 : index
    %c0_45 = arith.constant 0 : index
    %130 = vector.load %arg11[%c0_43, %c0_44, %c0_45] : memref<1x128x256xbf16, #tpu.memory_space<vmem>>, vector<1x128x256xbf16>
    %131 = vector.shape_cast %130 : vector<1x128x256xbf16> to vector<128x256xbf16>
    %cst_46 = arith.constant dense<0.000000e+00> : vector<32x256xf32>
    %132 = tpu.matmul %129, %131, %cst_46 {dimension_numbers = #tpu.dot_dimension_numbers<[1], [0], [0], [1], [0, 0, 1, 1], [], []>} : vector<32x128xbf16>, vector<128x256xbf16>, vector<32x256xf32> -> vector<32x256xf32>
    %c0_47 = arith.constant 0 : index
    %c0_48 = arith.constant 0 : index
    %c0_49 = arith.constant 0 : index
    %133 = vector.load %arg12[%c0_47, %c0_48, %c0_49] : memref<1x1x256xf32, #tpu.memory_space<vmem>>, vector<1x1x256xf32>
    %134 = vector.shape_cast %133 : vector<1x1x256xf32> to vector<1x256xf32>
    %135 = vector.broadcast %134 : vector<1x256xf32> to vector<32x256xf32>
    %136 = arith.addf %132, %135 : vector<32x256xf32>
    %137 = arith.mulf %136, %136 : vector<32x256xf32>
    %138 = arith.mulf %136, %137 : vector<32x256xf32>
    %cst_50 = arith.constant 4.471500e-02 : f32
    %139 = vector.broadcast %cst_50 : f32 to vector<32x256xf32>
    %140 = arith.mulf %139, %138 : vector<32x256xf32>
    %141 = arith.addf %136, %140 : vector<32x256xf32>
    %cst_51 = arith.constant 0.797884583 : f32
    %142 = vector.broadcast %cst_51 : f32 to vector<32x256xf32>
    %143 = arith.mulf %142, %141 : vector<32x256xf32>
    %144 = math.tanh %143 : vector<32x256xf32>
    %cst_52 = arith.constant 1.000000e+00 : f32
    %145 = vector.broadcast %cst_52 : f32 to vector<32x256xf32>
    %146 = arith.addf %145, %144 : vector<32x256xf32>
    %cst_53 = arith.constant 5.000000e-01 : f32
    %147 = vector.broadcast %cst_53 : f32 to vector<32x256xf32>
    %148 = arith.mulf %147, %146 : vector<32x256xf32>
    %149 = arith.mulf %136, %148 : vector<32x256xf32>
    %150 = arith.truncf %149 : vector<32x256xf32> to vector<32x256xbf16>
    %c0_54 = arith.constant 0 : index
    %c0_55 = arith.constant 0 : index
    %c0_56 = arith.constant 0 : index
    %151 = vector.load %arg13[%c0_54, %c0_55, %c0_56] : memref<1x256x128xbf16, #tpu.memory_space<vmem>>, vector<1x256x128xbf16>
    %152 = vector.shape_cast %151 : vector<1x256x128xbf16> to vector<256x128xbf16>
    %cst_57 = arith.constant dense<0.000000e+00> : vector<32x128xf32>
    %153 = tpu.matmul %150, %152, %cst_57 {dimension_numbers = #tpu.dot_dimension_numbers<[1], [0], [0], [1], [0, 0, 1, 1], [], []>} : vector<32x256xbf16>, vector<256x128xbf16>, vector<32x128xf32> -> vector<32x128xf32>
    %c0_58 = arith.constant 0 : index
    %c0_59 = arith.constant 0 : index
    %c0_60 = arith.constant 0 : index
    %154 = vector.load %arg14[%c0_58, %c0_59, %c0_60] : memref<1x1x128xf32, #tpu.memory_space<vmem>>, vector<1x1x128xf32>
    %155 = vector.shape_cast %154 : vector<1x1x128xf32> to vector<1x128xf32>
    %156 = vector.broadcast %155 : vector<1x128xf32> to vector<32x128xf32>
    %157 = arith.addf %153, %156 : vector<32x128xf32>
    %158 = arith.addf %102, %157 : vector<32x128xf32>
    %c0_61 = arith.constant 0 : index
    %c0_62 = arith.constant 0 : index
    %159 = vector.load %arg22[%c0_61, %c0_62] : memref<32x128xf32, #tpu.memory_space<vmem>>, vector<32x128xf32>
    tpu.vector_store %arg22[%c0_61, %c0_62], %158 {strides = array<i32>} : memref<32x128xf32, #tpu.memory_space<vmem>>, vector<32x128xf32>,
    %c1_i32 = arith.constant 1 : i32
    %160 = arith.cmpi eq, %arg0, %c1_i32 : i32
    %161 = arith.extui %160 : i1 to i32
    %c0_i32_63 = arith.constant 0 : i32
    %162 = arith.cmpi ne, %161, %c0_i32_63 : i32
    scf.if %162 {
      %163 = arith.truncf %158 : vector<32x128xf32> to vector<32x128xbf16>
      %c0_64 = arith.constant 0 : index
      %c0_65 = arith.constant 0 : index
      %164 = vector.load %arg15[%c0_64, %c0_65] : memref<128x128xbf16, #tpu.memory_space<vmem>>, vector<128x128xbf16>
      %cst_66 = arith.constant dense<0.000000e+00> : vector<32x128xf32>
      %165 = tpu.matmul %163, %164, %cst_66 {dimension_numbers = #tpu.dot_dimension_numbers<[1], [0], [0], [1], [0, 0, 1, 1], [], []>} : vector<32x128xbf16>, vector<128x128xbf16>, vector<32x128xf32> -> vector<32x128xf32>
      %c0_67 = arith.constant 0 : index
      %c0_68 = arith.constant 0 : index
      %166 = vector.load %arg16[%c0_67, %c0_68] : memref<1x128xf32, #tpu.memory_space<vmem>>, vector<1x128xf32>
      %167 = vector.broadcast %166 : vector<1x128xf32> to vector<32x128xf32>
      %168 = arith.addf %165, %167 : vector<32x128xf32>
      %169 = arith.mulf %168, %168 : vector<32x128xf32>
      %170 = arith.mulf %168, %169 : vector<32x128xf32>
      %cst_69 = arith.constant 4.471500e-02 : f32
      %171 = vector.broadcast %cst_69 : f32 to vector<32x128xf32>
      %172 = arith.mulf %171, %170 : vector<32x128xf32>
      %173 = arith.addf %168, %172 : vector<32x128xf32>
      %cst_70 = arith.constant 0.797884583 : f32
      %174 = vector.broadcast %cst_70 : f32 to vector<32x128xf32>
      %175 = arith.mulf %174, %173 : vector<32x128xf32>
      %176 = math.tanh %175 : vector<32x128xf32>
      %cst_71 = arith.constant 1.000000e+00 : f32
      %177 = vector.broadcast %cst_71 : f32 to vector<32x128xf32>
      %178 = arith.addf %177, %176 : vector<32x128xf32>
      %cst_72 = arith.constant 5.000000e-01 : f32
      %179 = vector.broadcast %cst_72 : f32 to vector<32x128xf32>
      %180 = arith.mulf %179, %178 : vector<32x128xf32>
      %181 = arith.mulf %168, %180 : vector<32x128xf32>
      %c0_73 = arith.constant 0 : index
      %c0_74 = arith.constant 0 : index
      %182 = vector.load %arg17[%c0_73, %c0_74] : memref<1x128xf32, #tpu.memory_space<vmem>>, vector<1x128xf32>
      %c0_75 = arith.constant 0 : index
      %c0_76 = arith.constant 0 : index
      %183 = vector.load %arg18[%c0_75, %c0_76] : memref<1x128xf32, #tpu.memory_space<vmem>>, vector<1x128xf32>
      %cst_77 = arith.constant dense<0.000000e+00> : vector<32xf32>
      %184 = vector.multi_reduction <add>, %181, %cst_77 [1] : vector<32x128xf32> to vector<32xf32>
      %185 = vector.shape_cast %184 : vector<32xf32> to vector<32x1xf32>
      %cst_78 = arith.constant 1.280000e+02 : f32
      %186 = vector.broadcast %cst_78 : f32 to vector<32x1xf32>
      %187 = arith.divf %185, %186 : vector<32x1xf32>
      %188 = vector.broadcast %187 : vector<32x1xf32> to vector<32x128xf32>
      %189 = arith.subf %181, %188 : vector<32x128xf32>
      %190 = arith.mulf %189, %189 : vector<32x128xf32>
      %cst_79 = arith.constant dense<0.000000e+00> : vector<32xf32>
      %191 = vector.multi_reduction <add>, %190, %cst_79 [1] : vector<32x128xf32> to vector<32xf32>
      %192 = vector.shape_cast %191 : vector<32xf32> to vector<32x1xf32>
      %cst_80 = arith.constant 1.280000e+02 : f32
      %193 = vector.broadcast %cst_80 : f32 to vector<32x1xf32>
      %194 = arith.divf %192, %193 : vector<32x1xf32>
      %195 = vector.broadcast %187 : vector<32x1xf32> to vector<32x128xf32>
      %196 = arith.subf %181, %195 : vector<32x128xf32>
      %cst_81 = arith.constant 9.99999974E-6 : f32
      %197 = vector.broadcast %cst_81 : f32 to vector<32x1xf32>
      %198 = arith.addf %194, %197 : vector<32x1xf32>
      %199 = math.rsqrt %198 : vector<32x1xf32>
      %200 = vector.broadcast %199 : vector<32x1xf32> to vector<32x128xf32>
      %201 = arith.mulf %196, %200 : vector<32x128xf32>
      %202 = vector.broadcast %182 : vector<1x128xf32> to vector<32x128xf32>
      %203 = arith.mulf %201, %202 : vector<32x128xf32>
      %204 = vector.broadcast %183 : vector<1x128xf32> to vector<32x128xf32>
      %205 = arith.addf %203, %204 : vector<32x128xf32>
      %206 = arith.truncf %205 : vector<32x128xf32> to vector<32x128xbf16>
      %c0_82 = arith.constant 0 : index
      %c0_83 = arith.constant 0 : index
      %207 = vector.load %arg19[%c0_82, %c0_83] : memref<128x256xbf16, #tpu.memory_space<vmem>>, vector<128x256xbf16>
      %cst_84 = arith.constant dense<0.000000e+00> : vector<32x256xf32>
      %208 = tpu.matmul %206, %207, %cst_84 {dimension_numbers = #tpu.dot_dimension_numbers<[1], [0], [0], [1], [0, 0, 1, 1], [], []>} : vector<32x128xbf16>, vector<128x256xbf16>, vector<32x256xf32> -> vector<32x256xf32>
      %209 = vector.shape_cast %208 : vector<32x256xf32> to vector<2x16x256xf32>
      %c0_85 = arith.constant 0 : index
      %c0_86 = arith.constant 0 : index
      %210 = vector.load %arg20[%c0_85, %c0_86] : memref<16x256xf32, #tpu.memory_space<vmem>>, vector<16x256xf32>
      %211 = vector.shape_cast %210 : vector<16x256xf32> to vector<1x16x256xf32>
      %212 = vector.broadcast %211 : vector<1x16x256xf32> to vector<2x16x256xf32>
      %213 = arith.addf %209, %212 : vector<2x16x256xf32>
      %c0_87 = arith.constant 0 : index
      %c0_88 = arith.constant 0 : index
      %c0_89 = arith.constant 0 : index
      %214 = vector.load %arg21[%c0_87, %c0_88, %c0_89] : memref<2x16x256xf32, #tpu.memory_space<vmem>>, vector<2x16x256xf32>
      tpu.vector_store %arg21[%c0_87, %c0_88, %c0_89], %213 {strides = array<i32>} : memref<2x16x256xf32, #tpu.memory_space<vmem>>, vector<2x16x256xf32>,
    } else {
    }
    return
  }
  func.func @transform_0(%arg0: i32) -> (i32, i32) {
    %c0_i32 = arith.constant 0 : i32
    %c0_i32_0 = arith.constant 0 : i32
    %c0_i32_1 = arith.constant 0 : i32
    return %c0_i32, %c0_i32_0 : i32, i32
  }
  func.func @transform_1(%arg0: i32) -> (i32, i32) {
    %c0_i32 = arith.constant 0 : i32
    %c0_i32_0 = arith.constant 0 : i32
    %c0_i32_1 = arith.constant 0 : i32
    return %c0_i32, %c0_i32_0 : i32, i32
  }
  func.func @transform_2(%arg0: i32) -> (i32, i32, i32) {
    %c0_i32 = arith.constant 0 : i32
    %c0_i32_0 = arith.constant 0 : i32
    %c0_i32_1 = arith.constant 0 : i32
    return %arg0, %c0_i32, %c0_i32_0 : i32, i32, i32
  }
  func.func @transform_3(%arg0: i32) -> (i32, i32, i32) {
    %c0_i32 = arith.constant 0 : i32
    %c0_i32_0 = arith.constant 0 : i32
    %c0_i32_1 = arith.constant 0 : i32
    return %arg0, %c0_i32, %c0_i32_0 : i32, i32, i32
  }
  func.func @transform_4(%arg0: i32) -> (i32, i32, i32) {
    %c0_i32 = arith.constant 0 : i32
    %c0_i32_0 = arith.constant 0 : i32
    %c0_i32_1 = arith.constant 0 : i32
    return %arg0, %c0_i32, %c0_i32_0 : i32, i32, i32
  }
  func.func @transform_5(%arg0: i32) -> (i32, i32, i32) {
    %c0_i32 = arith.constant 0 : i32
    %c0_i32_0 = arith.constant 0 : i32
    %c0_i32_1 = arith.constant 0 : i32
    return %arg0, %c0_i32, %c0_i32_0 : i32, i32, i32
  }
  func.func @transform_6(%arg0: i32) -> (i32, i32, i32) {
    %c0_i32 = arith.constant 0 : i32
    %c0_i32_0 = arith.constant 0 : i32
    %c0_i32_1 = arith.constant 0 : i32
    return %arg0, %c0_i32, %c0_i32_0 : i32, i32, i32
  }
  func.func @transform_7(%arg0: i32) -> (i32, i32, i32) {
    %c0_i32 = arith.constant 0 : i32
    %c0_i32_0 = arith.constant 0 : i32
    %c0_i32_1 = arith.constant 0 : i32
    return %arg0, %c0_i32, %c0_i32_0 : i32, i32, i32
  }
  func.func @transform_8(%arg0: i32) -> (i32, i32, i32) {
    %c0_i32 = arith.constant 0 : i32
    %c0_i32_0 = arith.constant 0 : i32
    %c0_i32_1 = arith.constant 0 : i32
    return %arg0, %c0_i32, %c0_i32_0 : i32, i32, i32
  }
  func.func @transform_9(%arg0: i32) -> (i32, i32, i32) {
    %c0_i32 = arith.constant 0 : i32
    %c0_i32_0 = arith.constant 0 : i32
    %c0_i32_1 = arith.constant 0 : i32
    return %arg0, %c0_i32, %c0_i32_0 : i32, i32, i32
  }
  func.func @transform_10(%arg0: i32) -> (i32, i32, i32) {
    %c0_i32 = arith.constant 0 : i32
    %c0_i32_0 = arith.constant 0 : i32
    %c0_i32_1 = arith.constant 0 : i32
    return %arg0, %c0_i32, %c0_i32_0 : i32, i32, i32
  }
  func.func @transform_11(%arg0: i32) -> (i32, i32, i32) {
    %c0_i32 = arith.constant 0 : i32
    %c0_i32_0 = arith.constant 0 : i32
    %c0_i32_1 = arith.constant 0 : i32
    return %arg0, %c0_i32, %c0_i32_0 : i32, i32, i32
  }
  func.func @transform_12(%arg0: i32) -> (i32, i32, i32) {
    %c0_i32 = arith.constant 0 : i32
    %c0_i32_0 = arith.constant 0 : i32
    %c0_i32_1 = arith.constant 0 : i32
    return %arg0, %c0_i32, %c0_i32_0 : i32, i32, i32
  }
  func.func @transform_13(%arg0: i32) -> (i32, i32, i32) {
    %c0_i32 = arith.constant 0 : i32
    %c0_i32_0 = arith.constant 0 : i32
    %c0_i32_1 = arith.constant 0 : i32
    return %arg0, %c0_i32, %c0_i32_0 : i32, i32, i32
  }
  func.func @transform_14(%arg0: i32) -> (i32, i32) {
    %c0_i32 = arith.constant 0 : i32
    %c0_i32_0 = arith.constant 0 : i32
    %c0_i32_1 = arith.constant 0 : i32
    return %c0_i32, %c0_i32_0 : i32, i32
  }
  func.func @transform_15(%arg0: i32) -> (i32, i32) {
    %c0_i32 = arith.constant 0 : i32
    %c0_i32_0 = arith.constant 0 : i32
    %c0_i32_1 = arith.constant 0 : i32
    return %c0_i32, %c0_i32_0 : i32, i32
  }
  func.func @transform_16(%arg0: i32) -> (i32, i32) {
    %c0_i32 = arith.constant 0 : i32
    %c0_i32_0 = arith.constant 0 : i32
    %c0_i32_1 = arith.constant 0 : i32
    return %c0_i32, %c0_i32_0 : i32, i32
  }
  func.func @transform_17(%arg0: i32) -> (i32, i32) {
    %c0_i32 = arith.constant 0 : i32
    %c0_i32_0 = arith.constant 0 : i32
    %c0_i32_1 = arith.constant 0 : i32
    return %c0_i32, %c0_i32_0 : i32, i32
  }
  func.func @transform_18(%arg0: i32) -> (i32, i32) {
    %c0_i32 = arith.constant 0 : i32
    %c0_i32_0 = arith.constant 0 : i32
    %c0_i32_1 = arith.constant 0 : i32
    return %c0_i32, %c0_i32_0 : i32, i32
  }
  func.func @transform_19(%arg0: i32) -> (i32, i32) {
    %c0_i32 = arith.constant 0 : i32
    %c0_i32_0 = arith.constant 0 : i32
    %c0_i32_1 = arith.constant 0 : i32
    return %c0_i32, %c0_i32_0 : i32, i32
  }
  func.func @transform_20(%arg0: i32) -> (i32, i32, i32) {
    %c0_i32 = arith.constant 0 : i32
    %c0_i32_0 = arith.constant 0 : i32
    %c0_i32_1 = arith.constant 0 : i32
    %c0_i32_2 = arith.constant 0 : i32
    return %c0_i32, %c0_i32_0, %c0_i32_1 : i32, i32, i32
  }
}

</mosaic_0001>

<bundles_post_ra>
// kernel: bidirectional_transformer.1
= control target key start
LH: loop header
LB: loop body
LE: loop exit
PB: predicated region body
PF: predicated region fallthrough
CT: control target
= control target key end

     0   :  { %s6235_s0 = inlined_call_operand.vmem [shape: f32[32,128], index: 0, kind: input, shape index: {}]   ;;  %s6236_s1 = inlined_call_operand.vmem [shape: f32[32,32], index: 1, kind: input, shape index: {}]   ;;  %s6237_s2 = inlined_call_operand.vmem [shape: bf16[2,128,384], index: 2, kind: input, shape index: {}]   ;;  %s6238_s3 = inlined_call_operand.hbm [shape: f32[2,1,384], index: 3, kind: input, shape index: {}]   ;;  %s6239_s4 = inlined_call_operand.hbm [shape: bf16[2,128,128], index: 4, kind: input, shape index: {}]   ;;  %s6240_s5 = inlined_call_operand.hbm [shape: f32[2,1,128], index: 5, kind: input, shape index: {}]   ;;  %s6241_s6 = inlined_call_operand.hbm [shape: f32[2,1,128], index: 6, kind: input, shape index: {}]   ;;  %s6242_s7 = inlined_call_operand.hbm [shape: f32[2,1,128], index: 7, kind: input, shape index: {}]   ;;  %s6243_s8 = inlined_call_operand.hbm [shape: f32[2,1,128], index: 8, kind: input, shape index: {}]   ;;  %s6244_s9 = inlined_call_operand.hbm [shape: f32[2,1,128], index: 9, kind: input, shape index: {}]   ;;  %s6245_s10 = inlined_call_operand.vmem [shape: bf16[2,128,256], index: 10, kind: input, shape index: {}]   ;;  %s6246_s11 = inlined_call_operand.vmem [shape: f32[2,1,256], index: 11, kind: input, shape index: {}]   ;;  %s6247_s12 = inlined_call_operand.hbm [shape: bf16[2,256,128], index: 12, kind: input, shape index: {}]   ;;  %s6248_s13 = inlined_call_operand.hbm [shape: f32[2,1,128], index: 13, kind: input, shape index: {}]   ;;  %s6249_s14 = inlined_call_operand.hbm [shape: bf16[128,128], index: 14, kind: input, shape index: {}]   ;;  %s6250_s15 = inlined_call_operand.hbm [shape: f32[1,128], index: 15, kind: input, shape index: {}]   ;;  %s6251_s16 = inlined_call_operand.hbm [shape: f32[1,128], index: 16, kind: input, shape index: {}]   ;;  %s6252_s17 = inlined_call_operand.hbm [shape: f32[1,128], index: 17, kind: input, shape index: {}]   ;;  %s6253_s18 = inlined_call_operand.hbm [shape: bf16[128,256], index: 18, kind: input, shape index: {}]   ;;  %s6254_s19 = inlined_call_operand.hbm [shape: f32[16,256], index: 19, kind: input, shape index: {}]   ;;  %s6255_s20 = inlined_call_operand.hbm [shape: f32[2,16,256], index: 20, kind: output, shape index: {}]  }
   0x1   :  { %6294 = sst [smem:[#allocation43_spill]] %s6235_s0 }
   0x2   :  { %6295 = sst [smem:[#allocation44_spill]] %s6236_s1 }
   0x3   :  { %6296 = sst [smem:[#allocation45_spill]] %s6237_s2 }
   0x4   :  { %6297 = sst [smem:[#allocation46_spill]] %s6238_s3 }
   0x5   :  { %6298 = sst [smem:[#allocation47_spill]] %s6239_s4 }
   0x6   :  { %6299 = sst [smem:[#allocation48_spill]] %s6240_s5 }
   0x7   :  { %6300 = sst [smem:[#allocation49_spill]] %s6241_s6 }
   0x8   :  { %6301 = sst [smem:[#allocation50_spill]] %s6242_s7 }
   0x9   :  { %6302 = sst [smem:[#allocation51_spill]] %s6243_s8 }
   0xa   :  { %6303 = sst [smem:[#allocation52_spill]] %s6244_s9 }
   0xb   :  { %6304 = sst [smem:[#allocation53_spill]] %s6245_s10 }
   0xc   :  { %6305 = sst [smem:[#allocation54_spill]] %s6246_s11 }
   0xd   :  { %6306 = sst [smem:[#allocation55_spill]] %s6247_s12 }
   0xe   :  { %6307 = sst [smem:[#allocation56_spill]] %s6248_s13 }
   0xf   :  { %6308 = sst [smem:[#allocation57_spill]] %s6249_s14 }
  0x10   :  { %6309 = sst [smem:[#allocation58_spill]] %s6250_s15 }
  0x11   :  { %6310 = sst [smem:[#allocation59_spill]] %s6255_s20 }
  0x12   :  { %25 = vsyncpa [#allocation4], 0 }
  0x13   :  { %27 = vsyncpa [#allocation4 + $0x1], 0 }
  0x14   :  { %28 = vsyncpa [#allocation7], 0 }
  0x15   :  { %30 = vsyncpa [#allocation7 + $0x1], 0 }
  0x16   :  { %31 = vsyncpa [#allocation10], 0 }
  0x17   :  { %33 = vsyncpa [#allocation10 + $0x1], 0 }
  0x18   :  { %34 = vsyncpa [#allocation13], 0 }
  0x19   :  { %36 = vsyncpa [#allocation13 + $0x1], 0 }
  0x1a   :  { %37 = vsyncpa [#allocation16], 0 }
  0x1b   :  { %39 = vsyncpa [#allocation16 + $0x1], 0 }
  0x1c   :  { %40 = vsyncpa [#allocation19], 0 }
  0x1d   :  { %41 = vsyncpa [#allocation22], 0 }
  0x1e   :  { %42 = vsyncpa [#allocation25], 0 }
  0x1f   :  { %43 = vsyncpa [#allocation5], 0  ;;  %s5153_s1 = smov 0   ;;  %s5155_s22 = smov 0  }
  0x20   :  { %s5157_s23 = smov 0   ;;  %s5159_s24 = smov 0  }
  0x21 LB: > { %6311 = sst [smem:[#allocation37_spill]] %s5009_s22  ;;  %s5172_s2 = sadd.s32 4294967295, %s5017_s24   ;;  %s5017_s24 = sphi %s5159_s24, %s6380_s24   ;;  %s5013_s23 = sphi %s5157_s23, %s6384_s23   ;;  %s5009_s22 = sphi %s5155_s22, %s6383_s22   ;;  %s5005_s1 = sphi %s5153_s1, %s6381_s1  }
  0x22   : > { %6312 = sst [smem:[#allocation38_spill]] %s5172_s2  ;;  %s5175_s25 = sadd.s32 1, %s5017_s24  }
  0x23   : > { %6313 = sst [smem:[#allocation39_spill]] %s5175_s25  ;;  %s121_s3 = ssub.s32 %s5017_s24, %s5175_s25 }
  0x24   : > { %s124_s26 = sadd.s32 1, %s5013_s23  ;;  %p122_p0 = scmp.eq.s32.totalorder %s121_s3, 0 }
  0x25   : > { %p131_p1 = scmp.ne.s32.totalorder %s5013_s23, %s5009_s22  ;;  %p132_p2 = scmp.eq.s32.totalorder %s5017_s24, 0 }
  0x26   : > { %p137_p3 = scmp.ne.s32.totalorder %s5009_s22, %s5005_s1  ;;  %p6263_p5 = scmp.eq.s32.totalorder %s5172_s2, 0 }
  0x27   : > { %s5185_s27 = scalar_select %p122_p0, %s5013_s23, %s124_s26  }
  0x28   : > { %p5187_p4 = por %p132_p2, %p131_p1  ;;  %p3597_p6 = scmp.ge.s32.totalorder %s5017_s24, 1 }
  0x29   : > { %6314 = sst [smem:[#allocation40_spill]] %s5185_s27  ;;  %p555_p7 = scmp.lt.s32.totalorder %s5017_s24, 3 }
  0x2a   : > { %p5196_p8 = por %p6263_p5, %p137_p3  ;;  %s5019_s30 = smov [#allocation18]  }
  0x2b   : > { %p5201_p10 = pnand %p3597_p6, %p555_p7  ;;  %s573_s0 = sshll.u32 %s5019_s30, 4  ;;  %s574_s0 = int_to_ptr.vmem [resolvable:$true] %s573_s0 }
  0x2c   : > { %s6316_s4 = scalar_select %p5196_p8, 1, 0 }
  0x2d   : > { %s6318_s29 = scalar_select %p5201_p10, 1, 0 }
  0x2e   : > { %6317 = sst [smem:[#allocation41_spill]] %s6316_s4  ;;  %p4025_p11 = pneg %p5201_p10 }
  0x2f   : > { %6319 = sst [smem:[#allocation42_spill]] %s6318_s29  ;;  %p4078_p13 = scmp.lt.s32.totalorder %s5017_s24, 2 }
  0x30   : > { %p5209_p12 = pnand %p4025_p11, %p6263_p5  ;;  %s6322_s14 = sld [smem:[#allocation57_spill]] }
  0x31   : > { %p5216_p0 = pnand %p4078_p13, %p5187_p4 }
  0x32   : > { %s6320_s21 = scalar_select %p5209_p12, 1, 0 }
  0x33   : > { %s6321_s1 = scalar_select %p5216_p0, 1, 0 }
  0x34   : > { %p5228_p2 = pneg %p5209_p12 }
  0x36   : > { %s4487_s27 = scalar_lea.hbm %s6322_s14, 1024 }
  0x37   : > { %p4488_p1 = scmp.ne.s32.totalorder %s6322_s14, %s4487_s27  ;;  %p4494_p6 = scmp.lt.u32.totalorder %s4487_s27, %s6322_s14 }
  0x38   : > { %s6323_s20 = scalar_select %p5228_p2, 1, 0 }
  0x39   : > { %p4490_p3 = pnand %p5228_p2, %p4488_p1 }
  0x3b   : > { %p4491_p4 = pneg %p4490_p3 }
  0x3d   : > { %p4496_p7 = pnand %p4494_p6, %p4491_p4 }
  0x3f   : > { %4499 = shalt.err (!%p4496_p7)
}
  0x40   : > { %s4500_s3 = scalar_lea.vmem %s574_s0, 1024  ;;  %p4508_p5 = scmp.lt.s32.totalorder %s574_s0, %s574_s0 }
  0x41   : > { %p4501_p11 = scmp.ne.s32.totalorder %s574_s0, %s4500_s3  ;;  %p4509_p8 = scmp.lt.s32.totalorder %s4500_s3, %s4500_s3 }
  0x43   : > { %p4503_p13 = pnand %p4501_p11, %p5228_p2  ;;  %p4510_p10 = por %p4509_p8, %p4508_p5 }
  0x45   : > { %p4504_p9 = pneg %p4503_p13 }
  0x47   : > { %p4511_p0 = pnand %p4510_p10, %p4504_p9 }
  0x49   : > { %4514 = shalt.err (!%p4511_p0)
}
  0x4a   : > { %s6277_s25 = smov 64   ;;  %s6284_s26 = smov 4  }
  0x4b   : > { %4028 = dma.hbm_to_vmem [thread:$0]  (!%p5209_p12), %s6322_s14, 1024, %s574_s0, [#allocation19], %s6277_s25, %s6277_s25, %s6284_s26  }
  0x4c   : > { %s5022_s30 = smov [#allocation21]   ;;  %s5023_s10 = smov [#allocation24]  }
  0x4d   : > { %s598_s28 = sshll.u32 %s5022_s30, 4  ;;  %s619_s3 = sshll.u32 %s5023_s10, 4  ;;  %s599_s28 = int_to_ptr.vmem [resolvable:$true] %s598_s28  ;;  %s620_s3 = int_to_ptr.vmem [resolvable:$true] %s619_s3 }
  0x4e   : > { %s4515_s22 = scalar_lea.hbm %s6251_s16, 16 }
  0x4f   : > { %p4516_p5 = scmp.ne.s32.totalorder %s6251_s16, %s4515_s22  ;;  %p4522_p10 = scmp.lt.u32.totalorder %s4515_s22, %s6251_s16 }
  0x51   : > { %p4518_p8 = pnand %p4516_p5, %p5228_p2 }
  0x53   : > { %p4519_p9 = pneg %p4518_p8 }
  0x55   : > { %p4524_p0 = pnand %p4522_p10, %p4519_p9 }
  0x57   : > { %4527 = shalt.err (!%p4524_p0)
}
  0x58   : > { %s4528_s0 = scalar_lea.vmem %s599_s28, 16  ;;  %s4535_s10 = scalar_lea.vmem %s599_s28, 32 }
  0x59   : > { %p4529_p1 = scmp.ne.s32.totalorder %s599_s28, %s4528_s0  ;;  %p4536_p6 = scmp.lt.s32.totalorder %s599_s28, %s599_s28 }
  0x5a   : > { %p4537_p7 = scmp.lt.s32.totalorder %s4535_s10, %s4528_s0 }
  0x5b   : > { %p4531_p3 = pnand %p4529_p1, %p5228_p2 }
  0x5c   : > { %p4538_p11 = por %p4537_p7, %p4536_p6 }
  0x5d   : > { %p4532_p4 = pneg %p4531_p3 }
  0x5f   : > { %p4539_p13 = pnand %p4538_p11, %p4532_p4 }
  0x61   : > { %4542 = shalt.err (!%p4539_p13)
}
  0x62   : > { %4034 = dma.hbm_to_vmem [thread:$0]  (!%p5209_p12), %s6251_s16, 16, %s599_s28, [#allocation22]  }
  0x63   : > { %s5266_s7 = sand.u32 1, %s5013_s23   ;;  %s4543_s4 = scalar_lea.hbm %s6253_s18, 2048 }
  0x64   : > { %p4544_p5 = scmp.ne.s32.totalorder %s6253_s18, %s4543_s4  ;;  %p4550_p10 = scmp.lt.u32.totalorder %s4543_s4, %s6253_s18 }
  0x66   : > { %p4546_p8 = pnand %p4544_p5, %p5228_p2 }
  0x68   : > { %p4547_p9 = pneg %p4546_p8 }
  0x6a   : > { %p4552_p0 = pnand %p4550_p10, %p4547_p9 }
  0x6c   : > { %4555 = shalt.err (!%p4552_p0)
}
  0x6d   : > { %s4556_s28 = scalar_lea.vmem %s620_s3, 2048  ;;  %p4564_p6 = scmp.lt.s32.totalorder %s620_s3, %s620_s3 }
  0x6e   : > { %p4557_p1 = scmp.ne.s32.totalorder %s620_s3, %s4556_s28  ;;  %p4565_p7 = scmp.lt.s32.totalorder %s4556_s28, %s4556_s28 }
  0x70   : > { %p4559_p3 = pnand %p4557_p1, %p5228_p2  ;;  %p4566_p11 = por %p4565_p7, %p4564_p6 }
  0x72   : > { %p4560_p4 = pneg %p4559_p3 }
  0x74   : > { %p4567_p13 = pnand %p4566_p11, %p4560_p4 }
  0x76   : > { %4570 = shalt.err (!%p4567_p13)
}
  0x77   : > { %s5024_s0 = smov 128   ;;  %s5025_s10 = smov 8  }
  0x78   : > { %4040 = dma.hbm_to_vmem [thread:$0]  (!%p5209_p12), %s6253_s18, 2048, %s620_s3, [#allocation25], %s5024_s0, %s5024_s0, %s5025_s10  }
  0x79   : > { %s5287_s9 = sand.u32 1, %s5017_s24   ;;  %s3606_s22 = sshll.u32 %s5266_s7, 6 }
  0x7a   : > { %s3750_s4 = sshll.u32 %s5017_s24, 10  ;;  %s677_s29 = scalar_lea.vmem [#allocation6], %s3606_s22 }
  0x7b   : > { %s684_s11 = sshll.u32 %s677_s29, 4  ;;  %s6324_s28 = sld [smem:[#allocation47_spill]]  ;;  %s5296_s11 = int_to_ptr.vmem [resolvable:$true] %s684_s11 }
  0x7c   : > { %s6283_s13 = scalar_lea.sflag [#allocation7], %s5287_s9  ;;  %p6325_p8 = scmp.ne.s32.totalorder %s6321_s1, 0 }
  0x7e   : > { %p5303_p9 = pneg %p6325_p8 }
  0x80   : > { %s6326_s0 = scalar_select %p5303_p9, 1, 0 }
  0x81   : > { %s5294_s25 = scalar_lea.hbm %s6324_s28, %s3750_s4  ;;  %s4576_s22 = scalar_lea.hbm %s6324_s28, 2048 }
  0x82   : > { %s4571_s3 = scalar_lea.hbm %s5294_s25, 1024  ;;  %p4577_p1 = scmp.lt.u32.totalorder %s5294_s25, %s6324_s28 }
  0x83   : > { %p4572_p5 = scmp.ne.s32.totalorder %s5294_s25, %s4571_s3  ;;  %p4578_p3 = scmp.lt.u32.totalorder %s4576_s22, %s4571_s3 }
  0x84   : > { %p4580_p6 = scmp.lt.u32.totalorder %s4571_s3, %s5294_s25 }
  0x85   : > { %p4574_p10 = pnand %p5303_p9, %p4572_p5  ;;  %p4579_p4 = por %p4578_p3, %p4577_p1 }
  0x87   : > { %p4575_p0 = pneg %p4574_p10  ;;  %p4581_p7 = por %p4580_p6, %p4579_p4 }
  0x89   : > { %p4582_p11 = pnand %p4581_p7, %p4575_p0 }
  0x8b   : > { %4585 = shalt.err (!%p4582_p11)
}
  0x8c   : > { %s4586_s27 = scalar_lea.vmem %s5296_s11, 1024  ;;  %s5026_s30 = smov [#allocation6]  }
  0x8d   : > { %p4587_p13 = scmp.ne.s32.totalorder %s5296_s11, %s4586_s27  ;;  %s4591_s10 = sshll.u32 %s5026_s30, 4  ;;  %s4592_s10 = int_to_ptr.vmem [resolvable:$false] %s4591_s10 }
  0x8e   : > { %s4593_s2 = scalar_lea.vmem %s4592_s10, 2048  ;;  %p4594_p12 = scmp.lt.s32.totalorder %s5296_s11, %s4592_s10 }
  0x8f   : > { %p4589_p5 = pnand %p4587_p13, %p5303_p9  ;;  %p4595_p2 = scmp.lt.s32.totalorder %s4593_s2, %s4586_s27 }
  0x91   : > { %p4590_p10 = pneg %p4589_p5  ;;  %p4596_p1 = por %p4595_p2, %p4594_p12 }
  0x93   : > { %p4597_p3 = pnand %p4596_p1, %p4590_p10 }
  0x95   : > { %4600 = shalt.err (!%p4597_p3)
}
  0x96   : > { %s6327_s3 = smov 64   ;;  %s5332_s22 = sshll.u32 %s5017_s24, 4 }
  0x97   : > { %4050 = dma.hbm_to_vmem [thread:$0]  (!%p6325_p8), %s5294_s25, 1024, %s5296_s11, %s6283_s13, %s6327_s3, %s6327_s3, %s6284_s26  }
  0x98   : > { %s6328_s6 = sld [smem:[#allocation49_spill]]  ;;  %s714_s30 = scalar_lea.vmem [#allocation9], %s5266_s7 }
  0x99   : > { %s721_s10 = sshll.u32 %s714_s30, 4  ;;  %s722_s10 = int_to_ptr.vmem [resolvable:$true] %s721_s10 }
  0x9e   : > { %s5338_s27 = scalar_lea.hbm %s6328_s6, %s5332_s22  ;;  %s4606_s13 = scalar_lea.hbm %s6328_s6, 32 }
  0x9f   : > { %s4601_s14 = scalar_lea.hbm %s5338_s27, 16  ;;  %p4607_p4 = scmp.lt.u32.totalorder %s5338_s27, %s6328_s6 }
  0xa0   : > { %p4602_p12 = scmp.ne.s32.totalorder %s5338_s27, %s4601_s14  ;;  %p4608_p6 = scmp.lt.u32.totalorder %s4606_s13, %s4601_s14 }
  0xa1   : > { %p4610_p11 = scmp.lt.u32.totalorder %s4601_s14, %s5338_s27 }
  0xa2   : > { %p4604_p2 = pnand %p4602_p12, %p5303_p9  ;;  %p4609_p7 = por %p4608_p6, %p4607_p4 }
  0xa4   : > { %p4605_p0 = pneg %p4604_p2  ;;  %p4611_p13 = por %p4610_p11, %p4609_p7 }
  0xa6   : > { %p4612_p5 = pnand %p4611_p13, %p4605_p0 }
  0xa8   : > { %4615 = shalt.err (!%p4612_p5)
}
  0xa9   : > { %s4616_s30 = scalar_lea.vmem %s722_s10, 16  ;;  %s5027_s26 = smov [#allocation9]  }
  0xaa   : > { %p4617_p10 = scmp.ne.s32.totalorder %s722_s10, %s4616_s30  ;;  %s4621_s2 = sshll.u32 %s5027_s26, 4  ;;  %s4622_s2 = int_to_ptr.vmem [resolvable:$false] %s4621_s2 }
  0xab   : > { %s4623_s25 = scalar_lea.vmem %s4622_s2, 32  ;;  %p4624_p12 = scmp.lt.s32.totalorder %s722_s10, %s4622_s2 }
  0xac   : > { %p4619_p1 = pnand %p4617_p10, %p5303_p9  ;;  %p4625_p2 = scmp.lt.s32.totalorder %s4623_s25, %s4616_s30 }
  0xae   : > { %p4620_p3 = pneg %p4619_p1  ;;  %p4626_p8 = por %p4625_p2, %p4624_p12 }
  0xb0   : > { %p4627_p4 = pnand %p4626_p8, %p4620_p3 }
  0xb2   : > { %4630 = shalt.err (!%p4627_p4)
}
  0xb3   : > { %p6329_p6 = scmp.ne.s32.totalorder %s6321_s1, 0  ;;  %s6330_s14 = scalar_lea.sflag [#allocation10], %s5287_s9 }
  0xb4   : > { %s6331_s8 = sld [smem:[#allocation51_spill]]  ;;  %s748_s2 = scalar_lea.vmem [#allocation12], %s5266_s7 }
  0xb5   : > { %4056 = dma.hbm_to_vmem [thread:$0]  (!%p6329_p6), %s5338_s27, 16, %s722_s10, %s6330_s14  }
  0xb6   : > { %s755_s4 = sshll.u32 %s748_s2, 4  ;;  %s756_s4 = int_to_ptr.vmem [resolvable:$true] %s755_s4 }
  0xba   : > { %s5365_s26 = scalar_lea.hbm %s6331_s8, %s5332_s22  ;;  %s4636_s10 = scalar_lea.hbm %s6331_s8, 32 }
  0xbb   : > { %s4631_s30 = scalar_lea.hbm %s5365_s26, 16  ;;  %p4637_p11 = scmp.lt.u32.totalorder %s5365_s26, %s6331_s8 }
  0xbc   : > { %p4632_p8 = scmp.ne.s32.totalorder %s5365_s26, %s4631_s30  ;;  %p4638_p13 = scmp.lt.u32.totalorder %s4636_s10, %s4631_s30 }
  0xbd   : > { %p4640_p10 = scmp.lt.u32.totalorder %s4631_s30, %s5365_s26 }
  0xbe   : > { %p4634_p0 = pnand %p4632_p8, %p5303_p9  ;;  %p4639_p5 = por %p4638_p13, %p4637_p11 }
  0xc0   : > { %p4635_p7 = pneg %p4634_p0  ;;  %p4641_p1 = por %p4640_p10, %p4639_p5 }
  0xc2   : > { %p4642_p3 = pnand %p4641_p1, %p4635_p7 }
  0xc4   : > { %4645 = shalt.err (!%p4642_p3)
}
  0xc5   : > { %s4646_s11 = scalar_lea.vmem %s756_s4, 16  ;;  %s5028_s2 = smov [#allocation12]  }
  0xc6   : > { %p4647_p12 = scmp.ne.s32.totalorder %s756_s4, %s4646_s11  ;;  %s4651_s29 = sshll.u32 %s5028_s2, 4  ;;  %s4652_s29 = int_to_ptr.vmem [resolvable:$false] %s4651_s29 }
  0xc7   : > { %s4653_s25 = scalar_lea.vmem %s4652_s29, 32  ;;  %p4654_p8 = scmp.lt.s32.totalorder %s756_s4, %s4652_s29 }
  0xc8   : > { %p4649_p2 = pnand %p4647_p12, %p5303_p9  ;;  %p4655_p0 = scmp.lt.s32.totalorder %s4653_s25, %s4646_s11 }
  0xca   : > { %p4650_p4 = pneg %p4649_p2  ;;  %p4656_p6 = por %p4655_p0, %p4654_p8 }
  0xcc   : > { %p4657_p11 = pnand %p4656_p6, %p4650_p4 }
  0xce   : > { %4660 = shalt.err (!%p4657_p11)
}
  0xcf   : > { %p6332_p13 = scmp.ne.s32.totalorder %s6321_s1, 0  ;;  %s6333_s30 = scalar_lea.sflag [#allocation13], %s5287_s9 }
  0xd0   : > { %s3614_s27 = sshll.u32 %s5266_s7, 7  ;;  %s3751_s10 = sshll.u32 %s5017_s24, 11 }
  0xd1   : > { %4062 = dma.hbm_to_vmem [thread:$0]  (!%p6332_p13), %s5365_s26, 16, %s756_s4, %s6333_s30  }
  0xd2   : > { %s6334_s12 = sld [smem:[#allocation55_spill]]  ;;  %s798_s11 = scalar_lea.vmem [#allocation15], %s3614_s27 }
  0xd3   : > { %s805_s2 = sshll.u32 %s798_s11, 4  ;;  %s5029_s25 = smov [#allocation20]   ;;  %s5395_s2 = int_to_ptr.vmem [resolvable:$true] %s805_s2 }
  0xd4   : > { %s5397_s6 = sshll.u32 %s5029_s25, 4  ;;  %s6289_s8 = scalar_lea.sflag [#allocation16], %s5287_s9  ;;  %s588_s6 = int_to_ptr.vmem [resolvable:$true] %s5397_s6 }
  0xd8   : > { %s5393_s29 = scalar_lea.hbm %s6334_s12, %s3751_s10  ;;  %s4666_s10 = scalar_lea.hbm %s6334_s12, 4096 }
  0xd9   : > { %s4661_s26 = scalar_lea.hbm %s5393_s29, 2048  ;;  %p4667_p10 = scmp.lt.u32.totalorder %s5393_s29, %s6334_s12 }
  0xda   : > { %p4662_p6 = scmp.ne.s32.totalorder %s5393_s29, %s4661_s26  ;;  %p4668_p1 = scmp.lt.u32.totalorder %s4666_s10, %s4661_s26 }
  0xdb   : > { %p4670_p12 = scmp.lt.u32.totalorder %s4661_s26, %s5393_s29 }
  0xdc   : > { %p4664_p7 = pnand %p4662_p6, %p5303_p9  ;;  %p4669_p3 = por %p4668_p1, %p4667_p10 }
  0xde   : > { %p4665_p5 = pneg %p4664_p7  ;;  %p4671_p2 = por %p4670_p12, %p4669_p3 }
  0xe0   : > { %p4672_p4 = pnand %p4671_p2, %p4665_p5 }
  0xe2   : > { %4675 = shalt.err (!%p4672_p4)
}
  0xe3   : > { %s4676_s27 = scalar_lea.vmem %s5395_s2, 2048  ;;  %s5030_s11 = smov [#allocation15]  }
  0xe4   : > { %p4677_p8 = scmp.ne.s32.totalorder %s5395_s2, %s4676_s27  ;;  %s4681_s25 = sshll.u32 %s5030_s11, 4  ;;  %s4682_s25 = int_to_ptr.vmem [resolvable:$false] %s4681_s25 }
  0xe5   : > { %s4683_s4 = scalar_lea.vmem %s4682_s25, 4096  ;;  %p4684_p6 = scmp.lt.s32.totalorder %s5395_s2, %s4682_s25 }
  0xe6   : > { %p4679_p0 = pnand %p4677_p8, %p5303_p9  ;;  %p4685_p7 = scmp.lt.s32.totalorder %s4683_s4, %s4676_s27 }
  0xe8   : > { %p4680_p11 = pneg %p4679_p0  ;;  %p4686_p10 = por %p4685_p7, %p4684_p6 }
  0xea   : > { %p4687_p1 = pnand %p4686_p10, %p4680_p11 }
  0xec   : > { %4690 = shalt.err (!%p4687_p1)
}
  0xed   : > { %s6335_s26 = smov 4   ;;  %s6336_s15 = sld [smem:[#allocation58_spill]] }
  0xee   : > { %4068 = dma.hbm_to_vmem [thread:$0]  (!%p6332_p13), %s5393_s29, 2048, %s5395_s2, %s6289_s8, %s6327_s3, %s6327_s3, %s6335_s26  }
  0xef   : > { %p6337_p3 = scmp.ne.s32.totalorder %s6323_s20, 0 }
  0xf3   : > { %s4691_s14 = scalar_lea.hbm %s6336_s15, 16 }
  0xf4   : > { %p4692_p5 = scmp.ne.s32.totalorder %s6336_s15, %s4691_s14  ;;  %p4698_p4 = scmp.lt.u32.totalorder %s4691_s14, %s6336_s15 }
  0xf6   : > { %p4694_p12 = pnand %p4692_p5, %p6337_p3 }
  0xf8   : > { %p4695_p2 = pneg %p4694_p12 }
  0xfa   : > { %p4700_p8 = pnand %p4698_p4, %p4695_p2 }
  0xfc   : > { %4703 = shalt.err (!%p4700_p8)
}
  0xfd   : > { %s4704_s4 = scalar_lea.vmem %s588_s6, 16  ;;  %s4711_s3 = scalar_lea.vmem %s588_s6, 32 }
  0xfe   : > { %p4705_p0 = scmp.ne.s32.totalorder %s588_s6, %s4704_s4  ;;  %p4712_p7 = scmp.lt.s32.totalorder %s588_s6, %s588_s6 }
  0xff   : > { %p4713_p10 = scmp.lt.s32.totalorder %s4711_s3, %s4704_s4 }
 0x100   : > { %p4707_p11 = pnand %p4705_p0, %p6337_p3 }
 0x101   : > { %p4714_p1 = por %p4713_p10, %p4712_p7 }
 0x102   : > { %p4708_p6 = pneg %p4707_p11 }
 0x104   : > { %p4715_p13 = pnand %p4714_p1, %p4708_p6 }
 0x106   : > { %4718 = shalt.err (!%p4715_p13)
}
 0x107   : > { %p6338_p5 = scmp.ne.s32.totalorder %s6320_s21, 0  ;;  %s5031_s26 = smov [#allocation23]  }
 0x108   : > { %s609_s30 = sshll.u32 %s5031_s26, 4  ;;  %s5032_s10 = smov [#allocation26]   ;;  %s610_s30 = int_to_ptr.vmem [resolvable:$true] %s609_s30 }
 0x109   : > { %4031 = dma.hbm_to_vmem [thread:$0]  (!%p6338_p5), %s6336_s15, 16, %s588_s6, [#allocation19]  }
 0x10a   : > { %s632_s14 = sshll.u32 %s5032_s10, 4  ;;  %s4719_s11 = scalar_lea.hbm %s6252_s17, 16  ;;  %s633_s14 = int_to_ptr.vmem [resolvable:$true] %s632_s14 }
 0x10b   : > { %p4720_p13 = scmp.ne.s32.totalorder %s6252_s17, %s4719_s11  ;;  %p4726_p4 = scmp.lt.u32.totalorder %s4719_s11, %s6252_s17 }
 0x10d   : > { %p4722_p12 = pnand %p4720_p13, %p6337_p3 }
 0x10f   : > { %p4723_p2 = pneg %p4722_p12 }
 0x111   : > { %p4728_p8 = pnand %p4726_p4, %p4723_p2 }
 0x113   : > { %4731 = shalt.err (!%p4728_p8)
}
 0x114   : > { %s4732_s6 = scalar_lea.vmem %s610_s30, 16  ;;  %s4739_s2 = scalar_lea.vmem %s610_s30, 32 }
 0x115   : > { %p4733_p0 = scmp.ne.s32.totalorder %s610_s30, %s4732_s6  ;;  %p4740_p7 = scmp.lt.s32.totalorder %s610_s30, %s610_s30 }
 0x116   : > { %p4741_p10 = scmp.lt.s32.totalorder %s4739_s2, %s4732_s6 }
 0x117   : > { %p4735_p11 = pnand %p4733_p0, %p6337_p3 }
 0x118   : > { %p4742_p1 = por %p4741_p10, %p4740_p7 }
 0x119   : > { %p4736_p6 = pneg %p4735_p11 }
 0x11b   : > { %p4743_p9 = pnand %p4742_p1, %p4736_p6 }
 0x11d   : > { %4746 = shalt.err (!%p4743_p9)
}
 0x11e   : > { %4037 = dma.hbm_to_vmem [thread:$0]  (!%p6338_p5), %s6252_s17, 16, %s610_s30, [#allocation22]  }
 0x11f   : > { %s4747_s11 = scalar_lea.hbm %s6254_s19, 512 }
 0x120   : > { %p4748_p13 = scmp.ne.s32.totalorder %s6254_s19, %s4747_s11  ;;  %p4754_p9 = scmp.lt.u32.totalorder %s4747_s11, %s6254_s19 }
 0x122   : > { %p4750_p12 = pnand %p4748_p13, %p6337_p3 }
 0x124   : > { %p4751_p2 = pneg %p4750_p12 }
 0x126   : > { %p4756_p4 = pnand %p4754_p9, %p4751_p2 }
 0x128   : > { %4759 = shalt.err (!%p4756_p4)
}
 0x129   : > { %s4760_s6 = scalar_lea.vmem %s633_s14, 512  ;;  %p4768_p6 = scmp.lt.s32.totalorder %s633_s14, %s633_s14 }
 0x12a   : > { %p4761_p8 = scmp.ne.s32.totalorder %s633_s14, %s4760_s6  ;;  %p4769_p7 = scmp.lt.s32.totalorder %s4760_s6, %s4760_s6 }
 0x12c   : > { %p4763_p0 = pnand %p4761_p8, %p6337_p3  ;;  %p4770_p10 = por %p4769_p7, %p4768_p6 }
 0x12e   : > { %p4764_p11 = pneg %p4763_p0 }
 0x130   : > { %p4771_p1 = pnand %p4770_p10, %p4764_p11 }
 0x132   : > { %4774 = shalt.err (!%p4771_p1)
}
 0x133   : > { %s5033_s30 = smov 256   ;;  %s5034_s2 = smov 16  }
 0x134   : > { %4043 = dma.hbm_to_vmem [thread:$0]  (!%p6338_p5), %s6254_s19, 512, %s633_s14, [#allocation25], %s5033_s30, %s5033_s30, %s5034_s2  }
 0x135   : > { %s3975_s20 = smul.u32 3, %s5266_s7  ;;  %s6339_s5 = sld [smem:[#allocation48_spill]] }
 0x136   : > { %s3976_s13 = smul.u32 48, %s5017_s24  ;;  %s697_s4 = scalar_lea.vmem [#allocation8], %s5266_s7 }
 0x137   : > { %s704_s3 = sshll.u32 %s697_s4, 4  ;;  %s6340_s8 = sld [smem:[#allocation46_spill]]  ;;  %s5497_s3 = int_to_ptr.vmem [resolvable:$true] %s704_s3 }
 0x138   : > { %s658_s21 = scalar_lea.vmem [#allocation3], %s3975_s20  ;;  %s655_s24 = scalar_lea.sflag [#allocation4], %s5266_s7 }
 0x139   : > { %s666_s14 = sshll.u32 %s658_s21, 4  ;;  %p6341_p5 = scmp.ne.s32.totalorder %s6326_s0, 0  ;;  %s5495_s14 = int_to_ptr.vmem [resolvable:$true] %s666_s14 }
 0x13b   : > { %s5487_s25 = scalar_lea.hbm %s6339_s5, %s5332_s22 }
 0x13d   : > { %s5493_s12 = scalar_lea.hbm %s6340_s8, %s3976_s13  ;;  %s4780_s10 = scalar_lea.hbm %s6340_s8, 96 }
 0x13e   : > { %s4775_s30 = scalar_lea.hbm %s5493_s12, 48  ;;  %p4781_p2 = scmp.lt.u32.totalorder %s5493_s12, %s6340_s8 }
 0x13f   : > { %p4776_p3 = scmp.ne.s32.totalorder %s5493_s12, %s4775_s30  ;;  %p4782_p9 = scmp.lt.u32.totalorder %s4780_s10, %s4775_s30 }
 0x140   : > { %p4784_p8 = scmp.lt.u32.totalorder %s4775_s30, %s5493_s12 }
 0x141   : > { %p4778_p13 = pnand %p4776_p3, %p6341_p5  ;;  %p4783_p4 = por %p4782_p9, %p4781_p2 }
 0x143   : > { %p4779_p12 = pneg %p4778_p13  ;;  %p4785_p0 = por %p4784_p8, %p4783_p4 }
 0x145   : > { %p4786_p11 = pnand %p4785_p0, %p4779_p12 }
 0x147   : > { %4789 = shalt.err (!%p4786_p11)
}
 0x148   : > { %s4790_s20 = scalar_lea.vmem %s5495_s14, 48  ;;  %s5035_s11 = smov [#allocation3]  }
 0x149   : > { %p4791_p6 = scmp.ne.s32.totalorder %s5495_s14, %s4790_s20  ;;  %s4795_s4 = sshll.u32 %s5035_s11, 4  ;;  %s4796_s4 = int_to_ptr.vmem [resolvable:$false] %s4795_s4 }
 0x14a   : > { %s4797_s29 = scalar_lea.vmem %s4796_s4, 96  ;;  %p4798_p1 = scmp.lt.s32.totalorder %s5495_s14, %s4796_s4 }
 0x14b   : > { %p4793_p7 = pnand %p4791_p6, %p6341_p5  ;;  %p4799_p3 = scmp.lt.s32.totalorder %s4797_s29, %s4790_s20 }
 0x14d   : > { %p4794_p10 = pneg %p4793_p7  ;;  %p4800_p13 = por %p4799_p3, %p4798_p1 }
 0x14f   : > { %p4801_p2 = pnand %p4800_p13, %p4794_p10 }
 0x151   : > { %4804 = shalt.err (!%p4801_p2)
}
 0x152   : > { %p6342_p12 = scmp.ne.s32.totalorder %s6321_s1, 0  ;;  %s4805_s6 = scalar_lea.hbm %s5487_s25, 16 }
 0x153   : > { %p4806_p9 = scmp.ne.s32.totalorder %s5487_s25, %s4805_s6  ;;  %s4810_s2 = scalar_lea.hbm %s6339_s5, 32 }
 0x154   : > { %4047 = dma.hbm_to_vmem [thread:$0]  (!%p6342_p12), %s5493_s12, 48, %s5495_s14, %s655_s24  }
 0x155   : > { %p4808_p4 = pnand %p4806_p9, %p6341_p5  ;;  %p4811_p0 = scmp.lt.u32.totalorder %s5487_s25, %s6339_s5 }
 0x156   : > { %p4812_p11 = scmp.lt.u32.totalorder %s4810_s2, %s4805_s6  ;;  %p4814_p7 = scmp.lt.u32.totalorder %s4805_s6, %s5487_s25 }
 0x157   : > { %p4809_p8 = pneg %p4808_p4 }
 0x158   : > { %p4813_p6 = por %p4812_p11, %p4811_p0 }
 0x15a   : > { %p4815_p10 = por %p4814_p7, %p4813_p6 }
 0x15c   : > { %p4816_p1 = pnand %p4815_p10, %p4809_p8 }
 0x15e   : > { %4819 = shalt.err (!%p4816_p1)
}
 0x15f   : > { %s4820_s12 = scalar_lea.vmem %s5497_s3, 16  ;;  %s5036_s14 = smov [#allocation8]  }
 0x160   : > { %p4821_p3 = scmp.ne.s32.totalorder %s5497_s3, %s4820_s12  ;;  %s4825_s24 = sshll.u32 %s5036_s14, 4  ;;  %s4826_s24 = int_to_ptr.vmem [resolvable:$false] %s4825_s24 }
 0x161   : > { %s4827_s13 = scalar_lea.vmem %s4826_s24, 32  ;;  %p4828_p9 = scmp.lt.s32.totalorder %s5497_s3, %s4826_s24 }
 0x162   : > { %p4823_p13 = pnand %p4821_p3, %p6341_p5  ;;  %p4829_p4 = scmp.lt.s32.totalorder %s4827_s13, %s4820_s12 }
 0x164   : > { %p4824_p2 = pneg %p4823_p13  ;;  %p4830_p0 = por %p4829_p4, %p4828_p9 }
 0x166   : > { %p4831_p11 = pnand %p4830_p0, %p4824_p2 }
 0x168   : > { %4834 = shalt.err (!%p4831_p11)
}
 0x169   : > { %s6343_s27 = scalar_lea.sflag [#allocation7], %s5287_s9  ;;  %s6344_s4 = sld [smem:[#allocation50_spill]] }
 0x16a   : > { %4053 = dma.hbm_to_vmem [thread:$0]  (!%p6342_p12), %s5487_s25, 16, %s5497_s3, %s6343_s27  }
 0x16b   : > { %s731_s6 = scalar_lea.vmem [#allocation11], %s5266_s7  ;;  %s6345_s26 = sld [smem:[#allocation52_spill]] }
 0x16c   : > { %s738_s21 = sshll.u32 %s731_s6, 4  ;;  %s739_s21 = int_to_ptr.vmem [resolvable:$true] %s738_s21 }
 0x16f   : > { %s5548_s29 = scalar_lea.hbm %s6344_s4, %s5332_s22  ;;  %s4840_s14 = scalar_lea.hbm %s6344_s4, 32 }
 0x170   : > { %s4835_s12 = scalar_lea.hbm %s5548_s29, 16  ;;  %p4841_p10 = scmp.lt.u32.totalorder %s5548_s29, %s6344_s4 }
 0x171   : > { %s5555_s10 = scalar_lea.hbm %s6345_s26, %s5332_s22  ;;  %p4836_p8 = scmp.ne.s32.totalorder %s5548_s29, %s4835_s12 }
 0x172   : > { %p4842_p1 = scmp.lt.u32.totalorder %s4840_s14, %s4835_s12  ;;  %p4844_p13 = scmp.lt.u32.totalorder %s4835_s12, %s5548_s29 }
 0x173   : > { %p4838_p6 = pnand %p4836_p8, %p6341_p5 }
 0x174   : > { %p4843_p3 = por %p4842_p1, %p4841_p10 }
 0x175   : > { %p4839_p7 = pneg %p4838_p6 }
 0x176   : > { %p4845_p2 = por %p4844_p13, %p4843_p3 }
 0x178   : > { %p4846_p9 = pnand %p4845_p2, %p4839_p7 }
 0x17a   : > { %4849 = shalt.err (!%p4846_p9)
}
 0x17b   : > { %s4850_s27 = scalar_lea.vmem %s739_s21, 16  ;;  %s5037_s20 = smov [#allocation11]  }
 0x17c   : > { %p4851_p4 = scmp.ne.s32.totalorder %s739_s21, %s4850_s27  ;;  %s4855_s11 = sshll.u32 %s5037_s20, 4  ;;  %s4856_s11 = int_to_ptr.vmem [resolvable:$false] %s4855_s11 }
 0x17d   : > { %s4857_s6 = scalar_lea.vmem %s4856_s11, 32  ;;  %p4858_p8 = scmp.lt.s32.totalorder %s739_s21, %s4856_s11 }
 0x17e   : > { %p4853_p0 = pnand %p4851_p4, %p6341_p5  ;;  %p4859_p6 = scmp.lt.s32.totalorder %s4857_s6, %s4850_s27 }
 0x180   : > { %p4854_p11 = pneg %p4853_p0  ;;  %p4860_p12 = por %p4859_p6, %p4858_p8 }
 0x182   : > { %p4861_p1 = pnand %p4860_p12, %p4854_p11 }
 0x184   : > { %4864 = shalt.err (!%p4861_p1)
}
 0x185   : > { %p6346_p10 = scmp.ne.s32.totalorder %s6321_s1, 0  ;;  %s6347_s30 = scalar_lea.sflag [#allocation10], %s5287_s9 }
 0x186   : > { %s765_s2 = scalar_lea.vmem [#allocation14], %s5266_s7  ;;  %s6348_s14 = sld [smem:[#allocation56_spill]] }
 0x187   : > { %4059 = dma.hbm_to_vmem [thread:$0]  (!%p6346_p10), %s5548_s29, 16, %s739_s21, %s6347_s30  }
 0x188   : > { %s772_s12 = sshll.u32 %s765_s2, 4  ;;  %s4865_s13 = scalar_lea.hbm %s5555_s10, 16  ;;  %s773_s12 = int_to_ptr.vmem [resolvable:$true] %s772_s12 }
 0x189   : > { %p4866_p12 = scmp.ne.s32.totalorder %s5555_s10, %s4865_s13  ;;  %s4870_s11 = scalar_lea.hbm %s6345_s26, 32 }
 0x18a   : > { %p4871_p13 = scmp.lt.u32.totalorder %s5555_s10, %s6345_s26  ;;  %p4872_p2 = scmp.lt.u32.totalorder %s4870_s11, %s4865_s13 }
 0x18b   : > { %p4868_p7 = pnand %p4866_p12, %p6341_p5  ;;  %p4874_p4 = scmp.lt.u32.totalorder %s4865_s13, %s5555_s10 }
 0x18c   : > { %s5581_s24 = scalar_lea.hbm %s6348_s14, %s5332_s22  ;;  %p4873_p9 = por %p4872_p2, %p4871_p13 }
 0x18d   : > { %p4869_p3 = pneg %p4868_p7 }
 0x18e   : > { %p4875_p0 = por %p4874_p4, %p4873_p9 }
 0x190   : > { %p4876_p11 = pnand %p4875_p0, %p4869_p3 }
 0x192   : > { %4879 = shalt.err (!%p4876_p11)
}
 0x193   : > { %s4880_s22 = scalar_lea.vmem %s773_s12, 16  ;;  %s5038_s29 = smov [#allocation14]  }
 0x194   : > { %p4881_p8 = scmp.ne.s32.totalorder %s773_s12, %s4880_s22  ;;  %s4885_s21 = sshll.u32 %s5038_s29, 4  ;;  %s4886_s21 = int_to_ptr.vmem [resolvable:$false] %s4885_s21 }
 0x195   : > { %s4887_s30 = scalar_lea.vmem %s4886_s21, 32  ;;  %p4888_p12 = scmp.lt.s32.totalorder %s773_s12, %s4886_s21 }
 0x196   : > { %p4883_p6 = pnand %p4881_p8, %p6341_p5  ;;  %p4889_p7 = scmp.lt.s32.totalorder %s4887_s30, %s4880_s22 }
 0x198   : > { %p4884_p1 = pneg %p4883_p6  ;;  %p4890_p10 = por %p4889_p7, %p4888_p12 }
 0x19a   : > { %p4891_p2 = pnand %p4890_p10, %p4884_p1 }
 0x19c   : > { %4894 = shalt.err (!%p4891_p2)
}
 0x19d   : > { %p6349_p13 = scmp.ne.s32.totalorder %s6321_s1, 0  ;;  %s6350_s4 = scalar_lea.sflag [#allocation13], %s5287_s9 }
 0x19e   : > { %s818_s2 = scalar_lea.vmem [#allocation17], %s5266_s7  ;;  %s4895_s3 = scalar_lea.hbm %s5581_s24, 16 }
 0x19f   : > { %4065 = dma.hbm_to_vmem [thread:$0]  (!%p6349_p13), %s5555_s10, 16, %s773_s12, %s6350_s4  }
 0x1a0   : > { %s825_s25 = sshll.u32 %s818_s2, 4  ;;  %p4896_p3 = scmp.ne.s32.totalorder %s5581_s24, %s4895_s3  ;;  %s826_s25 = int_to_ptr.vmem [resolvable:$true] %s825_s25 }
 0x1a1   : > { %s4900_s20 = scalar_lea.hbm %s6348_s14, 32  ;;  %p4901_p4 = scmp.lt.u32.totalorder %s5581_s24, %s6348_s14 }
 0x1a2   : > { %p4898_p10 = pnand %p4896_p3, %p6341_p5  ;;  %p4902_p0 = scmp.lt.u32.totalorder %s4900_s20, %s4895_s3 }
 0x1a3   : > { %p4904_p8 = scmp.lt.u32.totalorder %s4895_s3, %s5581_s24 }
 0x1a4   : > { %p4899_p9 = pneg %p4898_p10  ;;  %p4903_p11 = por %p4902_p0, %p4901_p4 }
 0x1a6   : > { %p4905_p6 = por %p4904_p8, %p4903_p11 }
 0x1a8   : > { %p4906_p1 = pnand %p4905_p6, %p4899_p9 }
 0x1aa   : > { %4909 = shalt.err (!%p4906_p1)
}
 0x1ab   : > { %s4910_s7 = scalar_lea.vmem %s826_s25, 16  ;;  %s5039_s10 = smov [#allocation17]  }
 0x1ac   : > { %p4911_p12 = scmp.ne.s32.totalorder %s826_s25, %s4910_s7  ;;  %s4915_s12 = sshll.u32 %s5039_s10, 4  ;;  %s4916_s12 = int_to_ptr.vmem [resolvable:$false] %s4915_s12 }
 0x1ad   : > { %s4917_s22 = scalar_lea.vmem %s4916_s12, 32  ;;  %p4918_p3 = scmp.lt.s32.totalorder %s826_s25, %s4916_s12 }
 0x1ae   : > { %p4913_p7 = pnand %p4911_p12, %p6341_p5  ;;  %p4919_p10 = scmp.lt.s32.totalorder %s4917_s22, %s4910_s7 }
 0x1b0   : > { %p4914_p2 = pneg %p4913_p7  ;;  %p4920_p13 = por %p4919_p10, %p4918_p3 }
 0x1b2   : > { %p4921_p0 = pnand %p4920_p13, %p4914_p2 }
 0x1b4   : > { %4924 = shalt.err (!%p4921_p0)
}
 0x1b5   : > { %p6351_p4 = scmp.ne.s32.totalorder %s6321_s1, 0  ;;  %s6352_s29 = scalar_lea.sflag [#allocation16], %s5287_s9 }
 0x1b6   : > { %s6353_s21 = sld [smem:[#allocation42_spill]] }
 0x1b7   : > { %4071 = dma.hbm_to_vmem [thread:$0]  (!%p6351_p4), %s5581_s24, 16, %s826_s25, %s6352_s29  }
 0x1bc   : > { %p6354_p9 = scmp.ne.s32.totalorder %s6353_s21, 0 }
 0x1bd   : > { %s6355_s0 = sld [smem:[#allocation37_spill]] (!%p6354_p9)  ;;  %s6356_s30 = sld [smem:[#allocation41_spill]] (!%p6354_p9) }
 0x1be   : > { %834 = sbr.rel (%p6354_p9) target bundleno = 3977 (0xf89), region = 100 }
 0x1c3   : > { %s5625_s4 = sand.u32 (!%p6354_p9), 1, %s6355_s0   ;;  %p6357_p5 = scmp.ne.s32.totalorder (!%p6354_p9), %s6356_s30, 0 }
 0x1c4   : > { %s3977_s2 = smul.u32 (!%p6354_p9), 3, %s5625_s4  ;;  %s837_s3 = scalar_lea.sflag (!%p6354_p9), [#allocation4], %s5625_s4 }
 0x1c6   : > { %s5629_s13 = scalar_lea.vmem [#allocation3], %s3977_s2 }
 0x1c7   : > { %4968 = dma.done.wait (%p6357_p5), %s837_s3, 48  }
 0x1c8   : > { %4970 = vsyncadd (%p6357_p5), %s837_s3, 4294967248  ;;  %s6358_s1 = sld [smem:[#allocation38_spill]]  ;;  %s3619_s24 = sshll.u32 %s5625_s4, 6 }
 0x1c9   : > { %s5637_s27 = scalar_lea.vmem [#allocation6], %s3619_s24 }
 0x1ce   : > { %s845_s9 = sand.u32 1, %s6358_s1  }
 0x1cf   : > { %s846_s25 = scalar_lea.sflag [#allocation7], %s845_s9 }
 0x1d0   : > { %4972 = dma.done.wait (%p6357_p5), %s846_s25, 1040  }
 0x1d1   : > { %4974 = vsyncadd (%p6357_p5), %s846_s25, 4294966256  ;;  %s863_s11 = scalar_lea.sflag [#allocation10], %s845_s9 }
 0x1d2   : > { %4976 = dma.done.wait (%p6357_p5), %s863_s11, 32  }
 0x1d3   : > { %4978 = vsyncadd (%p6357_p5), %s863_s11, 4294967264  ;;  %s879_s10 = scalar_lea.sflag [#allocation13], %s845_s9 }
 0x1d4   : > { %4980 = dma.done.wait (%p6357_p5), %s879_s10, 32  }
 0x1d5   : > { %4982 = vsyncadd (%p6357_p5), %s879_s10, 4294967264  ;;  %s3620_s22 = sshll.u32 %s5625_s4, 7  ;;  %s895_s21 = scalar_lea.sflag [#allocation16], %s845_s9 }
 0x1d6   : > { %s5657_s0 = scalar_lea.vmem [#allocation15], %s3620_s22 }
 0x1d7   : > { %4984 = dma.done.wait (%p6357_p5), %s895_s21, 2064  }
 0x1d8   : > { %4986 = vsyncadd (%p6357_p5), %s895_s21, 4294965232  ;;  %p6359_p13 = scmp.eq.s32.totalorder %s6358_s1, 0 }
 0x1da   : > { %4988 = dma.done.wait (%p6359_p13), [#allocation19], 1040   ;;  %p6360_p11 = pmov %p6359_p13 }
 0x1dc   : > { %4990 = vsyncadd (%p6360_p11), [#allocation19], 4294966256  ;;  %p6361_p8 = pmov %p6360_p11 }
 0x1de   : > { %4992 = dma.done.wait (%p6361_p8), [#allocation22], 32   ;;  %p6362_p6 = pmov %p6361_p8 }
 0x1e0   : > { %4994 = vsyncadd (%p6362_p6), [#allocation22], 4294967264  ;;  %p6363_p1 = pmov %p6362_p6 }
 0x1e2   : > { %4996 = dma.done.wait (%p6363_p1), [#allocation25], 2560   ;;  %p6364_p12 = pmov %p6363_p1 }
 0x1e3   : > { %p1030_p7 = scmp.lt.s32.totalorder %s6358_s1, 1  ;;  %s6365_s11 = sld [smem:[#allocation53_spill]] }
 0x1e4   : > { %4998 = vsyncadd (%p6364_p12), [#allocation25], 4294964736  ;;  %s6366_s29 = sld [smem:[#allocation45_spill]]  ;;  %s6367_s6 = sld [smem:[#allocation54_spill]] }
 0x1e5   : > { %s1031_s30 = scalar_select %p1030_p7, %s6358_s1, 1 }
 0x1e6   : > { %p6368_p2 = scmp.ne.s32.totalorder %s6358_s1, 0 }
 0x1e7   : > { %s3978_s3 = smul.u32 192, %s1031_s30  ;;  %s3752_s9 = sshll.u32 %s1031_s30, 7 }
 0x1e8   : > { %s3630_s22 = sshll.u32 %s1031_s30, 1  ;;  %1048 = sbr.rel (%p6368_p2) target bundleno = 498 (0x1f2), region = 164 }
 0x1e9   : > { %s5681_s10 = scalar_lea.vmem %s6365_s11, %s3752_s9  ;;  %s6369_s15 = sld [smem:[#allocation43_spill]] (!%p6368_p2) }
 0x1ea   : > { %s5686_s12 = scalar_lea.vmem %s6366_s29, %s3978_s3  ;;  %s5691_s5 = scalar_lea.vmem %s6367_s6, %s3630_s22 }
 0x1ef   : > { %v1049_v0 = vld [vmem:[%s6369_s15] sm:$0xff]  ;;  %v1050_v1 = vld [vmem:[%s6369_s15 + $0x8] sm:$0xff]  ;;  %v1051_v2 = vld [vmem:[%s6369_s15 + $0x10] sm:$0xff] }
 0x1f0   : > { %1053 = vst [vmem:[#allocation2] sm:$0xff] %v1049_v0  ;;  %1054 = vst [vmem:[#allocation2 + $0x8] sm:$0xff] %v1050_v1  ;;  %v1052_v3 = vld [vmem:[%s6369_s15 + $0x18] sm:$0xff] }
 0x1f1   : > { %1055 = vst [vmem:[#allocation2 + $0x10] sm:$0xff] %v1051_v2  ;;  %1056 = vst [vmem:[#allocation2 + $0x18] sm:$0xff] %v1052_v3 }
 0x1f2 PF: > { %v4259_v8 = vld [vmem:[%s5686_s12 + $0x4] ss:$12 sps:$4 sm:$0xff]   ;;  %v4261_v9 = vld [vmem:[%s5686_s12] ss:$12 sps:$4 sm:$0xff]   ;;  %v4262_v10 = vld [vmem:[%s5686_s12 + $0x1c] ss:$12 sps:$4 sm:$0xff]  }
 0x1f3   : > { %v4264_v11 = vld [vmem:[%s5686_s12 + $0x8] ss:$12 sps:$4 sm:$0xff]   ;;  %1307 = vmatprep.subr.bf16.mxu0 %v4259_v8  ;;  %v4265_v28 = vld [vmem:[%s5686_s12 + $0x18] ss:$12 sps:$4 sm:$0xff]   ;;  %v4268_v30 = vld [vmem:[%s5686_s12 + $0x20] ss:$12 sps:$4 sm:$0xff]  }
 0x1f4   : > { %1308 = vmatpush1.bf16.msra.mxu0 %v4261_v9  ;;  %3843 = vmatprep.subr.bf16.mxu1 %v4264_v11  ;;  %v4266_v29 = vld [vmem:[%s5686_s12 + $0x34] ss:$12 sps:$4 sm:$0xff]   ;;  %v4269_v31 = vld [vmem:[%s5686_s12 + $0x30] ss:$12 sps:$4 sm:$0xff]   ;;  %v4270_v32 = vld [vmem:[%s5686_s12 + $0x4c] ss:$12 sps:$4 sm:$0xff]  }
 0x1f5   : > { %1309 = vmatprep.subr.bf16.mxu0 %v4262_v10  ;;  %3844 = vmatpush3.bf16.msra.mxu1 %v4264_v11  ;;  %v4272_v33 = vld [vmem:[%s5686_s12 + $0x38] ss:$12 sps:$4 sm:$0xff]   ;;  %v4273_v34 = vld [vmem:[%s5686_s12 + $0x48] ss:$12 sps:$4 sm:$0xff]   ;;  %v4276_v36 = vld [vmem:[%s5686_s12 + $0x50] ss:$12 sps:$4 sm:$0xff]  }
 0x1f6   : > { %3845 = vmatprep.subr.bf16.mxu1 %v4268_v30  ;;  %v4274_v35 = vld [vmem:[%s5686_s12 + $0x64] ss:$12 sps:$4 sm:$0xff]   ;;  %v4277_v37 = vld [vmem:[%s5686_s12 + $0x60] ss:$12 sps:$4 sm:$0xff]   ;;  %v4278_v38 = vld [vmem:[%s5686_s12 + $0x7c] ss:$12 sps:$4 sm:$0xff]  }
 0x1f7   : > { %v1057_v4 = vld [vmem:[#allocation2] sm:$0xff]  ;;  %v1058_v6 = vld [vmem:[#allocation2 + $0x8] sm:$0xff]  ;;  %v5040_v43 = vmov 0   ;;  %v4285_v44 = vld [vmem:[%s5686_s12 + $0x90] ss:$12 sps:$4 sm:$0xff]   ;;  %s6370_s8 = scalar_lea.vmem [#allocation9], %s5625_s4 }
 0x1f8   : > { %v1059_v5 = vld [vmem:[#allocation2 + $0x10] sm:$0xff]  ;;  %1063 = vadd.xlane.f32.xlu0 %v1057_v4  ;;  %v1060_v7 = vld [vmem:[#allocation2 + $0x18] sm:$0xff]  ;;  %1310 = vmatpush1.bf16.msra.mxu0 %v4265_v28  ;;  %v4284_v42 = vld [vmem:[%s5686_s12 + $0x80] ss:$12 sps:$4 sm:$0xff]   ;;  %s6371_s14 = scalar_lea.vmem [#allocation11], %s5625_s4  ;;  %vm1557_vm0 = vcmask 261120  }
 0x1f9   : > { %1067 = vadd.xlane.f32.xlu1 %v1059_v5  ;;  %1311 = vmatprep.subr.bf16.mxu0 %v4266_v29  ;;  %v4280_v39 = vld [vmem:[%s5686_s12 + $0x68] ss:$12 sps:$4 sm:$0xff]   ;;  %v4281_v40 = vld [vmem:[%s5686_s12 + $0x78] ss:$12 sps:$4 sm:$0xff]   ;;  %v4290_v48 = vld [vmem:[%s5686_s12 + $0xb0] ss:$12 sps:$4 sm:$0xff]  }
 0x1fa   : > { %3846 = vmatpush3.bf16.msra.mxu1 %v4268_v30  ;;  %v4282_v41 = vld [vmem:[%s5686_s12 + $0x94] ss:$12 sps:$4 sm:$0xff]   ;;  %1339 = vmatprep.mubr.bf16.mxu0 %v5040_v43  ;;  %v4286_v45 = vld [vmem:[%s5686_s12 + $0xac] ss:$12 sps:$4 sm:$0xff]   ;;  %s5042_s1 = smov 32   ;;  %s5043_s7 = smov 64  }
 0x1fb   : > { %3847 = vmatprep.subr.bf16.mxu1 %v4272_v33  ;;  %v4288_v46 = vld [vmem:[%s5686_s12 + $0x98] ss:$12 sps:$4 sm:$0xff]   ;;  %v4289_v47 = vld [vmem:[%s5686_s12 + $0xa8] ss:$12 sps:$4 sm:$0xff]   ;;  %v3632_v63 = vld [vmem:[%s6370_s8] ss:$0 sm:$0xff] }
 0x1fc   : > { %1065 = vadd.xlane.f32.xlu0 %v1058_v6  ;;  %1312 = vmatpush1.bf16.msra.mxu0 %v4269_v31  ;;  %s6372_s3 = sld [smem:[#allocation44_spill]]  ;;  %vm2258_vm1 = vcmask 523264   ;;  %vm2263_vm2 = vcmask 785408   ;;  %s6375_s30 = scalar_lea.vmem [#allocation14], %s5625_s4 }
 0x1fd   : > { %1069 = vadd.xlane.f32.xlu1 %v1060_v7  ;;  %1313 = vmatprep.subr.bf16.mxu0 %v4270_v32 }
 0x1fe   : > { %3848 = vmatpush3.bf16.msra.mxu1 %v4272_v33 }
 0x1ff   : > { %3849 = vmatprep.subr.bf16.mxu1 %v4276_v36 }
 0x200   : > { %1314 = vmatpush1.bf16.msra.mxu0 %v4273_v34 }
 0x201   : > { %1315 = vmatprep.subr.bf16.mxu0 %v4274_v35 }
 0x202   : > { %3850 = vmatpush3.bf16.msra.mxu1 %v4276_v36 }
 0x203   : > { %3851 = vmatprep.subr.bf16.mxu1 %v4280_v39 }
 0x204   : > { %1316 = vmatpush1.bf16.msra.mxu0 %v4277_v37 }
 0x205   : > { %1317 = vmatprep.subr.bf16.mxu0 %v4278_v38 }
 0x206   : > { %3852 = vmatpush3.bf16.msra.mxu1 %v4280_v39 }
 0x207   : > { %3853 = vmatprep.subr.bf16.mxu1 %v4284_v42 }
 0x208   : > { %1318 = vmatpush1.bf16.msra.mxu0 %v4281_v40 }
 0x209   : > { %1319 = vmatprep.subr.bf16.mxu0 %v4282_v41 }
 0x20a   : > { %3854 = vmatpush3.bf16.msra.mxu1 %v4284_v42 }
 0x20b   : > { %3855 = vmatprep.subr.bf16.mxu1 %v4288_v46 }
 0x20c   : > { %1320 = vmatpush1.bf16.msra.mxu0 %v4285_v44 }
 0x20d   : > { %1321 = vmatprep.subr.bf16.mxu0 %v4286_v45 }
 0x20e   : > { %3856 = vmatpush3.bf16.msra.mxu1 %v4288_v46 }
 0x20f   : > { %3857 = vmatprep.subr.bf16.mxu1 %v4290_v48 }
 0x210   : > { %1322 = vmatpush1.bf16.msra.mxu0 %v4289_v47 }
 0x212   : > { %3858 = vmatpush3.bf16.msra.mxu1 %v4290_v48 }
 0x285   : > { %v1064_v12 = vpop.xlane.xlu0 %1063 }
 0x286   : > { %v1068_v13 = vpop.xlane.xlu1 %1067  ;;  %v1072_v14 = vmul.f32 0.0078125, %v1064_v12 }
 0x287   : > { %v1074_v15 = vmul.f32 0.0078125, %v1068_v13 }
 0x288   : > { %v5711_v16 = vsub.f32 %v1057_v4, %v1072_v14  ;;  %v3633_v4 = vld [vmem:[%s6371_s14] ss:$0 sm:$0xff] }
 0x289   : > { %v5713_v17 = vsub.f32 %v1059_v5, %v1074_v15  ;;  %v1066_v18 = vpop.xlane.xlu0 %1065 }
 0x28a   : > { %v1070_v19 = vpop.xlane.xlu1 %1069  ;;  %v1073_v20 = vmul.f32 0.0078125, %v1066_v18  ;;  %v1080_v21 = vmul.f32 %v5711_v16, %v5711_v16 }
 0x28b   : > { %v1075_v22 = vmul.f32 0.0078125, %v1070_v19  ;;  %v1082_v25 = vmul.f32 %v5713_v17, %v5713_v17 }
 0x28c   : > { %v5717_v23 = vsub.f32 %v1058_v6, %v1073_v20  ;;  %1084 = vadd.xlane.f32.xlu0 %v1080_v21  ;;  %v1162_v20 = vld [vmem:[%s5629_s13] sm:$0x7]  ;;  %s5041_s13 = smov 96  }
 0x28d   : > { %v5719_v24 = vsub.f32 %v1060_v7, %v1075_v22 }
 0x28e   : > { %v1081_v26 = vmul.f32 %v5717_v23, %v5717_v23 }
 0x28f   : > { %v1083_v27 = vmul.f32 %v5719_v24, %v5719_v24 }
 0x290   : > { %1088 = vadd.xlane.f32.xlu0 %v1082_v25  ;;  %1086 = vadd.xlane.f32.xlu1 %v1081_v26 }
 0x294   : > { %1090 = vadd.xlane.f32.xlu1 %v1083_v27 }
 0x319   : > { %v1085_v49 = vpop.xlane.xlu0 %1084 }
 0x31a   : > { %v1092_v50 = vmul.f32 0.0078125, %v1085_v49 }
 0x31c   : > { %v1096_v51 = vadd.f32 1e-05, %v1092_v50 }
 0x31d   : > { %v1087_v52 = vpop.xlane.xlu1 %1086  ;;  %v1089_v53 = vpop.xlane.xlu0 %1088 }
 0x31e   : > { %4339 = vrsqrt.f32 %v1096_v51  ;;  %v1093_v54 = vmul.f32 0.0078125, %v1087_v52  ;;  %v1094_v55 = vmul.f32 0.0078125, %v1089_v53 }
 0x320   : > { %v1097_v56 = vadd.f32 1e-05, %v1093_v54  ;;  %v1098_v57 = vadd.f32 1e-05, %v1094_v55 }
 0x321   : > { %v1091_v58 = vpop.xlane.xlu1 %1090 }
 0x322   : > { %4341 = vrsqrt.f32 %v1097_v56  ;;  %v1095_v59 = vmul.f32 0.0078125, %v1091_v58 }
 0x323   : > { %4343 = vrsqrt.f32 %v1098_v57 }
 0x324   : > { %v1099_v60 = vadd.f32 1e-05, %v1095_v59 }
 0x326   : > { %4345 = vrsqrt.f32 %v1099_v60 }
 0x328   : > { %v4340_v61 = vpop.eup %4339 }
 0x329   : > { %v1104_v62 = vmul.f32 %v4340_v61, %v5711_v16 }
 0x32b   : > { %v1114_v3 = vmul.f32 %v3632_v63, %v1104_v62 }
 0x32c   : > { %v4342_v0 = vpop.eup %4341 }
 0x32d   : > { %v4344_v1 = vpop.eup %4343  ;;  %v1105_v2 = vmul.f32 %v4342_v0, %v5717_v23  ;;  %v1124_v8 = vadd.f32 %v3633_v4, %v1114_v3 }
 0x32e   : > { %v1106_v5 = vmul.f32 %v4344_v1, %v5713_v17  ;;  %v1164_v17 = vlaneseq }
 0x32f   : > { %v1115_v6 = vmul.f32 %v3632_v63, %v1105_v2 }
 0x330   : > { %v4346_v7 = vpop.eup %4345  ;;  %v1116_v11 = vmul.f32 %v3632_v63, %v1106_v5  ;;  %v5757_v18 = vshrl.u32 %v1164_v17, 7 }
 0x331   : > { %v1125_v9 = vadd.f32 %v3633_v4, %v1115_v6  ;;  %v1107_v10 = vmul.f32 %v4346_v7, %v5719_v24 }
 0x332   : > { %v1126_v14 = vadd.f32 %v3633_v4, %v1116_v11  ;;  %v1166_v19 = vsub.s32 0, %v5757_v18  ;;  %v1170_v21 = vsub.s32 1, %v5757_v18  ;;  %v1174_v23 = vsub.s32 2, %v5757_v18 }
 0x333   : > { %v1128_v12 = vpack.c.bf16 %v1125_v9, %v1124_v8  ;;  %v1117_v13 = vmul.f32 %v3632_v63, %v1107_v10 }
 0x334   : > { %v1167_v22 = vrot.slane %v1162_v20, %v1166_v19  ;;  %v1171_v25 = vrot.slane %v1162_v20, %v1170_v21  ;;  %v1175_v31 = vrot.slane %v1162_v20, %v1174_v23 }
 0x335   : > { %1340 = vmatmul.mubr.bf16.vlgmr.msra.gmra.mrb[0].mxu0 %v1128_v12  ;;  %3859 = vmatprep.mubr.bf16.mxu1 %v1128_v12  ;;  %v1127_v15 = vadd.f32 %v3633_v4, %v1117_v13 }
 0x336   : > { %1349 = vmatprep.mubr.bf16.mxu0 %v5040_v43 }
 0x337   : > { %v1129_v16 = vpack.c.bf16 %v1127_v15, %v1126_v14 }
 0x339   : > { %3860 = vmatmul.mubr.bf16.vlgmr.msra.gmra.mrb[0].mxu1 %v1129_v16 }
 0x33d   : > { %1350 = vmatmul.mubr.bf16.gmra.mrb[4].mxu0 %v1129_v16 }
 0x408   : > { %v1341_v24 = vpop.f32.mrb[0].mxu0 }
 0x409   : > { %v1343_v26 = vpop.f32.mrb[1].mxu0  ;;  %v1342_v28 = vadd.f32 %v1341_v24, %v1167_v22 }
 0x40a   : > { %v1345_v27 = vpop.f32.mrb[2].mxu0  ;;  %v1344_v32 = vadd.f32 %v1343_v26, %v1171_v25 }
 0x40b   : > { %v1346_v29 = vadd.f32 %v1345_v27, %v1167_v22  ;;  %v1347_v30 = vpop.f32.mrb[3].mxu0 }
 0x40c   : > { %v1348_v33 = vadd.f32 %v1347_v30, %v1171_v25  ;;  %v3861_v34 = vpop.f32.mrb[0].mxu1 }
 0x40d   : > { %v1394_v35 = vpop.f32.mrb[1].mxu1  ;;  %v1449_v36 = vpack.c.bf16 %v1346_v29, %v1342_v28  ;;  %v4174_v37 = vpack.i.bf16 %v1346_v29, %v1342_v28  ;;  %v1403_v41 = vadd.f32 %v3861_v34, %v1175_v31 }
 0x40e   : > { %v3862_v38 = vpop.f32.mrb[2].mxu1  ;;  %v4139_v39 = vpack.i.bf16 %v1348_v33, %v1344_v32  ;;  %v1497_v40 = vpack.c.bf16 %v1348_v33, %v1344_v32  ;;  %v1395_v45 = vadd.f32 %v1394_v35, %v1175_v31 }
 0x40f   : > { %v1406_v42 = vadd.f32 %v3862_v38, %v1175_v31  ;;  %v1397_v44 = vpop.f32.mrb[3].mxu1  ;;  %3867 = vmatprep.mubr.msk.bf16.mxu1 %vm1557_vm0, %v1449_v36 }
 0x410   : > { %v1398_v46 = vadd.f32 %v1397_v44, %v1175_v31  ;;  %4140 = vrot.lane.b32.xlu0 %v4139_v39, %s5041_s13  ;;  %v1351_v47 = vpop.f32.mrb[4].mxu0  ;;  %3967 = vmatprep.subr.msk.bf16.mxu1 %vm1557_vm0, %v1497_v40  ;;  %v1565_v48 = vsel %vm1557_vm0, %v1497_v40, 0 }
 0x411   : > { %v1353_v49 = vpop.f32.mrb[5].mxu0  ;;  %3864 = vmatpush3.bf16.xpose.msra.mxu1 %v1565_v48  ;;  %v5771_v50 = vpack.c.bf16 %v1406_v42, %v1403_v41  ;;  %v5773_v51 = vpack.i.bf16 %v1406_v42, %v1403_v41  ;;  %v1352_v55 = vadd.f32 %v1351_v47, %v1167_v22 }
 0x412   : > { %v1355_v52 = vpop.f32.mrb[6].mxu0  ;;  %v5775_v53 = vpack.c.bf16 %v1398_v46, %v1395_v45  ;;  %v5777_v54 = vpack.i.bf16 %v1398_v46, %v1395_v45  ;;  %v1354_v58 = vadd.f32 %v1353_v49, %v1171_v25 }
 0x413   : > { %v1356_v56 = vadd.f32 %v1355_v52, %v1167_v22  ;;  %v1357_v57 = vpop.f32.mrb[7].mxu0 }
 0x414   : > { %v1358_v59 = vadd.f32 %v1357_v57, %v1171_v25  ;;  %4160 = vrot.lane.b32.xlu0 %v4139_v39, %s5042_s1 }
 0x415   : > { %v1450_v60 = vpack.c.bf16 %v1356_v56, %v1352_v55  ;;  %v4164_v61 = vpack.i.bf16 %v1356_v56, %v1352_v55 }
 0x416   : > { %v4169_v62 = vpack.i.bf16 %v1358_v59, %v1354_v58  ;;  %v1498_v63 = vpack.c.bf16 %v1358_v59, %v1354_v58 }
 0x418   : > { %4170 = vrot.lane.b32.xlu0 %v4169_v62, %s5043_s7  ;;  %4145 = vrot.lane.b32.xlu1 %v4169_v62, %s5041_s13  ;;  %v1568_v0 = vsel %vm1557_vm0, %v1498_v63, 0 }
 0x419   : > { %3968 = vmatprep.subr.msk.bf16.mxu1 %vm1557_vm0, %v1498_v63  ;;  %v1555_v63 = vld [vmem:[%s6372_s3 + $0x10] sm:$0xff] }
 0x41a   : > { %3866 = vmatpush3.bf16.xpose.msra.mxu1 %v1568_v0 }
 0x41c   : > { %4175 = vrot.lane.b32.xlu0 %v4174_v37, %s5043_s7  ;;  %4150 = vrot.lane.b32.xlu1 %v4139_v39, %s5043_s7 }
 0x420   : > { %4190 = vrot.lane.b32.xlu0 %v4174_v37, %s5042_s1  ;;  %4155 = vrot.lane.b32.xlu1 %v4174_v37, %s5041_s13 }
 0x421   : > { %3868 = vmatmul.mubr.msk.bf16.vlgmr.msra.gmra.mrb[4].mxu1 %vm1557_vm0, %v1450_v60 }
 0x424   : > { %4165 = vrot.lane.b32.xlu1 %v4164_v61, %s5041_s13 }
 0x428   : > { %4180 = vrot.lane.b32.xlu1 %v4169_v62, %s5042_s1 }
 0x42c   : > { %4185 = vrot.lane.b32.xlu1 %v4164_v61, %s5043_s7 }
 0x430   : > { %4195 = vrot.lane.b32.xlu1 %v4164_v61, %s5042_s1 }
 0x482   : > { %v4141_v1 = vpop.permute.xlu0 %4140 }
 0x483   : > { %v4143_v2 = vunpack.i.h.bf16 %v4141_v1  ;;  %v4142_v3 = vunpack.i.l.bf16 %v4141_v1  ;;  %v1553_v1 = vld [vmem:[%s6372_s3] sm:$0xff] }
 0x485   : > { %v1499_v4 = vpack.c.bf16 %v4143_v2, %v4142_v3 }
 0x486   : > { %v4161_v5 = vpop.permute.xlu0 %4160 }
 0x487   : > { %3969 = vmatprep.subr.msk.bf16.mxu1 %vm1557_vm0, %v1499_v4  ;;  %v1626_v6 = vsel %vm1557_vm0, %v1499_v4, 0  ;;  %v4163_v11 = vunpack.i.h.bf16 %v4161_v5  ;;  %v4162_v12 = vunpack.i.l.bf16 %v4161_v5 }
 0x488   : > { %3872 = vmatpush3.bf16.xpose.msra.mxu1 %v1626_v6 }
 0x489   : > { %v1503_v23 = vpack.c.bf16 %v4163_v11, %v4162_v12 }
 0x48a   : > { %v4146_v7 = vpop.permute.xlu1 %4145  ;;  %v4171_v8 = vpop.permute.xlu0 %4170 }
 0x48b   : > { %v4148_v9 = vunpack.i.h.bf16 %v4146_v7  ;;  %v4147_v10 = vunpack.i.l.bf16 %v4146_v7  ;;  %v4173_v24 = vunpack.i.h.bf16 %v4171_v8  ;;  %v4172_v25 = vunpack.i.l.bf16 %v4171_v8  ;;  %v5835_v7 = vld [vmem:[%s6372_s3 + $0x18] sm:$0xff] }
 0x48c   : > { %v1748_v47 = vsel %vm1557_vm0, %v1503_v23, 0 }
 0x48d   : > { %v1500_v13 = vpack.c.bf16 %v4148_v9, %v4147_v10  ;;  %v1502_v33 = vpack.c.bf16 %v4173_v24, %v4172_v25 }
 0x48e   : > { %v4151_v14 = vpop.permute.xlu1 %4150  ;;  %v4176_v15 = vpop.permute.xlu0 %4175 }
 0x48f   : > { %v4153_v16 = vunpack.i.h.bf16 %v4151_v14  ;;  %v4152_v17 = vunpack.i.l.bf16 %v4151_v14  ;;  %v4178_v20 = vunpack.i.h.bf16 %v4176_v15  ;;  %v4177_v22 = vunpack.i.l.bf16 %v4176_v15  ;;  %3970 = vmatprep.subr.msk.bf16.mxu1 %vm1557_vm0, %v1500_v13 }
 0x490   : > { %v1629_v26 = vsel %vm1557_vm0, %v1500_v13, 0  ;;  %v1690_v48 = vsel %vm1557_vm0, %v1502_v33, 0 }
 0x491   : > { %v1501_v27 = vpack.c.bf16 %v4153_v16, %v4152_v17  ;;  %v1453_v28 = vpack.c.bf16 %v4178_v20, %v4177_v22  ;;  %3874 = vmatpush3.bf16.xpose.msra.mxu1 %v1629_v26 }
 0x492   : > { %3973 = vmatprep.subr.msk.bf16.mxu1 %vm1557_vm0, %v1503_v23  ;;  %v4156_v29 = vpop.permute.xlu1 %4155  ;;  %v4191_v32 = vpop.permute.xlu0 %4190 }
 0x493   : > { %v4158_v30 = vunpack.i.h.bf16 %v4156_v29  ;;  %v4157_v31 = vunpack.i.l.bf16 %v4156_v29  ;;  %3971 = vmatprep.subr.msk.bf16.mxu0 %vm1557_vm0, %v1501_v27  ;;  %3883 = vmatprep.mubr.msk.bf16.mxu0 %vm1557_vm0, %v1453_v28  ;;  %v1687_v34 = vsel %vm1557_vm0, %v1501_v27, 0  ;;  %v4193_v36 = vunpack.i.h.bf16 %v4191_v32 }
 0x494   : > { %3880 = vmatpush3.bf16.xpose.msra.mxu0 %v1687_v34  ;;  %v4192_v37 = vunpack.i.l.bf16 %v4191_v32 }
 0x495   : > { %v1451_v35 = vpack.c.bf16 %v4158_v30, %v4157_v31  ;;  %3972 = vmatprep.subr.msk.bf16.mxu0 %vm1557_vm0, %v1502_v33 }
 0x496   : > { %v4166_v38 = vpop.permute.xlu1 %4165  ;;  %v1455_v42 = vpack.c.bf16 %v4193_v36, %v4192_v37 }
 0x497   : > { %v4168_v39 = vunpack.i.h.bf16 %v4166_v38  ;;  %v4167_v40 = vunpack.i.l.bf16 %v4166_v38  ;;  %3875 = vmatprep.mubr.msk.bf16.mxu1 %vm1557_vm0, %v1451_v35 }
 0x499   : > { %v1452_v41 = vpack.c.bf16 %v4168_v39, %v4167_v40 }
 0x49a   : > { %v4181_v44 = vpop.permute.xlu1 %4180 }
 0x49b   : > { %v4183_v45 = vunpack.i.h.bf16 %v4181_v44  ;;  %v4182_v46 = vunpack.i.l.bf16 %v4181_v44  ;;  %3876 = vmatmul.mubr.msk.bf16.vlgmr.msra.gmra.mrb[8].mxu1 %vm1557_vm0, %v1452_v41 }
 0x49c   : > { %3888 = vmatpush3.bf16.xpose.msra.mxu1 %v1748_v47  ;;  %3891 = vmatprep.mubr.msk.bf16.mxu1 %vm1557_vm0, %v1455_v42 }
 0x49d   : > { %v1504_v49 = vpack.c.bf16 %v4183_v45, %v4182_v46  ;;  %3882 = vmatpush3.bf16.xpose.msra.mxu0 %v1690_v48 }
 0x49e   : > { %3895 = vmatprep.subr.bf16.mxu0 %v5775_v53  ;;  %v4186_v52 = vpop.permute.xlu1 %4185 }
 0x49f   : > { %v4188_v55 = vunpack.i.h.bf16 %v4186_v52  ;;  %v4187_v56 = vunpack.i.l.bf16 %v4186_v52  ;;  %3974 = vmatprep.subr.msk.bf16.mxu1 %vm1557_vm0, %v1504_v49  ;;  %v1751_v59 = vsel %vm1557_vm0, %v1504_v49, 0 }
 0x4a1   : > { %v1454_v57 = vpack.c.bf16 %v4188_v55, %v4187_v56 }
 0x4a2   : > { %v4196_v58 = vpop.permute.xlu1 %4195 }
 0x4a3   : > { %v4198_v60 = vunpack.i.h.bf16 %v4196_v58  ;;  %v4197_v61 = vunpack.i.l.bf16 %v4196_v58 }
 0x4a4   : > { %3884 = vmatmul.mubr.msk.bf16.vlgmr.msra.gmra.mrb[8].mxu0 %vm1557_vm0, %v1454_v57  ;;  %3890 = vmatpush3.bf16.xpose.msra.mxu1 %v1751_v59 }
 0x4a5   : > { %3896 = vmatpush3.bf16.msra.mxu0 %v5775_v53  ;;  %v1456_v62 = vpack.c.bf16 %v4198_v60, %v4197_v61  ;;  %v5826_v53 = vld [vmem:[%s6372_s3 + $0x8] sm:$0xff] }
 0x4a6   : > { %3897 = vmatprep.subr.bf16.mxu0 %v5771_v50 }
 0x4a9   : > { %3898 = vmatpush3.bf16.msra.mxu0 %v5771_v50 }
 0x4ab   : > { %3892 = vmatmul.mubr.msk.bf16.vlgmr.msra.gmra.mrb[12].mxu1 %vm1557_vm0, %v1456_v62 }
 0x4f4   : > { %v3869_v0 = vpop.f32.mrb[4].mxu1 }
 0x4f5   : > { %v5821_v2 = vadd.f32 %v3869_v0, %v1555_v63  ;;  %v1604_v3 = vpop.f32.mrb[5].mxu1 }
 0x4f6   : > { %v3870_v50 = vpop.f32.mrb[6].mxu1  ;;  %v5828_v4 = vadd.f32 %v1604_v3, %v1553_v1 }
 0x4f7   : > { %v1607_v5 = vpop.f32.mrb[7].mxu1  ;;  %v1808_v6 = vsel %vm1557_vm0, %v5821_v2, -inf  ;;  %v5843_v10 = vadd.f32 %v3870_v50, %v5835_v7 }
 0x4f8   : > { %v5838_v8 = vadd.f32 %v1607_v5, %v5826_v53  ;;  %1809 = vmax.xlane.f32.xlu0 %v1808_v6  ;;  %v1802_v11 = vsel %vm1557_vm0, %v5828_v4, -inf }
 0x4f9   : > { %v1811_v12 = vsel %vm1557_vm0, %v5843_v10, -inf }
 0x4fa   : > { %v1805_v9 = vsel %vm1557_vm0, %v5838_v8, -inf }
 0x4fb   : > { %1806 = vmax.xlane.f32.xlu1 %v1805_v9 }
 0x4fc   : > { %1803 = vmax.xlane.f32.xlu0 %v1802_v11 }
 0x500   : > { %1812 = vmax.xlane.f32.xlu0 %v1811_v12 }
 0x56e   : > { %v3877_v13 = vpop.f32.mrb[8].mxu1 }
 0x56f   : > { %v5849_v14 = vadd.f32 %v3877_v13, %v1555_v63  ;;  %v1665_v15 = vpop.f32.mrb[9].mxu1 }
 0x570   : > { %v3878_v16 = vpop.f32.mrb[10].mxu1  ;;  %v5860_v28 = vadd.f32 %v1665_v15, %v1553_v1 }
 0x571   : > { %v5852_v17 = vadd.f32 %v3878_v16, %v5835_v7  ;;  %v1668_v20 = vpop.f32.mrb[11].mxu1  ;;  %v1820_v22 = vsel %vm1557_vm0, %v5849_v14, -inf }
 0x572   : > { %1821 = vmax.xlane.f32.xlu0 %v1820_v22  ;;  %v5868_v32 = vadd.f32 %v1668_v20, %v5826_v53  ;;  %v1814_v36 = vsel %vm1557_vm0, %v5860_v28, -inf }
 0x573   : > { %v1823_v23 = vsel %vm1557_vm0, %v5852_v17, -inf }
 0x574   : > { %1824 = vmax.xlane.f32.xlu1 %v1823_v23  ;;  %v1817_v40 = vsel %vm1557_vm0, %v5868_v32, -inf }
 0x577   : > { %v3885_v24 = vpop.f32.mrb[8].mxu0 }
 0x578   : > { %v5858_v25 = vadd.f32 %v3885_v24, %v1555_v63  ;;  %v1726_v26 = vpop.f32.mrb[9].mxu0 }
 0x579   : > { %v3886_v27 = vpop.f32.mrb[10].mxu0  ;;  %v5872_v34 = vadd.f32 %v1726_v26, %v1553_v1 }
 0x57a   : > { %v5863_v29 = vadd.f32 %v3886_v27, %v5835_v7  ;;  %v1729_v30 = vpop.f32.mrb[11].mxu0  ;;  %v1832_v31 = vsel %vm1557_vm0, %v5858_v25, -inf }
 0x57b   : > { %1833 = vmax.xlane.f32.xlu0 %v1832_v31  ;;  %v5877_v38 = vadd.f32 %v1729_v30, %v5826_v53  ;;  %v1826_v44 = vsel %vm1557_vm0, %v5872_v34, -inf }
 0x57c   : > { %v1835_v33 = vsel %vm1557_vm0, %v5863_v29, -inf }
 0x57d   : > { %1836 = vmax.xlane.f32.xlu1 %v1835_v33  ;;  %v1829_v45 = vsel %vm1557_vm0, %v5877_v38, -inf }
 0x57e   : > { %v3893_v35 = vpop.f32.mrb[12].mxu1 }
 0x57f   : > { %v1787_v37 = vpop.f32.mrb[13].mxu1  ;;  %1815 = vmax.xlane.f32.xlu0 %v1814_v36  ;;  %v5881_v42 = vadd.f32 %v3893_v35, %v1555_v63 }
 0x580   : > { %v3894_v39 = vpop.f32.mrb[14].mxu1  ;;  %v5887_v46 = vadd.f32 %v1787_v37, %v1553_v1 }
 0x581   : > { %v1790_v41 = vpop.f32.mrb[15].mxu1  ;;  %1818 = vmax.xlane.f32.xlu1 %v1817_v40  ;;  %v1844_v47 = vsel %vm1557_vm0, %v5881_v42, -inf  ;;  %v5902_v59 = vadd.f32 %v3894_v39, %v5835_v7 }
 0x582   : > { %v1838_v48 = vsel %vm1557_vm0, %v5887_v46, -inf  ;;  %v5907_v61 = vadd.f32 %v1790_v41, %v5826_v53 }
 0x583   : > { %1827 = vmax.xlane.f32.xlu0 %v1826_v44  ;;  %v1847_v62 = vsel %vm1557_vm0, %v5902_v59, -inf }
 0x584   : > { %v1841_v1 = vsel %vm1557_vm0, %v5907_v61, -inf }
 0x585   : > { %1830 = vmax.xlane.f32.xlu1 %v1829_v45  ;;  %v1810_v49 = vpop.xlane.xlu0 %1809 }
 0x586   : > { %v1852_v52 = vsub.f32 %v5821_v2, %v1810_v49 }
 0x587   : > { %1845 = vmax.xlane.f32.xlu0 %v1844_v47 }
 0x588   : > { %v1870_v56 = vmul.f32 1.442695, %v1852_v52  ;;  %v1807_v50 = vpop.xlane.xlu1 %1806 }
 0x589   : > { %v1804_v55 = vpop.xlane.xlu0 %1803 }
 0x58a   : > { %v1850_v57 = vsub.f32 %v5828_v4, %v1804_v55  ;;  %4347 = vpow2.f32 %v1870_v56  ;;  %v1851_v4 = vsub.f32 %v5838_v8, %v1807_v50 }
 0x58b   : > { %1839 = vmax.xlane.f32.xlu0 %v1838_v48 }
 0x58c   : > { %v1866_v58 = vmul.f32 1.442695, %v1850_v57  ;;  %v1868_v6 = vmul.f32 1.442695, %v1851_v4 }
 0x58d   : > { %v1813_v3 = vpop.xlane.xlu0 %1812 }
 0x58e   : > { %4349 = vpow2.f32 %v1866_v58  ;;  %v1853_v53 = vsub.f32 %v5843_v10, %v1813_v3 }
 0x590   : > { %v1872_v5 = vmul.f32 1.442695, %v1853_v53 }
 0x592   : > { %4351 = vpow2.f32 %v1872_v5 }
 0x593   : > { %4353 = vpow2.f32 %v1868_v6 }
 0x594   : > { %v5904_v60 = vpop.eup %4347 }
 0x595   : > { %v1904_v63 = vsel %vm1557_vm0, %v5904_v60, 0.0 }
 0x596   : > { %4205 = vrot.lane.b32.xlu1 %v5773_v51, %s5041_s13 }
 0x598   : > { %v5913_v0 = vpop.eup %4349 }
 0x599   : > { %v1898_v2 = vsel %vm1557_vm0, %v5913_v0, 0.0 }
 0x59a   : > { %4210 = vrot.lane.b32.xlu1 %v5777_v54, %s5043_s7 }
 0x59c   : > { %v5923_v7 = vpop.eup %4351 }
 0x59d   : > { %v1907_v9 = vsel %vm1557_vm0, %v5923_v7, 0.0  ;;  %v5927_v11 = vpop.eup %4353 }
 0x5a1   : > { %4200 = vrot.lane.b32.xlu0 %v5777_v54, %s5041_s13 }
 0x5be   : > { %1848 = vmax.xlane.f32.xlu1 %v1847_v62 }
 0x5c0   : > { %1905 = vadd.xlane.f32.xlu0 %v1904_v63 }
 0x5c2   : > { %1842 = vmax.xlane.f32.xlu1 %v1841_v1 }
 0x5c4   : > { %1899 = vadd.xlane.f32.xlu0 %v1898_v2 }
 0x5d3   : > { %4215 = vrot.lane.b32.xlu1 %v5777_v54, %s5042_s1  ;;  %v1901_v54 = vsel %vm1557_vm0, %v5927_v11, 0.0 }
 0x5f7   : > { %1908 = vadd.xlane.f32.xlu1 %v1907_v9 }
 0x5fb   : > { %1902 = vadd.xlane.f32.xlu1 %v1901_v54 }
 0x5ff   : > { %v1822_v10 = vpop.xlane.xlu0 %1821 }
 0x600   : > { %v1856_v12 = vsub.f32 %v5849_v14, %v1822_v10 }
 0x601   : > { %v1825_v8 = vpop.xlane.xlu1 %1824 }
 0x602   : > { %v1878_v13 = vmul.f32 1.442695, %v1856_v12  ;;  %v1857_v15 = vsub.f32 %v5852_v17, %v1825_v8 }
 0x604   : > { %4355 = vpow2.f32 %v1878_v13  ;;  %v1880_v16 = vmul.f32 1.442695, %v1857_v15 }
 0x606   : > { %4357 = vpow2.f32 %v1880_v16 }
 0x608   : > { %v1834_v20 = vpop.xlane.xlu0 %1833 }
 0x609   : > { %v1860_v22 = vsub.f32 %v5858_v25, %v1834_v20 }
 0x60a   : > { %v1837_v23 = vpop.xlane.xlu1 %1836 }
 0x60b   : > { %v1886_v24 = vmul.f32 1.442695, %v1860_v22  ;;  %v1861_v26 = vsub.f32 %v5863_v29, %v1837_v23 }
 0x60c   : > { %v1816_v27 = vpop.xlane.xlu0 %1815 }
 0x60d   : > { %4359 = vpow2.f32 %v1886_v24  ;;  %v1888_v30 = vmul.f32 1.442695, %v1861_v26  ;;  %v1854_v31 = vsub.f32 %v5860_v28, %v1816_v27 }
 0x60e   : > { %v5936_v14 = vpop.eup %4355  ;;  %v1819_v33 = vpop.xlane.xlu1 %1818 }
 0x60f   : > { %4361 = vpow2.f32 %v1888_v30  ;;  %v1874_v17 = vmul.f32 1.442695, %v1854_v31  ;;  %v1855_v35 = vsub.f32 %v5868_v32, %v1819_v33  ;;  %v1916_v36 = vsel %vm1557_vm0, %v5936_v14, 0.0 }
 0x610   : > { %v5941_v25 = vpop.eup %4357  ;;  %v1828_v37 = vpop.xlane.xlu0 %1827  ;;  %1917 = vadd.xlane.f32.xlu0 %v1916_v36 }
 0x611   : > { %4363 = vpow2.f32 %v1874_v17  ;;  %v1876_v29 = vmul.f32 1.442695, %v1855_v35  ;;  %v1858_v39 = vsub.f32 %v5872_v34, %v1828_v37  ;;  %v1919_v28 = vsel %vm1557_vm0, %v5941_v25, 0.0 }
 0x612   : > { %v1831_v40 = vpop.xlane.xlu1 %1830  ;;  %1920 = vadd.xlane.f32.xlu1 %v1919_v28 }
 0x613   : > { %4365 = vpow2.f32 %v1876_v29  ;;  %v1882_v41 = vmul.f32 1.442695, %v1858_v39  ;;  %v1859_v32 = vsub.f32 %v5877_v38, %v1831_v40 }
 0x614   : > { %v1846_v44 = vpop.xlane.xlu0 %1845 }
 0x615   : > { %4367 = vpow2.f32 %v1882_v41  ;;  %v1884_v45 = vmul.f32 1.442695, %v1859_v32  ;;  %v1864_v47 = vsub.f32 %v5881_v42, %v1846_v44 }
 0x616   : > { %v4206_v48 = vpop.permute.xlu1 %4205 }
 0x617   : > { %v5948_v49 = vpop.eup %4359  ;;  %4369 = vpow2.f32 %v1884_v45  ;;  %v1894_v52 = vmul.f32 1.442695, %v1864_v47  ;;  %v4208_v2 = vunpack.i.h.bf16 %v4206_v48  ;;  %v4207_v3 = vunpack.i.l.bf16 %v4206_v48 }
 0x618   : > { %v1840_v34 = vpop.xlane.xlu0 %1839  ;;  %v1928_v55 = vsel %vm1557_vm0, %v5948_v49, 0.0 }
 0x619   : > { %v5952_v56 = vpop.eup %4361  ;;  %4371 = vpow2.f32 %v1894_v52  ;;  %v1862_v57 = vsub.f32 %v5887_v46, %v1840_v34  ;;  %1929 = vadd.xlane.f32.xlu0 %v1928_v55  ;;  %v1548_v13 = vpack.c.bf16 %v4208_v2, %v4207_v3 }
 0x61a   : > { %v4211_v38 = vpop.permute.xlu1 %4210  ;;  %v1931_v58 = vsel %vm1557_vm0, %v5952_v56, 0.0 }
 0x61b   : > { %v5957_v42 = vpop.eup %4363  ;;  %v1890_v62 = vmul.f32 1.442695, %v1862_v57  ;;  %v4213_v63 = vunpack.i.h.bf16 %v4211_v38  ;;  %v4212_v1 = vunpack.i.l.bf16 %v4211_v38  ;;  %1932 = vadd.xlane.f32.xlu1 %v1931_v58 }
 0x61c   : > { %v4201_v53 = vpop.permute.xlu0 %4200  ;;  %v1910_v50 = vsel %vm1557_vm0, %v5957_v42, 0.0 }
 0x61d   : > { %v5961_v4 = vpop.eup %4365  ;;  %4373 = vpow2.f32 %v1890_v62  ;;  %v5963_v46 = vpack.c.bf16 %v4213_v63, %v4212_v1  ;;  %v4203_v5 = vunpack.i.h.bf16 %v4201_v53  ;;  %v4202_v6 = vunpack.i.l.bf16 %v4201_v53  ;;  %1911 = vadd.xlane.f32.xlu0 %v1910_v50 }
 0x61e   : > { %v1913_v9 = vsel %vm1557_vm0, %v5961_v4, 0.0 }
 0x61f   : > { %v5967_v54 = vpop.eup %4367  ;;  %v1547_v10 = vpack.c.bf16 %v4203_v5, %v4202_v6  ;;  %1914 = vadd.xlane.f32.xlu1 %v1913_v9  ;;  %3911 = vmatprep.subr.bf16.mxu0 %v5963_v46 }
 0x620   : > { %v1922_v12 = vsel %vm1557_vm0, %v5967_v54, 0.0 }
 0x621   : > { %v5972_v8 = vpop.eup %4369  ;;  %1923 = vadd.xlane.f32.xlu0 %v1922_v12  ;;  %3903 = vmatprep.subr.bf16.mxu1 %v1547_v10 }
 0x622   : > { %3904 = vmatpush3.bf16.msra.mxu1 %v1547_v10  ;;  %v1925_v15 = vsel %vm1557_vm0, %v5972_v8, 0.0 }
 0x623   : > { %v5976_v16 = vpop.eup %4371  ;;  %1926 = vadd.xlane.f32.xlu1 %v1925_v15  ;;  %3905 = vmatprep.subr.bf16.mxu1 %v1548_v13 }
 0x624   : > { %v1940_v20 = vsel %vm1557_vm0, %v5976_v16, 0.0 }
 0x625   : > { %1941 = vadd.xlane.f32.xlu0 %v1940_v20 }
 0x626   : > { %3906 = vmatpush3.bf16.msra.mxu1 %v1548_v13 }
 0x627   : > { %v5980_v22 = vpop.eup %4373 }
 0x628   : > { %v1934_v23 = vsel %vm1557_vm0, %v5980_v22, 0.0 }
 0x629   : > { %1935 = vadd.xlane.f32.xlu0 %v1934_v23 }
 0x63f   : > { %4220 = vrot.lane.b32.xlu0 %v5773_v51, %s5043_s7 }
 0x64b   : > { %v1849_v24 = vpop.xlane.xlu1 %1848 }
 0x64c   : > { %v1865_v26 = vsub.f32 %v5902_v59, %v1849_v24 }
 0x64d   : > { %v1906_v28 = vpop.xlane.xlu0 %1905 }
 0x64e   : > { %v1896_v27 = vmul.f32 1.442695, %v1865_v26 }
 0x64f   : > { %v1843_v30 = vpop.xlane.xlu1 %1842 }
 0x650   : > { %4375 = vpow2.f32 %v1896_v27  ;;  %v1863_v31 = vsub.f32 %v5907_v61, %v1843_v30 }
 0x651   : > { %v1900_v40 = vpop.xlane.xlu0 %1899 }
 0x652   : > { %v1892_v33 = vmul.f32 1.442695, %v1863_v31 }
 0x653   : > { %v4216_v17 = vpop.permute.xlu1 %4215 }
 0x654   : > { %4377 = vpow2.f32 %v1892_v33  ;;  %v4218_v35 = vunpack.i.h.bf16 %v4216_v17  ;;  %v4217_v36 = vunpack.i.l.bf16 %v4216_v17 }
 0x656   : > { %v5988_v37 = vpack.c.bf16 %v4218_v35, %v4217_v36 }
 0x658   : > { %3919 = vmatprep.subr.bf16.mxu1 %v5988_v37 }
 0x65a   : > { %v5991_v29 = vpop.eup %4375 }
 0x65b   : > { %v1943_v39 = vsel %vm1557_vm0, %v5991_v29, 0.0 }
 0x65c   : > { %1944 = vadd.xlane.f32.xlu1 %v1943_v39 }
 0x65e   : > { %v5995_v59 = vpop.eup %4377 }
 0x65f   : > { %v1937_v61 = vsel %vm1557_vm0, %v5995_v59, 0.0 }
 0x660   : > { %1938 = vadd.xlane.f32.xlu1 %v1937_v61 }
 0x671   : > { %4225 = vrot.lane.b32.xlu1 %v5773_v51, %s5042_s1 }
 0x684   : > { %v1909_v41 = vpop.xlane.xlu1 %1908 }
 0x685   : > { %4379 = vrcp.f32 %v1909_v41 }
 0x686   : > { %4381 = vrcp.f32 %v1900_v40 }
 0x687   : > { %4383 = vrcp.f32 %v1906_v28 }
 0x688   : > { %v1903_v32 = vpop.xlane.xlu1 %1902 }
 0x689   : > { %4385 = vrcp.f32 %v1903_v32 }
 0x68f   : > { %v4380_v44 = vpop.eup %4379 }
 0x690   : > { %v4382_v45 = vpop.eup %4381  ;;  %v1965_v52 = vmul.f32 %v4380_v44, %v5923_v7 }
 0x691   : > { %v4384_v47 = vpop.eup %4383  ;;  %v1962_v34 = vmul.f32 %v4382_v45, %v5913_v0 }
 0x692   : > { %v1964_v51 = vmul.f32 %v4384_v47, %v5904_v60 }
 0x693   : > { %v4386_v48 = vpop.eup %4385 }
 0x694   : > { %v1963_v55 = vmul.f32 %v4386_v48, %v5927_v11  ;;  %v1979_v38 = vpack.c.bf16 %v1965_v52, %v1964_v51  ;;  %v4292_v51 = vld [vmem:[%s5637_s27 + $0x8] sm:$0xff]  }
 0x696   : > { %v1978_v57 = vpack.c.bf16 %v1963_v55, %v1962_v34 }
 0x698   : > { %3899 = vmatprep.mubr.msk.bf16.mxu0 %vm1557_vm0, %v1978_v57 }
 0x699   : > { %3900 = vmatmul.mubr.msk.bf16.vlgmr.msra.gmra.mrb[12].mxu0 %vm1557_vm0, %v1979_v38 }
 0x69a   : > { %3912 = vmatpush3.bf16.msra.mxu0 %v5963_v46 }
 0x69d   : > { %v1918_v58 = vpop.xlane.xlu0 %1917 }
 0x69f   : > { %v1921_v62 = vpop.xlane.xlu1 %1920 }
 0x6a0   : > { %4387 = vrcp.f32 %v1921_v62 }
 0x6a6   : > { %v1930_v63 = vpop.xlane.xlu0 %1929 }
 0x6a8   : > { %v1933_v1 = vpop.xlane.xlu1 %1932 }
 0x6aa   : > { %v1912_v7 = vpop.xlane.xlu0 %1911  ;;  %v4388_v3 = vpop.eup %4387 }
 0x6ab   : > { %4389 = vrcp.f32 %v1912_v7  ;;  %v1969_v6 = vmul.f32 %v4388_v3, %v5941_v25 }
 0x6ac   : > { %4391 = vrcp.f32 %v1918_v58  ;;  %v1915_v0 = vpop.xlane.xlu1 %1914 }
 0x6ad   : > { %4393 = vrcp.f32 %v1915_v0 }
 0x6ae   : > { %v1924_v11 = vpop.xlane.xlu0 %1923 }
 0x6af   : > { %4395 = vrcp.f32 %v1924_v11 }
 0x6b0   : > { %4397 = vrcp.f32 %v1933_v1  ;;  %v1927_v60 = vpop.xlane.xlu1 %1926 }
 0x6b1   : > { %4399 = vrcp.f32 %v1927_v60 }
 0x6b2   : > { %4401 = vrcp.f32 %v1930_v63  ;;  %v1942_v2 = vpop.xlane.xlu0 %1941  ;;  %v4293_v63 = vld [vmem:[%s5637_s27 + $0x10] sm:$0xff]  }
 0x6b5   : > { %v4390_v53 = vpop.eup %4389 }
 0x6b6   : > { %v4392_v50 = vpop.eup %4391  ;;  %v1936_v46 = vpop.xlane.xlu0 %1935  ;;  %v1966_v9 = vmul.f32 %v4390_v53, %v5957_v42  ;;  %v4295_v53 = vld [vmem:[%s5637_s27 + $0x20] sm:$0xff]  }
 0x6b7   : > { %v4394_v5 = vpop.eup %4393  ;;  %v1968_v13 = vmul.f32 %v4392_v50, %v5936_v14  ;;  %v4296_v50 = vld [vmem:[%s5637_s27 + $0x28] sm:$0xff]  }
 0x6b8   : > { %v1967_v10 = vmul.f32 %v4394_v5, %v5961_v4  ;;  %v4298_v5 = vld [vmem:[%s5637_s27 + $0x38] sm:$0xff]  }
 0x6b9   : > { %v4396_v12 = vpop.eup %4395  ;;  %v1981_v30 = vpack.c.bf16 %v1969_v6, %v1968_v13 }
 0x6ba   : > { %v4398_v15 = vpop.eup %4397  ;;  %v4221_v20 = vpop.permute.xlu0 %4220  ;;  %v1980_v23 = vpack.c.bf16 %v1967_v10, %v1966_v9  ;;  %v1970_v33 = vmul.f32 %v4396_v12, %v5967_v54 }
 0x6bb   : > { %v4400_v24 = vpop.eup %4399  ;;  %v4223_v26 = vunpack.i.h.bf16 %v4221_v20  ;;  %v4222_v27 = vunpack.i.l.bf16 %v4221_v20  ;;  %v1973_v42 = vmul.f32 %v4398_v15, %v5952_v56 }
 0x6bc   : > { %v4402_v31 = vpop.eup %4401  ;;  %3907 = vmatprep.mubr.msk.bf16.mxu1 %vm1557_vm0, %v1980_v23  ;;  %v1971_v25 = vmul.f32 %v4400_v24, %v5972_v8 }
 0x6bd   : > { %v1550_v4 = vpack.c.bf16 %v4223_v26, %v4222_v27  ;;  %3908 = vmatmul.mubr.msk.bf16.vlgmr.msra.gmra.mrb[16].mxu1 %vm1557_vm0, %v1981_v30  ;;  %v1972_v17 = vmul.f32 %v4402_v31, %v5948_v49 }
 0x6be   : > { %3920 = vmatpush3.bf16.msra.mxu1 %v5988_v37  ;;  %v1982_v14 = vpack.c.bf16 %v1971_v25, %v1970_v33 }
 0x6bf   : > { %3913 = vmatprep.subr.bf16.mxu0 %v1550_v4  ;;  %v1983_v35 = vpack.c.bf16 %v1973_v42, %v1972_v17 }
 0x6c0   : > { %3914 = vmatpush3.bf16.msra.mxu0 %v1550_v4  ;;  %3915 = vmatprep.mubr.msk.bf16.mxu0 %vm1557_vm0, %v1982_v14 }
 0x6c3   : > { %3916 = vmatmul.mubr.msk.bf16.vlgmr.msra.gmra.mrb[16].mxu0 %vm1557_vm0, %v1983_v35 }
 0x6e9   : > { %v1945_v54 = vpop.xlane.xlu1 %1944 }
 0x6ea   : > { %4403 = vrcp.f32 %v1945_v54 }
 0x6eb   : > { %4405 = vrcp.f32 %v1936_v46  ;;  %v4297_v46 = vld [vmem:[%s5637_s27 + $0x30] sm:$0xff]  }
 0x6ec   : > { %4407 = vrcp.f32 %v1942_v2  ;;  %v4294_v2 = vld [vmem:[%s5637_s27 + $0x18] sm:$0xff]  }
 0x6ed   : > { %v1939_v56 = vpop.xlane.xlu1 %1938 }
 0x6ee   : > { %4409 = vrcp.f32 %v1939_v56 }
 0x6f1   : > { %v4226_v8 = vpop.permute.xlu1 %4225 }
 0x6f2   : > { %v4228_v36 = vunpack.i.h.bf16 %v4226_v8  ;;  %v4227_v39 = vunpack.i.l.bf16 %v4226_v8 }
 0x6f4   : > { %v1552_v37 = vpack.c.bf16 %v4228_v36, %v4227_v39  ;;  %v4404_v61 = vpop.eup %4403 }
 0x6f5   : > { %v4406_v28 = vpop.eup %4405  ;;  %v1977_v41 = vmul.f32 %v4404_v61, %v5991_v29 }
 0x6f6   : > { %3921 = vmatprep.subr.bf16.mxu1 %v1552_v37  ;;  %v4408_v49 = vpop.eup %4407  ;;  %v1974_v32 = vmul.f32 %v4406_v28, %v5980_v22 }
 0x6f7   : > { %3922 = vmatpush3.bf16.msra.mxu1 %v1552_v37  ;;  %v1976_v45 = vmul.f32 %v4408_v49, %v5976_v16  ;;  %v4291_v16 = vld [vmem:[%s5637_s27] sm:$0xff]   ;;  %s6373_s27 = scalar_lea.vmem [#allocation8], %s5625_s4 }
 0x6f8   : > { %v4410_v40 = vpop.eup %4409  ;;  %3927 = vmatprep.subr.bf16.mxu0 %v4291_v16 }
 0x6f9   : > { %v1975_v44 = vmul.f32 %v4410_v40, %v5995_v59  ;;  %v1985_v48 = vpack.c.bf16 %v1977_v41, %v1976_v45  ;;  %3928 = vmatpush3.bf16.msra.mxu0 %v4291_v16 }
 0x6fa   : > { %3929 = vmatprep.subr.bf16.mxu0 %v4292_v51 }
 0x6fb   : > { %v1984_v47 = vpack.c.bf16 %v1975_v44, %v1974_v32 }
 0x6fd   : > { %3923 = vmatprep.mubr.msk.bf16.mxu1 %vm1557_vm0, %v1984_v47  ;;  %3930 = vmatpush3.bf16.msra.mxu0 %v4292_v51 }
 0x6fe   : > { %3924 = vmatmul.mubr.msk.bf16.vlgmr.msra.gmra.mrb[20].mxu1 %vm1557_vm0, %v1985_v48  ;;  %3931 = vmatprep.subr.bf16.mxu0 %v4293_v63 }
 0x6ff   : > { %2602 = vmatprep.mubr.bf16.mxu1 %v5040_v43 }
 0x701   : > { %3932 = vmatpush3.bf16.msra.mxu0 %v4293_v63  ;;  %v4436_v63 = vld [vmem:[#allocation2 + $0x8] sm:$0xff] }
 0x702   : > { %3933 = vmatprep.subr.bf16.mxu0 %v4294_v2 }
 0x705   : > { %3934 = vmatpush3.bf16.msra.mxu0 %v4294_v2 }
 0x706   : > { %3935 = vmatprep.subr.bf16.mxu0 %v4295_v53 }
 0x709   : > { %3936 = vmatpush3.bf16.msra.mxu0 %v4295_v53  ;;  %v4301_v53 = vld [vmem:[%s5681_s10 + $0x4] ss:$8 sps:$4 sm:$0xff]  }
 0x70a   : > { %3937 = vmatprep.subr.bf16.mxu0 %v4296_v50  ;;  %2570 = vmatprep.subr.bf16.mxu1 %v4301_v53 }
 0x70d   : > { %3938 = vmatpush3.bf16.msra.mxu0 %v4296_v50  ;;  %v4304_v50 = vld [vmem:[%s5681_s10 + $0x14] ss:$8 sps:$4 sm:$0xff]  }
 0x70e   : > { %3939 = vmatprep.subr.bf16.mxu0 %v4297_v46 }
 0x711   : > { %3940 = vmatpush3.bf16.msra.mxu0 %v4297_v46  ;;  %v4302_v46 = vld [vmem:[%s5681_s10 + $0x10] ss:$8 sps:$4 sm:$0xff]  }
 0x712   : > { %3941 = vmatprep.subr.bf16.mxu0 %v4298_v5 }
 0x715   : > { %3942 = vmatpush3.bf16.msra.mxu0 %v4298_v5 }
 0x76c   : > { %v6028_v52 = vpop.f32.mrb[12].mxu0 }
 0x76d   : > { %v6030_v34 = vpop.f32.mrb[13].mxu0 }
 0x76e   : > { %v6032_v29 = vpop.f32.mrb[14].mxu0 }
 0x76f   : > { %v6034_v22 = vpop.f32.mrb[15].mxu0 }
 0x790   : > { %v3909_v59 = vpop.f32.mrb[16].mxu1 }
 0x791   : > { %v2081_v55 = vpop.f32.mrb[17].mxu1 }
 0x792   : > { %v3910_v57 = vpop.f32.mrb[18].mxu1 }
 0x793   : > { %v4229_v38 = vpack.i.bf16 %v3910_v57, %v3909_v59  ;;  %v2084_v58 = vpop.f32.mrb[19].mxu1 }
 0x794   : > { %v4239_v62 = vpack.i.bf16 %v2084_v58, %v2081_v55 }
 0x795   : > { %4230 = vrot.lane.b32.xlu1 %v4229_v38, %s5042_s1  ;;  %v4435_v38 = vld [vmem:[#allocation2] sm:$0xff] }
 0x796   : > { %v3917_v1 = vpop.f32.mrb[16].mxu0  ;;  %4240 = vrot.lane.b32.xlu0 %v4239_v62, %s5042_s1 }
 0x797   : > { %v2136_v7 = vpop.f32.mrb[17].mxu0 }
 0x798   : > { %v3918_v0 = vpop.f32.mrb[18].mxu0 }
 0x799   : > { %v4234_v11 = vpack.i.bf16 %v3918_v0, %v3917_v1  ;;  %v2139_v60 = vpop.f32.mrb[19].mxu0 }
 0x79a   : > { %v4244_v3 = vpack.i.bf16 %v2139_v60, %v2136_v7  ;;  %v4437_v7 = vld [vmem:[#allocation2 + $0x10] sm:$0xff]  ;;  %v4438_v60 = vld [vmem:[#allocation2 + $0x18] sm:$0xff] }
 0x79b   : > { %4235 = vrot.lane.b32.xlu1 %v4234_v11, %s5043_s7 }
 0x79c   : > { %4245 = vrot.lane.b32.xlu0 %v4244_v3, %s5043_s7  ;;  %v4299_v3 = vld [vmem:[%s5681_s10] ss:$8 sps:$4 sm:$0xff]  }
 0x79d   : > { %2571 = vmatpush1.bf16.msra.mxu1 %v4299_v3 }
 0x79e   : > { %2572 = vmatprep.subr.bf16.mxu1 %v4304_v50 }
 0x7a1   : > { %2573 = vmatpush1.bf16.msra.mxu1 %v4302_v46 }
 0x7d1   : > { %v3925_v6 = vpop.f32.mrb[20].mxu1 }
 0x7d2   : > { %v2191_v9 = vpop.f32.mrb[21].mxu1 }
 0x7d3   : > { %v3926_v10 = vpop.f32.mrb[22].mxu1 }
 0x7d4   : > { %v4254_v12 = vpack.i.bf16 %v3926_v10, %v3925_v6  ;;  %v2194_v13 = vpop.f32.mrb[23].mxu1 }
 0x7d5   : > { %v4249_v15 = vpack.i.bf16 %v2194_v13, %v2191_v9 }
 0x7d6   : > { %4255 = vrot.lane.b32.xlu1 %v4254_v12, %s5041_s13 }
 0x7d7   : > { %4250 = vrot.lane.b32.xlu0 %v4249_v15, %s5041_s13 }
 0x807   : > { %v4231_v20 = vpop.permute.xlu1 %4230 }
 0x808   : > { %v4241_v23 = vpop.permute.xlu0 %4240  ;;  %v4233_v26 = vunpack.i.h.bf16 %v4231_v20  ;;  %v4232_v27 = vunpack.i.l.bf16 %v4231_v20 }
 0x809   : > { %v4243_v31 = vunpack.i.h.bf16 %v4241_v23  ;;  %v4242_v33 = vunpack.i.l.bf16 %v4241_v23 }
 0x80a   : > { %v2257_v17 = vsel %vm1557_vm0, %v6032_v29, %v4233_v26  ;;  %v2256_v35 = vsel %vm1557_vm0, %v6028_v52, %v4232_v27  ;;  %v3674_v29 = vld [vmem:[%s6373_s27] ss:$0 sm:$0xff] }
 0x80b   : > { %v2255_v56 = vsel %vm1557_vm0, %v6034_v22, %v4243_v31  ;;  %v2254_v8 = vsel %vm1557_vm0, %v6030_v34, %v4242_v33 }
 0x80d   : > { %v4236_v24 = vpop.permute.xlu1 %4235 }
 0x80e   : > { %v4246_v30 = vpop.permute.xlu0 %4245  ;;  %v4238_v25 = vunpack.i.h.bf16 %v4236_v24  ;;  %v4237_v42 = vunpack.i.l.bf16 %v4236_v24 }
 0x80f   : > { %v4248_v4 = vunpack.i.h.bf16 %v4246_v30  ;;  %v4247_v14 = vunpack.i.l.bf16 %v4246_v30 }
 0x810   : > { %v2261_v61 = vsel %vm2258_vm1, %v2256_v35, %v4237_v42  ;;  %v2262_v28 = vsel %vm2258_vm1, %v2257_v17, %v4238_v25  ;;  %v4307_v42 = vld [vmem:[%s5681_s10 + $0x24] ss:$8 sps:$4 sm:$0xff]   ;;  %v4308_v17 = vld [vmem:[%s5681_s10 + $0x30] ss:$8 sps:$4 sm:$0xff]  }
 0x811   : > { %v2259_v41 = vsel %vm2258_vm1, %v2254_v8, %v4247_v14  ;;  %v2260_v32 = vsel %vm2258_vm1, %v2255_v56, %v4248_v4  ;;  %v4305_v4 = vld [vmem:[%s5681_s10 + $0x20] ss:$8 sps:$4 sm:$0xff]   ;;  %2574 = vmatprep.subr.bf16.mxu1 %v4307_v42  ;;  %v4310_v14 = vld [vmem:[%s5681_s10 + $0x34] ss:$8 sps:$4 sm:$0xff]   ;;  %v4313_v35 = vld [vmem:[%s5681_s10 + $0x44] ss:$8 sps:$4 sm:$0xff]  }
 0x812   : > { %2575 = vmatpush1.bf16.msra.mxu1 %v4305_v4  ;;  %v4316_v56 = vld [vmem:[%s5681_s10 + $0x54] ss:$8 sps:$4 sm:$0xff]   ;;  %v4314_v8 = vld [vmem:[%s5681_s10 + $0x50] ss:$8 sps:$4 sm:$0xff]   ;;  %v4336_v42 = vld [vmem:[%s5657_s0 + $0x30] sm:$0xff]  }
 0x813   : > { %2576 = vmatprep.subr.bf16.mxu1 %v4310_v14  ;;  %v4337_v4 = vld [vmem:[%s5657_s0 + $0x78] sm:$0xff]  }
 0x814   : > { %v4338_v14 = vld [vmem:[%s5657_s0 + $0x38] sm:$0xff]  }
 0x816   : > { %2577 = vmatpush1.bf16.msra.mxu1 %v4308_v17  ;;  %v2478_v17 = vld [vmem:[%s5691_s5] sm:$0x3]  ;;  %s6376_s5 = scalar_lea.vmem [#allocation17], %s5625_s4 }
 0x817   : > { %2578 = vmatprep.subr.bf16.mxu1 %v4313_v35  ;;  %v2483_v35 = vrot.slane %v2478_v17, %v1166_v19 }
 0x848   : > { %v4256_v54 = vpop.permute.xlu1 %4255 }
 0x849   : > { %v4258_v36 = vunpack.i.h.bf16 %v4256_v54  ;;  %v4257_v39 = vunpack.i.l.bf16 %v4256_v54  ;;  %v4251_v37 = vpop.permute.xlu0 %4250  ;;  %v4311_v54 = vld [vmem:[%s5681_s10 + $0x40] ss:$8 sps:$4 sm:$0xff]  }
 0x84a   : > { %v4253_v49 = vunpack.i.h.bf16 %v4251_v37  ;;  %v4252_v40 = vunpack.i.l.bf16 %v4251_v37  ;;  %2579 = vmatpush1.bf16.msra.mxu1 %v4311_v54  ;;  %v4322_v37 = vld [vmem:[%s5681_s10 + $0x74] ss:$8 sps:$4 sm:$0xff]   ;;  %v2487_v54 = vrot.slane %v2478_v17, %v1170_v21 }
 0x84b   : > { %v2267_v44 = vsel %vm2263_vm2, %v2262_v28, %v4258_v36  ;;  %v2266_v45 = vsel %vm2263_vm2, %v2261_v61, %v4257_v39  ;;  %2580 = vmatprep.subr.bf16.mxu1 %v4316_v56  ;;  %v4319_v36 = vld [vmem:[%s5681_s10 + $0x64] ss:$8 sps:$4 sm:$0xff]   ;;  %v4317_v39 = vld [vmem:[%s5681_s10 + $0x60] ss:$8 sps:$4 sm:$0xff]   ;;  %v4320_v61 = vld [vmem:[%s5681_s10 + $0x70] ss:$8 sps:$4 sm:$0xff]  }
 0x84c   : > { %v2269_v47 = vpack.c.bf16 %v2267_v44, %v2266_v45  ;;  %v2264_v48 = vsel %vm2263_vm2, %v2259_v41, %v4252_v40  ;;  %v2265_v52 = vsel %vm2263_vm2, %v2260_v32, %v4253_v49  ;;  %s6374_s10 = scalar_lea.vmem [#allocation12], %s5625_s4  ;;  %s6377_s4 = sld [smem:[#allocation38_spill]] }
 0x84d   : > { %v2268_v34 = vpack.c.bf16 %v2265_v52, %v2264_v48 }
 0x84e   : > { %2581 = vmatpush1.bf16.msra.mxu1 %v4314_v8 }
 0x84f   : > { %3943 = vmatprep.mubr.bf16.mxu0 %v2268_v34  ;;  %2582 = vmatprep.subr.bf16.mxu1 %v4319_v36 }
 0x850   : > { %3944 = vmatmul.mubr.bf16.vlgmr.msra.gmra.mrb[20].mxu0 %v2269_v47 }
 0x852   : > { %2583 = vmatpush1.bf16.msra.mxu1 %v4317_v39  ;;  %p3718_p3 = scmp.ne.s32.totalorder %s6377_s4, 1 }
 0x853   : > { %2584 = vmatprep.subr.bf16.mxu1 %v4322_v37 }
 0x856   : > { %2585 = vmatpush1.bf16.msra.mxu1 %v4320_v61 }
 0x923   : > { %v3945_v22 = vpop.f32.mrb[20].mxu0 }
 0x924   : > { %v2375_v59 = vpop.f32.mrb[21].mxu0  ;;  %v2384_v57 = vadd.f32 %v3945_v22, %v3674_v29 }
 0x925   : > { %v2376_v55 = vadd.f32 %v3674_v29, %v2375_v59  ;;  %v3946_v16 = vpop.f32.mrb[22].mxu0  ;;  %v3683_v59 = vld [vmem:[%s6374_s10] ss:$0 sm:$0xff] }
 0x926   : > { %v2378_v51 = vpop.f32.mrb[23].mxu0  ;;  %v6073_v0 = vadd.f32 %v4437_v7, %v2384_v57  ;;  %v2387_v11 = vadd.f32 %v3946_v16, %v3674_v29 }
 0x927   : > { %v6068_v58 = vadd.f32 %v4435_v38, %v2376_v55  ;;  %v2379_v62 = vadd.f32 %v3674_v29, %v2378_v51 }
 0x928   : > { %v6077_v2 = vadd.f32 %v4438_v60, %v2387_v11 }
 0x929   : > { %v6070_v1 = vadd.f32 %v4436_v63, %v2379_v62  ;;  %2396 = vadd.xlane.f32.xlu0 %v6068_v58  ;;  %v3684_v62 = vld [vmem:[%s6375_s30] ss:$0 sm:$0xff] }
 0x92b   : > { %2398 = vadd.xlane.f32.xlu1 %v6070_v1 }
 0x92d   : > { %2400 = vadd.xlane.f32.xlu0 %v6073_v0 }
 0x931   : > { %2402 = vadd.xlane.f32.xlu0 %v6077_v2 }
 0x9b6   : > { %v2397_v5 = vpop.xlane.xlu0 %2396 }
 0x9b7   : > { %v2404_v6 = vmul.f32 0.0078125, %v2397_v5 }
 0x9b8   : > { %v2399_v9 = vpop.xlane.xlu1 %2398 }
 0x9b9   : > { %v2408_v10 = vsub.f32 %v6068_v58, %v2404_v6  ;;  %v2405_v12 = vmul.f32 0.0078125, %v2399_v9 }
 0x9ba   : > { %v2401_v13 = vpop.xlane.xlu0 %2400 }
 0x9bb   : > { %v2409_v15 = vsub.f32 %v6070_v1, %v2405_v12  ;;  %v2406_v20 = vmul.f32 0.0078125, %v2401_v13  ;;  %v2412_v23 = vmul.f32 %v2408_v10, %v2408_v10  ;;  %v4323_v12 = vld [vmem:[%s5657_s0 + $0x40] sm:$0xff]  }
 0x9bc   : > { %v4324_v13 = vld [vmem:[%s5657_s0] sm:$0xff]   ;;  %3805 = vmatprep.subr.bf16.mxu0 %v4323_v12 }
 0x9bd   : > { %v2410_v24 = vsub.f32 %v6073_v0, %v2406_v20  ;;  %2416 = vadd.xlane.f32.xlu0 %v2412_v23  ;;  %v2413_v26 = vmul.f32 %v2409_v15, %v2409_v15  ;;  %3806 = vmatpush3.bf16.msra.mxu0 %v4324_v13  ;;  %v4326_v20 = vld [vmem:[%s5657_s0 + $0x8] sm:$0xff]   ;;  %v4327_v23 = vld [vmem:[%s5657_s0 + $0x50] sm:$0xff]  }
 0x9be   : > { %v2403_v27 = vpop.xlane.xlu0 %2402 }
 0x9bf   : > { %v2407_v30 = vmul.f32 0.0078125, %v2403_v27  ;;  %2418 = vadd.xlane.f32.xlu1 %v2413_v26  ;;  %v2414_v31 = vmul.f32 %v2410_v24, %v2410_v24  ;;  %v4330_v26 = vld [vmem:[%s5657_s0 + $0x18] sm:$0xff]   ;;  %v4331_v27 = vld [vmem:[%s5657_s0 + $0x60] sm:$0xff]  }
 0x9c1   : > { %v2411_v33 = vsub.f32 %v6077_v2, %v2407_v30  ;;  %2420 = vadd.xlane.f32.xlu0 %v2414_v31  ;;  %v4332_v30 = vld [vmem:[%s5657_s0 + $0x20] sm:$0xff]   ;;  %v4333_v31 = vld [vmem:[%s5657_s0 + $0x68] sm:$0xff]  }
 0x9c3   : > { %v2415_v25 = vmul.f32 %v2411_v33, %v2411_v33 }
 0x9c5   : > { %2422 = vadd.xlane.f32.xlu1 %v2415_v25  ;;  %v4335_v25 = vld [vmem:[%s5657_s0 + $0x70] sm:$0xff]  }
 0xa4a   : > { %v2417_v28 = vpop.xlane.xlu0 %2416 }
 0xa4b   : > { %v2424_v49 = vmul.f32 0.0078125, %v2417_v28 }
 0xa4c   : > { %v2419_v40 = vpop.xlane.xlu1 %2418 }
 0xa4d   : > { %v2428_v41 = vadd.f32 1e-05, %v2424_v49  ;;  %v2425_v32 = vmul.f32 0.0078125, %v2419_v40 }
 0xa4e   : > { %v2421_v44 = vpop.xlane.xlu0 %2420 }
 0xa4f   : > { %4411 = vrsqrt.f32 %v2428_v41  ;;  %v2429_v45 = vadd.f32 1e-05, %v2425_v32  ;;  %v2426_v47 = vmul.f32 0.0078125, %v2421_v44 }
 0xa51   : > { %4413 = vrsqrt.f32 %v2429_v45  ;;  %v2430_v48 = vadd.f32 1e-05, %v2426_v47 }
 0xa52   : > { %v2423_v52 = vpop.xlane.xlu1 %2422 }
 0xa53   : > { %4415 = vrsqrt.f32 %v2430_v48  ;;  %v2427_v34 = vmul.f32 0.0078125, %v2423_v52 }
 0xa55   : > { %v2431_v29 = vadd.f32 1e-05, %v2427_v34 }
 0xa57   : > { %4417 = vrsqrt.f32 %v2431_v29 }
 0xa59   : > { %v4412_v22 = vpop.eup %4411 }
 0xa5a   : > { %v2436_v55 = vmul.f32 %v4412_v22, %v2408_v10 }
 0xa5b   : > { %v4414_v16 = vpop.eup %4413 }
 0xa5c   : > { %v2437_v51 = vmul.f32 %v4414_v16, %v2409_v15  ;;  %v2446_v57 = vmul.f32 %v3683_v59, %v2436_v55  ;;  %v4325_v15 = vld [vmem:[%s5657_s0 + $0x48] sm:$0xff]  }
 0xa5d   : > { %v4416_v38 = vpop.eup %4415  ;;  %3807 = vmatprep.subr.bf16.mxu0 %v4325_v15 }
 0xa5e   : > { %v2447_v63 = vmul.f32 %v3683_v59, %v2437_v51  ;;  %v2456_v7 = vadd.f32 %v3684_v62, %v2446_v57  ;;  %v2438_v60 = vmul.f32 %v4416_v38, %v2410_v24  ;;  %3808 = vmatpush3.bf16.msra.mxu0 %v4326_v20  ;;  %v4329_v24 = vld [vmem:[%s5657_s0 + $0x58] sm:$0xff]  }
 0xa5f   : > { %3809 = vmatprep.subr.bf16.mxu0 %v4327_v23 }
 0xa60   : > { %v2457_v11 = vadd.f32 %v3684_v62, %v2447_v63  ;;  %v2448_v46 = vmul.f32 %v3683_v59, %v2438_v60 }
 0xa61   : > { %v4418_v3 = vpop.eup %4417 }
 0xa62   : > { %v2460_v53 = vpack.c.bf16 %v2457_v11, %v2456_v7  ;;  %v2439_v50 = vmul.f32 %v4418_v3, %v2411_v33  ;;  %v2458_v9 = vadd.f32 %v3684_v62, %v2448_v46  ;;  %v4334_v33 = vld [vmem:[%s5657_s0 + $0x28] sm:$0xff]  }
 0xa64   : > { %2603 = vmatmul.mubr.bf16.vlgmr.msra.gmra.mrb[24].mxu1 %v2460_v53  ;;  %v2449_v5 = vmul.f32 %v3683_v59, %v2439_v50 }
 0xa65   : > { %2612 = vmatprep.mubr.bf16.mxu1 %v5040_v43  ;;  %v4328_v43 = vld [vmem:[%s5657_s0 + $0x10] sm:$0xff]  }
 0xa66   : > { %v2459_v6 = vadd.f32 %v3684_v62, %v2449_v5  ;;  %3810 = vmatpush3.bf16.msra.mxu0 %v4328_v43 }
 0xa67   : > { %3811 = vmatprep.subr.bf16.mxu0 %v4329_v24 }
 0xa68   : > { %v2461_v10 = vpack.c.bf16 %v2459_v6, %v2458_v9 }
 0xa6a   : > { %3812 = vmatpush3.bf16.msra.mxu0 %v4330_v26 }
 0xa6b   : > { %3813 = vmatprep.subr.bf16.mxu0 %v4331_v27 }
 0xa6c   : > { %2613 = vmatmul.mubr.bf16.gmra.mrb[28].mxu1 %v2461_v10 }
 0xa6e   : > { %3814 = vmatpush3.bf16.msra.mxu0 %v4332_v30 }
 0xa6f   : > { %3815 = vmatprep.subr.bf16.mxu0 %v4333_v31 }
 0xa72   : > { %3816 = vmatpush3.bf16.msra.mxu0 %v4334_v33 }
 0xa73   : > { %3817 = vmatprep.subr.bf16.mxu0 %v4335_v25 }
 0xa76   : > { %3818 = vmatpush3.bf16.msra.mxu0 %v4336_v42 }
 0xa77   : > { %3819 = vmatprep.subr.bf16.mxu0 %v4337_v4 }
 0xa7a   : > { %3820 = vmatpush3.bf16.msra.mxu0 %v4338_v14 }
 0xb37   : > { %v2604_v56 = vpop.f32.mrb[24].mxu1 }
 0xb38   : > { %v6126_v8 = vadd.f32 %v2604_v56, %v2483_v35  ;;  %v2606_v36 = vpop.f32.mrb[25].mxu1 }
 0xb39   : > { %v6128_v39 = vadd.f32 %v2606_v36, %v2487_v54  ;;  %v2608_v37 = vpop.f32.mrb[26].mxu1 }
 0xb3a   : > { %v2623_v61 = vmul.f32 %v6126_v8, %v6126_v8  ;;  %v6132_v28 = vadd.f32 %v2608_v37, %v2483_v35  ;;  %v2610_v49 = vpop.f32.mrb[27].mxu1 }
 0xb3b   : > { %v2624_v40 = vmul.f32 %v6128_v39, %v6128_v39  ;;  %v6136_v19 = vadd.f32 %v2610_v49, %v2487_v54 }
 0xb3c   : > { %v2631_v18 = vmul.f32 %v2623_v61, %v6126_v8  ;;  %v2625_v21 = vmul.f32 %v6132_v28, %v6132_v28 }
 0xb3d   : > { %v2632_v41 = vmul.f32 %v2624_v40, %v6128_v39  ;;  %v2626_v32 = vmul.f32 %v6136_v19, %v6136_v19 }
 0xb3e   : > { %v2639_v44 = vmul.f32 0.044715, %v2631_v18  ;;  %v2633_v45 = vmul.f32 %v2625_v21, %v6132_v28 }
 0xb3f   : > { %v2640_v47 = vmul.f32 0.044715, %v2632_v41  ;;  %v2634_v48 = vmul.f32 %v2626_v32, %v6136_v19  ;;  %v2614_v52 = vpop.f32.mrb[28].mxu1 }
 0xb40   : > { %v2647_v34 = vadd.f32 %v2639_v44, %v6126_v8  ;;  %v2641_v29 = vmul.f32 0.044715, %v2633_v45  ;;  %v6147_v22 = vadd.f32 %v2614_v52, %v2483_v35  ;;  %v2616_v59 = vpop.f32.mrb[29].mxu1 }
 0xb41   : > { %v2648_v55 = vadd.f32 %v2640_v47, %v6128_v39  ;;  %v2642_v16 = vmul.f32 0.044715, %v2634_v48  ;;  %v6150_v51 = vadd.f32 %v2616_v59, %v2487_v54  ;;  %v2618_v57 = vpop.f32.mrb[30].mxu1 }
 0xb42   : > { %v2655_v38 = vmul.f32 0.7978846, %v2647_v34  ;;  %v2649_v62 = vadd.f32 %v2641_v29, %v6132_v28  ;;  %v2627_v63 = vmul.f32 %v6147_v22, %v6147_v22  ;;  %v6155_v7 = vadd.f32 %v2618_v57, %v2483_v35  ;;  %v2620_v11 = vpop.f32.mrb[31].mxu1 }
 0xb43   : > { %v2656_v60 = vmul.f32 0.7978846, %v2648_v55  ;;  %v2650_v3 = vadd.f32 %v2642_v16, %v6136_v19  ;;  %v2628_v53 = vmul.f32 %v6150_v51, %v6150_v51  ;;  %v6160_v50 = vadd.f32 %v2620_v11, %v2487_v54 }
 0xb44   : > { %4419 = vtanh.f32 %v2655_v38  ;;  %v2657_v46 = vmul.f32 0.7978846, %v2649_v62  ;;  %v2635_v5 = vmul.f32 %v2627_v63, %v6147_v22  ;;  %v2629_v6 = vmul.f32 %v6155_v7, %v6155_v7 }
 0xb45   : > { %4421 = vtanh.f32 %v2656_v60  ;;  %v2658_v9 = vmul.f32 0.7978846, %v2650_v3  ;;  %v2636_v10 = vmul.f32 %v2628_v53, %v6150_v51  ;;  %v2630_v12 = vmul.f32 %v6160_v50, %v6160_v50 }
 0xb46   : > { %4423 = vtanh.f32 %v2657_v46  ;;  %v2643_v13 = vmul.f32 0.044715, %v2635_v5  ;;  %v2637_v15 = vmul.f32 %v2629_v6, %v6155_v7  ;;  %v3701_v5 = vld [vmem:[%s6376_s5] ss:$0 sm:$0xff] }
 0xb47   : > { %4425 = vtanh.f32 %v2658_v9  ;;  %v2644_v20 = vmul.f32 0.044715, %v2636_v10  ;;  %v2638_v23 = vmul.f32 %v2630_v12, %v6160_v50 }
 0xb48   : > { %v2651_v43 = vadd.f32 %v2643_v13, %v6147_v22  ;;  %v2645_v24 = vmul.f32 0.044715, %v2637_v15 }
 0xb49   : > { %v2652_v26 = vadd.f32 %v2644_v20, %v6150_v51  ;;  %v2646_v27 = vmul.f32 0.044715, %v2638_v23 }
 0xb4a   : > { %v2659_v30 = vmul.f32 0.7978846, %v2651_v43  ;;  %v2653_v31 = vadd.f32 %v2645_v24, %v6155_v7 }
 0xb4b   : > { %v2660_v33 = vmul.f32 0.7978846, %v2652_v26  ;;  %v2654_v25 = vadd.f32 %v2646_v27, %v6160_v50 }
 0xb4c   : > { %4427 = vtanh.f32 %v2659_v30  ;;  %v2661_v42 = vmul.f32 0.7978846, %v2653_v31 }
 0xb4d   : > { %4429 = vtanh.f32 %v2660_v33  ;;  %v2662_v4 = vmul.f32 0.7978846, %v2654_v25  ;;  %v4440_v25 = vld [vmem:[#allocation18 + $0x8] sm:$0xff] (!%p3718_p3)  }
 0xb4e   : > { %v4420_v14 = vpop.eup %4419  ;;  %4431 = vtanh.f32 %v2661_v42  ;;  %v4441_v42 = vld [vmem:[#allocation18 + $0x10] sm:$0xff] (!%p3718_p3)  }
 0xb4f   : > { %v4422_v17 = vpop.eup %4421  ;;  %v2671_v35 = vadd.f32 1.0, %v4420_v14  ;;  %4433 = vtanh.f32 %v2662_v4  ;;  %v4442_v4 = vld [vmem:[#allocation18 + $0x18] sm:$0xff] (!%p3718_p3)   ;;  %v4445_v14 = vld [vmem:[#allocation18 + $0x30] sm:$0xff] (!%p3718_p3)  }
 0xb50   : > { %v4424_v54 = vpop.eup %4423  ;;  %v2672_v56 = vadd.f32 1.0, %v4422_v17  ;;  %v4446_v17 = vld [vmem:[#allocation18 + $0x38] sm:$0xff] (!%p3718_p3)  }
 0xb51   : > { %v4426_v36 = vpop.eup %4425  ;;  %v2679_v37 = vmul.f32 0.5, %v2671_v35  ;;  %v2673_v61 = vadd.f32 1.0, %v4424_v54  ;;  %v3719_v54 = vld [vmem:[#allocation20] ss:$0 sm:$0xff] (!%p3718_p3) }
 0xb52   : > { %v2674_v49 = vadd.f32 1.0, %v4426_v36  ;;  %v2680_v40 = vmul.f32 0.5, %v2672_v56 }
 0xb53   : > { %v2681_v18 = vmul.f32 0.5, %v2673_v61  ;;  %v2687_v41 = vmul.f32 %v2679_v37, %v6126_v8 }
 0xb54   : > { %v2682_v21 = vmul.f32 0.5, %v2674_v49  ;;  %v2688_v45 = vmul.f32 %v2680_v40, %v6128_v39 }
 0xb55   : > { %v2689_v32 = vmul.f32 %v2681_v18, %v6132_v28 }
 0xb56   : > { %v4428_v44 = vpop.eup %4427  ;;  %v2690_v47 = vmul.f32 %v2682_v21, %v6136_v19 }
 0xb57   : > { %v4430_v48 = vpop.eup %4429  ;;  %v2695_v52 = vpack.c.bf16 %v2689_v32, %v2687_v41  ;;  %v2675_v34 = vadd.f32 1.0, %v4428_v44 }
 0xb58   : > { %v4432_v29 = vpop.eup %4431  ;;  %v2696_v59 = vpack.c.bf16 %v2690_v47, %v2688_v45  ;;  %v2676_v55 = vadd.f32 1.0, %v4430_v48 }
 0xb59   : > { %v4434_v16 = vpop.eup %4433  ;;  %v2677_v57 = vadd.f32 1.0, %v4432_v29  ;;  %v2683_v38 = vmul.f32 0.5, %v2675_v34 }
 0xb5a   : > { %2866 = vmatprep.mubr.bf16.mxu0 %v2696_v59  ;;  %v2678_v62 = vadd.f32 1.0, %v4434_v16  ;;  %v2684_v8 = vmul.f32 0.5, %v2676_v55 }
 0xb5b   : > { %2867 = vmatmul.mubr.bf16.vlgmr.msra.gmra.mrb[24].mxu0 %v2695_v52  ;;  %v2685_v28 = vmul.f32 0.5, %v2677_v57  ;;  %v2691_v39 = vmul.f32 %v2683_v38, %v6147_v22 }
 0xb5c   : > { %v2686_v63 = vmul.f32 0.5, %v2678_v62  ;;  %v2692_v11 = vmul.f32 %v2684_v8, %v6150_v51 }
 0xb5d   : > { %v2693_v19 = vmul.f32 %v2685_v28, %v6155_v7 }
 0xb5e   : > { %v2694_v60 = vmul.f32 %v2686_v63, %v6160_v50 }
 0xb5f   : > { %v2697_v3 = vpack.c.bf16 %v2693_v19, %v2691_v39 }
 0xb60   : > { %v2698_v53 = vpack.c.bf16 %v2694_v60, %v2692_v11 }
 0xb62   : > { %2874 = vmatprep.mubr.bf16.mxu0 %v2698_v53 }
 0xb63   : > { %2875 = vmatmul.mubr.bf16.gmra.mrb[28].mxu0 %v2697_v3 }
 0xc2e   : > { %v3821_v46 = vpop.f32.mrb[24].mxu0 }
 0xc2f   : > { %v3822_v6 = vpop.f32.mrb[25].mxu0 }
 0xc30   : > { %v3823_v9 = vadd.f32 %v3822_v6, %v3821_v46  ;;  %v3824_v10 = vpop.f32.mrb[26].mxu0 }
 0xc31   : > { %v3825_v12 = vpop.f32.mrb[27].mxu0 }
 0xc32   : > { %v2869_v13 = vadd.f32 %v3823_v9, %v3701_v5  ;;  %v3826_v15 = vadd.f32 %v3825_v12, %v3824_v10 }
 0xc34   : > { %v2883_v22 = vadd.f32 %v2869_v13, %v6068_v58  ;;  %v2872_v7 = vadd.f32 %v3826_v15, %v3701_v5  ;;  %v4439_v58 = vld [vmem:[#allocation18] sm:$0xff] (!%p3718_p3)  }
 0xc35   : > { %3947 = vmatprep.subr.bf16.mxu0 (!%p3718_p3), %v4439_v58 }
 0xc36   : > { %2887 = vst [vmem:[#allocation2] sm:$0xff] %v2883_v22  ;;  %v2884_v51 = vadd.f32 %v2872_v7, %v6070_v1  ;;  %v3827_v50 = vpop.f32.mrb[28].mxu0  ;;  %3948 = vmatpush3.bf16.msra.mxu0 (!%p3718_p3), %v4439_v58 }
 0xc37   : > { %v3828_v20 = vpop.f32.mrb[29].mxu0  ;;  %3949 = vmatprep.subr.bf16.mxu0 (!%p3718_p3), %v4440_v25 }
 0xc38   : > { %2888 = vst [vmem:[#allocation2 + $0x8] sm:$0xff] %v2884_v51  ;;  %v3829_v23 = vadd.f32 %v3828_v20, %v3827_v50  ;;  %v3830_v43 = vpop.f32.mrb[30].mxu0  ;;  %v2895_v1 = vpack.c.bf16 (!%p3718_p3), %v2884_v51, %v2883_v22  ;;  %v4447_v20 = vld [vmem:[#allocation24 + $0x4] ss:$8 sps:$4 sm:$0xff] (!%p3718_p3)  }
 0xc39   : > { %v3831_v24 = vpop.f32.mrb[31].mxu0  ;;  %3217 = vmatprep.subr.bf16.mxu1 (!%p3718_p3), %v4447_v20 }
 0xc3a   : > { %v2877_v26 = vadd.f32 %v3829_v23, %v3701_v5  ;;  %v3832_v27 = vadd.f32 %v3831_v24, %v3830_v43  ;;  %2894 = sbr.rel (%p3718_p3) target bundleno = 3942 (0xf66), region = 168  ;;  %3963 = vmatprep.mubr.bf16.mxu0 (!%p3718_p3), %v2895_v1  ;;  %3950 = vmatpush3.bf16.msra.mxu0 (!%p3718_p3), %v4440_v25  ;;  %v4449_v23 = vld [vmem:[#allocation24] ss:$8 sps:$4 sm:$0xff] (!%p3718_p3)   ;;  %v4450_v43 = vld [vmem:[#allocation24 + $0x14] ss:$8 sps:$4 sm:$0xff] (!%p3718_p3)  }
 0xc3b   : > { %3951 = vmatprep.subr.bf16.mxu0 (!%p3718_p3), %v4441_v42  ;;  %3218 = vmatpush1.bf16.msra.mxu1 (!%p3718_p3), %v4449_v23  ;;  %v3270_v23 = vld [vmem:[#allocation26] sm:$0xff] (!%p3718_p3) }
 0xc3c   : > { %v2885_v30 = vadd.f32 %v2877_v26, %v6073_v0  ;;  %v2880_v31 = vadd.f32 %v3832_v27, %v3701_v5  ;;  %v4443_v0 = vld [vmem:[#allocation18 + $0x20] sm:$0xff] (!%p3718_p3)   ;;  %3219 = vmatprep.subr.bf16.mxu1 (!%p3718_p3), %v4450_v43  ;;  %v3271_v43 = vld [vmem:[#allocation26 + $0x8] sm:$0xff] (!%p3718_p3) }
 0xc3e   : > { %2889 = vst [vmem:[#allocation2 + $0x10] sm:$0xff] %v2885_v30  ;;  %v2886_v33 = vadd.f32 %v2880_v31, %v6077_v2  ;;  %3952 = vmatpush3.bf16.msra.mxu0 (!%p3718_p3), %v4441_v42  ;;  %v4444_v2 = vld [vmem:[#allocation18 + $0x28] sm:$0xff] (!%p3718_p3)  }
 0xc3f   : > { %3953 = vmatprep.subr.bf16.mxu0 (!%p3718_p3), %v4442_v4 }
 0xc40   : > { %2890 = vst [vmem:[#allocation2 + $0x18] sm:$0xff] %v2886_v33  ;;  %v2896_v35 = vpack.c.bf16 (!%p3718_p3), %v2886_v33, %v2885_v30 }
 0xc42   : > { %3954 = vmatpush3.bf16.msra.mxu0 %v4442_v4 }
 0xc43   : > { %3955 = vmatprep.subr.bf16.mxu0 %v4443_v0 }
 0xc46   : > { %3956 = vmatpush3.bf16.msra.mxu0 %v4443_v0 }
 0xc47   : > { %3957 = vmatprep.subr.bf16.mxu0 %v4444_v2 }
 0xc4a   : > { %3958 = vmatpush3.bf16.msra.mxu0 %v4444_v2 }
 0xc4b   : > { %3959 = vmatprep.subr.bf16.mxu0 %v4445_v14 }
 0xc4e   : > { %3960 = vmatpush3.bf16.msra.mxu0 %v4445_v14 }
 0xc4f   : > { %3961 = vmatprep.subr.bf16.mxu0 %v4446_v17 }
 0xc52   : > { %3962 = vmatpush3.bf16.msra.mxu0 %v4446_v17 }
 0xc55   : > { %3964 = vmatmul.mubr.bf16.vlgmr.msra.gmra.mrb[0].mxu0 %v2896_v35 }
 0xd28   : > { %v3965_v56 = vpop.f32.mrb[0].mxu0 }
 0xd29   : > { %v3011_v36 = vadd.f32 %v3965_v56, %v3719_v54  ;;  %v3002_v37 = vpop.f32.mrb[1].mxu0  ;;  %v4453_v56 = vld [vmem:[#allocation24 + $0x24] ss:$8 sps:$4 sm:$0xff]  }
 0xd2a   : > { %v3003_v61 = vadd.f32 %v3719_v54, %v3002_v37  ;;  %v3966_v49 = vpop.f32.mrb[2].mxu0  ;;  %v4456_v37 = vld [vmem:[#allocation24 + $0x34] ss:$8 sps:$4 sm:$0xff]  }
 0xd2b   : > { %v3019_v40 = vmul.f32 %v3011_v36, %v3011_v36  ;;  %v3014_v18 = vadd.f32 %v3966_v49, %v3719_v54  ;;  %v3005_v21 = vpop.f32.mrb[3].mxu0  ;;  %v4459_v49 = vld [vmem:[#allocation24 + $0x44] ss:$8 sps:$4 sm:$0xff]  }
 0xd2c   : > { %v3017_v41 = vmul.f32 %v3003_v61, %v3003_v61  ;;  %v3006_v32 = vadd.f32 %v3719_v54, %v3005_v21  ;;  %v4452_v54 = vld [vmem:[#allocation24 + $0x10] ss:$8 sps:$4 sm:$0xff]  }
 0xd2d   : > { %v3023_v44 = vmul.f32 %v3019_v40, %v3011_v36  ;;  %v3020_v45 = vmul.f32 %v3014_v18, %v3014_v18  ;;  %3220 = vmatpush1.bf16.msra.mxu1 %v4452_v54  ;;  %v4461_v40 = vld [vmem:[#allocation24 + $0x40] ss:$8 sps:$4 sm:$0xff]   ;;  %v4464_v21 = vld [vmem:[#allocation24 + $0x50] ss:$8 sps:$4 sm:$0xff]  }
 0xd2e   : > { %v3021_v47 = vmul.f32 %v3017_v41, %v3003_v61  ;;  %v3018_v48 = vmul.f32 %v3006_v32, %v3006_v32  ;;  %3221 = vmatprep.subr.bf16.mxu1 %v4453_v56  ;;  %v4465_v41 = vld [vmem:[#allocation24 + $0x64] ss:$8 sps:$4 sm:$0xff]  }
 0xd2f   : > { %v3027_v52 = vmul.f32 0.044715, %v3023_v44  ;;  %v3024_v34 = vmul.f32 %v3020_v45, %v3014_v18  ;;  %v4467_v44 = vld [vmem:[#allocation24 + $0x60] ss:$8 sps:$4 sm:$0xff]   ;;  %v4468_v45 = vld [vmem:[#allocation24 + $0x74] ss:$8 sps:$4 sm:$0xff]  }
 0xd30   : > { %v3025_v29 = vmul.f32 0.044715, %v3021_v47  ;;  %v3022_v59 = vmul.f32 %v3018_v48, %v3006_v32  ;;  %v4470_v47 = vld [vmem:[#allocation24 + $0x70] ss:$8 sps:$4 sm:$0xff]  }
 0xd31   : > { %v3028_v55 = vmul.f32 0.044715, %v3024_v34  ;;  %v3031_v16 = vadd.f32 %v3027_v52, %v3011_v36 }
 0xd32   : > { %v3026_v57 = vmul.f32 0.044715, %v3022_v59  ;;  %v3029_v38 = vadd.f32 %v3025_v29, %v3003_v61 }
 0xd33   : > { %v3035_v62 = vmul.f32 0.7978846, %v3031_v16  ;;  %v3032_v8 = vadd.f32 %v3028_v55, %v3014_v18 }
 0xd34   : > { %v3033_v28 = vmul.f32 0.7978846, %v3029_v38  ;;  %v3030_v63 = vadd.f32 %v3026_v57, %v3006_v32 }
 0xd35   : > { %4471 = vtanh.f32 %v3035_v62  ;;  %v3036_v39 = vmul.f32 0.7978846, %v3032_v8 }
 0xd36   : > { %4473 = vtanh.f32 %v3033_v28  ;;  %v3034_v19 = vmul.f32 0.7978846, %v3030_v63 }
 0xd37   : > { %4475 = vtanh.f32 %v3036_v39 }
 0xd38   : > { %4477 = vtanh.f32 %v3034_v19  ;;  %v3728_v19 = vld [vmem:[#allocation21] ss:$0 sm:$0xff] }
 0xd3f   : > { %v4472_v11 = vpop.eup %4471 }
 0xd40   : > { %v4474_v60 = vpop.eup %4473  ;;  %v3043_v3 = vadd.f32 1.0, %v4472_v11 }
 0xd41   : > { %v4476_v53 = vpop.eup %4475  ;;  %v3041_v46 = vadd.f32 1.0, %v4474_v60 }
 0xd42   : > { %v4478_v5 = vpop.eup %4477  ;;  %v3047_v6 = vmul.f32 0.5, %v3043_v3  ;;  %v3044_v9 = vadd.f32 1.0, %v4476_v53 }
 0xd43   : > { %v3045_v10 = vmul.f32 0.5, %v3041_v46  ;;  %v3042_v12 = vadd.f32 1.0, %v4478_v5  ;;  %v3729_v46 = vld [vmem:[#allocation23] ss:$0 sm:$0xff] }
 0xd44   : > { %v3051_v13 = vmul.f32 %v3047_v6, %v3011_v36  ;;  %v3048_v15 = vmul.f32 0.5, %v3044_v9  ;;  %v4455_v36 = vld [vmem:[#allocation24 + $0x20] ss:$8 sps:$4 sm:$0xff]  }
 0xd45   : > { %v3049_v22 = vmul.f32 %v3045_v10, %v3003_v61  ;;  %v3046_v7 = vmul.f32 0.5, %v3042_v12  ;;  %3222 = vmatpush1.bf16.msra.mxu1 %v4455_v36  ;;  %v4458_v61 = vld [vmem:[#allocation24 + $0x30] ss:$8 sps:$4 sm:$0xff]  }
 0xd46   : > { %3059 = vadd.xlane.f32.xlu1 %v3051_v13  ;;  %v3052_v51 = vmul.f32 %v3048_v15, %v3014_v18  ;;  %3223 = vmatprep.subr.bf16.mxu1 %v4456_v37  ;;  %v4462_v18 = vld [vmem:[#allocation24 + $0x54] ss:$8 sps:$4 sm:$0xff]  }
 0xd47   : > { %3055 = vadd.xlane.f32.xlu0 %v3049_v22  ;;  %v3050_v50 = vmul.f32 %v3046_v7, %v3006_v32  ;;  %v5044_v32 = vmov 0  }
 0xd48   : > { %3249 = vmatprep.mubr.bf16.mxu1 %v5044_v32 }
 0xd49   : > { %3224 = vmatpush1.bf16.msra.mxu1 %v4458_v61 }
 0xd4a   : > { %3061 = vadd.xlane.f32.xlu1 %v3052_v51  ;;  %3225 = vmatprep.subr.bf16.mxu1 %v4459_v49 }
 0xd4b   : > { %3057 = vadd.xlane.f32.xlu0 %v3050_v50 }
 0xd4d   : > { %3226 = vmatpush1.bf16.msra.mxu1 %v4461_v40 }
 0xd4e   : > { %3227 = vmatprep.subr.bf16.mxu1 %v4462_v18 }
 0xd51   : > { %3228 = vmatpush1.bf16.msra.mxu1 %v4464_v21 }
 0xd52   : > { %3229 = vmatprep.subr.bf16.mxu1 %v4465_v41 }
 0xd55   : > { %3230 = vmatpush1.bf16.msra.mxu1 %v4467_v44 }
 0xd56   : > { %3231 = vmatprep.subr.bf16.mxu1 %v4468_v45 }
 0xd59   : > { %3232 = vmatpush1.bf16.msra.mxu1 %v4470_v47 }
 0xdd3   : > { %v3060_v24 = vpop.xlane.xlu1 %3059 }
 0xdd4   : > { %v3056_v26 = vpop.xlane.xlu0 %3055  ;;  %v3065_v27 = vmul.f32 0.0078125, %v3060_v24 }
 0xdd5   : > { %v3063_v30 = vmul.f32 0.0078125, %v3056_v26  ;;  %v3272_v26 = vld [vmem:[#allocation26 + $0x10] sm:$0xff] }
 0xdd6   : > { %v6189_v1 = vsub.f32 %v3051_v13, %v3065_v27 }
 0xdd7   : > { %v3067_v31 = vsub.f32 %v3049_v22, %v3063_v30  ;;  %v3062_v33 = vpop.xlane.xlu1 %3061 }
 0xdd8   : > { %v3058_v58 = vpop.xlane.xlu0 %3057  ;;  %v3066_v25 = vmul.f32 0.0078125, %v3062_v33  ;;  %v3073_v14 = vmul.f32 %v6189_v1, %v6189_v1 }
 0xdd9   : > { %v3064_v42 = vmul.f32 0.0078125, %v3058_v58  ;;  %v3071_v4 = vmul.f32 %v3067_v31, %v3067_v31 }
 0xdda   : > { %v6191_v2 = vsub.f32 %v3052_v51, %v3066_v25 }
 0xddb   : > { %v3068_v0 = vsub.f32 %v3050_v50, %v3064_v42  ;;  %3075 = vadd.xlane.f32.xlu0 %v3071_v4 }
 0xddc   : > { %v3074_v35 = vmul.f32 %v6191_v2, %v6191_v2 }
 0xddd   : > { %v3072_v17 = vmul.f32 %v3068_v0, %v3068_v0 }
 0xddf   : > { %3079 = vadd.xlane.f32.xlu0 %v3073_v14  ;;  %3077 = vadd.xlane.f32.xlu1 %v3072_v17 }
 0xde3   : > { %3081 = vadd.xlane.f32.xlu1 %v3074_v35 }
 0xe68   : > { %v3076_v48 = vpop.xlane.xlu0 %3075 }
 0xe69   : > { %v3083_v52 = vmul.f32 0.0078125, %v3076_v48 }
 0xe6b   : > { %v3087_v34 = vadd.f32 1e-05, %v3083_v52 }
 0xe6c   : > { %v3078_v29 = vpop.xlane.xlu1 %3077  ;;  %v3080_v59 = vpop.xlane.xlu0 %3079 }
 0xe6d   : > { %4479 = vrsqrt.f32 %v3087_v34  ;;  %v3084_v55 = vmul.f32 0.0078125, %v3078_v29  ;;  %v3085_v16 = vmul.f32 0.0078125, %v3080_v59 }
 0xe6f   : > { %v3088_v57 = vadd.f32 1e-05, %v3084_v55  ;;  %v3089_v38 = vadd.f32 1e-05, %v3085_v16 }
 0xe70   : > { %v3082_v62 = vpop.xlane.xlu1 %3081 }
 0xe71   : > { %4481 = vrsqrt.f32 %v3088_v57  ;;  %v3086_v8 = vmul.f32 0.0078125, %v3082_v62 }
 0xe72   : > { %4483 = vrsqrt.f32 %v3089_v38 }
 0xe73   : > { %v3090_v28 = vadd.f32 1e-05, %v3086_v8 }
 0xe75   : > { %4485 = vrsqrt.f32 %v3090_v28 }
 0xe77   : > { %v4480_v63 = vpop.eup %4479 }
 0xe78   : > { %v3095_v39 = vmul.f32 %v4480_v63, %v3067_v31  ;;  %v3273_v31 = vld [vmem:[#allocation26 + $0x18] sm:$0xff] }
 0xe7a   : > { %v3105_v3 = vmul.f32 %v3728_v19, %v3095_v39 }
 0xe7b   : > { %v4482_v11 = vpop.eup %4481 }
 0xe7c   : > { %v3096_v60 = vmul.f32 %v4482_v11, %v3068_v0  ;;  %v4484_v53 = vpop.eup %4483  ;;  %v3115_v9 = vadd.f32 %v3729_v46, %v3105_v3 }
 0xe7d   : > { %v3097_v12 = vmul.f32 %v4484_v53, %v6189_v1 }
 0xe7e   : > { %v3106_v5 = vmul.f32 %v3728_v19, %v3096_v60 }
 0xe7f   : > { %v4486_v6 = vpop.eup %4485  ;;  %v3107_v7 = vmul.f32 %v3728_v19, %v3097_v12 }
 0xe80   : > { %v3116_v10 = vadd.f32 %v3729_v46, %v3106_v5  ;;  %v3098_v13 = vmul.f32 %v4486_v6, %v6191_v2 }
 0xe81   : > { %v3117_v50 = vadd.f32 %v3729_v46, %v3107_v7 }
 0xe82   : > { %v3119_v15 = vpack.c.bf16 %v3116_v10, %v3115_v9  ;;  %v3108_v22 = vmul.f32 %v3728_v19, %v3098_v13 }
 0xe84   : > { %3250 = vmatmul.mubr.bf16.vlgmr.msra.gmra.mrb[0].mxu1 %v3119_v15  ;;  %v3118_v51 = vadd.f32 %v3729_v46, %v3108_v22 }
 0xe85   : > { %3259 = vmatprep.mubr.bf16.mxu1 %v5044_v32 }
 0xe86   : > { %v3120_v20 = vpack.c.bf16 %v3118_v51, %v3117_v50 }
 0xe8c   : > { %3260 = vmatmul.mubr.bf16.gmra.mrb[4].mxu1 %v3120_v20 }
 0xf57   : > { %v3251_v24 = vpop.f32.mrb[0].mxu1 }
 0xf58   : > { %v3274_v27 = vadd.f32 %v3270_v23, %v3251_v24  ;;  %v3253_v30 = vpop.f32.mrb[1].mxu1 }
 0xf59   : > { %v3275_v33 = vadd.f32 %v3271_v43, %v3253_v30  ;;  %v3255_v58 = vpop.f32.mrb[2].mxu1 }
 0xf5a   : > { %3282 = vst [vmem:[#allocation27] sm:$0xff] %v3274_v27  ;;  %v3276_v1 = vadd.f32 %v3272_v26, %v3255_v58  ;;  %v3257_v25 = vpop.f32.mrb[3].mxu1 }
 0xf5b   : > { %3283 = vst [vmem:[#allocation27 + $0x8] sm:$0xff] %v3275_v33  ;;  %v3277_v42 = vadd.f32 %v3273_v31, %v3257_v25 }
 0xf5c   : > { %3284 = vst [vmem:[#allocation27 + $0x10] sm:$0xff] %v3276_v1 }
 0xf5d   : > { %3285 = vst [vmem:[#allocation27 + $0x18] sm:$0xff] %v3277_v42 }
 0xf5f   : > { %v3261_v4 = vpop.f32.mrb[4].mxu1 }
 0xf60   : > { %v3278_v0 = vadd.f32 %v3270_v23, %v3261_v4  ;;  %v3263_v2 = vpop.f32.mrb[5].mxu1 }
 0xf61   : > { %v3279_v14 = vadd.f32 %v3271_v43, %v3263_v2  ;;  %v3265_v17 = vpop.f32.mrb[6].mxu1 }
 0xf62   : > { %3286 = vst [vmem:[#allocation27 + $0x20] sm:$0xff] %v3278_v0  ;;  %v3280_v35 = vadd.f32 %v3272_v26, %v3265_v17  ;;  %v3267_v54 = vpop.f32.mrb[7].mxu1 }
 0xf63   : > { %3287 = vst [vmem:[#allocation27 + $0x28] sm:$0xff] %v3279_v14  ;;  %v3281_v56 = vadd.f32 %v3273_v31, %v3267_v54 }
 0xf64   : > { %3288 = vst [vmem:[#allocation27 + $0x30] sm:$0xff] %v3280_v35 }
 0xf65   : > { %3289 = vst [vmem:[#allocation27 + $0x38] sm:$0xff] %v3281_v56 }
 0xf66 PF: > { %s6378_s0 = sld [smem:[#allocation38_spill]]  ;;  %s5045_s2 = smov [#allocation27]  }
 0xf67   : > { %s3296_s20 = sshll.u32 %s5045_s2, 4  ;;  %s3297_s20 = int_to_ptr.vmem [resolvable:$true] %s3296_s20 }
 0xf68   : > { %s4925_s6 = scalar_lea.vmem %s3297_s20, 1024  ;;  %p4932_p5 = scmp.lt.s32.totalorder %s3297_s20, %s3297_s20 }
 0xf69   : > { %p4926_p0 = scmp.ne.s32.totalorder %s3297_s20, %s4925_s6  ;;  %p4933_p13 = scmp.lt.s32.totalorder %s4925_s6, %s4925_s6 }
 0xf6b   : > { %p4934_p11 = por %p4933_p13, %p4932_p5 }
 0xf6c   : > { %p4085_p10 = scmp.eq.s32.totalorder %s6378_s0, 1 }
 0xf6e   : > { %p4927_p4 = pnand %p4926_p0, %p4085_p10 }
 0xf70   : > { %p4928_p9 = pneg %p4927_p4 }
 0xf72   : > { %p4935_p8 = pnand %p4934_p11, %p4928_p9 }
 0xf74   : > { %4938 = shalt.err (!%p4935_p8)
}
 0xf75   : > { %s6379_s13 = sld [smem:[#allocation59_spill]] }
 0xf7b   : > { %s4939_s1 = scalar_lea.hbm %s6379_s13, 1024 }
 0xf7c   : > { %p4940_p6 = scmp.ne.s32.totalorder %s6379_s13, %s4939_s1  ;;  %p4945_p7 = scmp.lt.u32.totalorder %s4939_s1, %s6379_s13 }
 0xf7e   : > { %p4941_p1 = pnand %p4940_p6, %p4085_p10 }
 0xf80   : > { %p4942_p12 = pneg %p4941_p1 }
 0xf82   : > { %p4947_p2 = pnand %p4945_p7, %p4942_p12 }
 0xf84   : > { %4950 = shalt.err (!%p4947_p2)
}
 0xf85   : > { %s5046_s11 = smov 256   ;;  %s5047_s22 = smov 16  }
 0xf86   : > { %4022 = dma.vmem_to_hbm [thread:$0]  (%p4085_p10), %s3297_s20, 1024, %s6379_s13, [#allocation5], %s5046_s11, %s5046_s11, %s5047_s22  }
 0xf87   : > { %5000 = dma.done.wait (%p4085_p10), [#allocation5], 1024  }
 0xf88   : > { %5002 = vsyncadd (%p4085_p10), [#allocation5], 4294966272 }
 0xf89 PF: > { %s6380_s24 = sld [smem:[#allocation39_spill]]  ;;  %s6381_s1 = sld [smem:[#allocation37_spill]] }
 0xf8a   : > { %s6382_s27 = sld [smem:[#allocation40_spill]]  ;;  %s6383_s22 = smov %s5013_s23 }
 0xf8f   : > { %p46_p3 = scmp.ge.s32.totalorder %s6380_s24, 4  }
 0xf90   : > { %s6384_s23 = smov %s6382_s27 }
 0xf91   :  { %48 = sbr.rel (!%p46_p3) target bundleno = 33 (0x21), region = 274 }
 0xf98   :  { %3312 = vsyncpa [#allocation4], 1 }
 0xf99   :  { %3314 = vsyncpa [#allocation4 + $0x1], 1 }
 0xf9a   :  { %3315 = vsyncpa [#allocation7], 1 }
 0xf9b   :  { %3317 = vsyncpa [#allocation7 + $0x1], 1 }
 0xf9c   :  { %3318 = vsyncpa [#allocation10], 1 }
 0xf9d   :  { %3320 = vsyncpa [#allocation10 + $0x1], 1 }
 0xf9e   :  { %3321 = vsyncpa [#allocation13], 1 }
 0xf9f   :  { %3323 = vsyncpa [#allocation13 + $0x1], 1 }
 0xfa0   :  { %3324 = vsyncpa [#allocation16], 1 }
 0xfa1   :  { %3326 = vsyncpa [#allocation16 + $0x1], 1 }
 0xfa2   :  { %3327 = vsyncpa [#allocation19], 1 }
 0xfa3   :  { %3328 = vsyncpa [#allocation22], 1 }
 0xfa4   :  { %3329 = vsyncpa [#allocation25], 1 }
 0xfa5   :  { %3330 = vsyncpa [#allocation5], 1 }
 0xfa6   :  { %3332 = vsyncpa [#allocation5 + $0x1], 1 }

</bundles_post_ra>
